<compile_context>
chip_gen: v7x
topology: tpu7x:2x2x1
jax: 0.10.0
libtpu: 0.0.40
codegen_flags: <defaults>
</compile_context>

<pallas_src>
import functools
import math

import jax
import jax.numpy as jnp
from jax import lax
from jax.experimental import pallas as pl
from jax.experimental.pallas import tpu as pltpu


# ------------------------------ fused kernel ----------------------------------

def wavenet_fused_kernel(x_ref, sw_ref, sb_ref,
                         wd_ref, bd_ref, wfg_ref, bfg_ref, wsr_ref, bsr_ref,
                         bnsc_ref, bnsh_ref,
                         e1w_ref, e1b_ref, e2w_ref, e2b_ref,
                         hw1_ref, hb1_ref, hw2_ref, hb2_ref, hw3_ref,
                         gw1_ref, gb1_ref, gw2_ref, sc_ref,
                         pu_ref, skips_ref,
                         *, dilations):
    f32 = jnp.float32

    x = x_ref[0]                                  # (1, T)  lane-dense row
    RC = sw_ref.shape[0]
    T = x.shape[1]
    SC = skips_ref.shape[2]

    # start conv (1 -> RC): broadcast outer product, channel-major (RC, T).
    h = sw_ref[...] * x + sb_ref[...]             # (RC, T)

    # Loop-invariant lane-index iota for the causal mask (hoisted out of the loop).
    tidx = lax.broadcasted_iota(jnp.int32, (RC, T), 1)

    skip_sum = None
    for l, d in enumerate(dilations):
        # Causal dilated conv (kernel_size=2):
        #   dil[:, t] = W0 @ h[:, t-d] + W1 @ h[:, t] + b,   h[:, t-d] = 0 for t < d.
        # pltpu.roll matches jnp.roll along lanes: rolled[:, t] = h[:, t-d] (wraps);
        # the iota mask zeroes the wrapped lanes t < d.
        rolled = pltpu.roll(h, shift=d, axis=1)
        h_shift = jnp.where(tidx < d, 0.0, rolled)

        dil = (jnp.dot(wd_ref[l, 0], h_shift, preferred_element_type=f32)
               + jnp.dot(wd_ref[l, 1], h, preferred_element_type=f32)
               + bd_ref[l])                                                  # (GC, T)

        # filter|gate share one stacked weight; slice rows afterwards.
        fg = jnp.dot(wfg_ref[l], dil, preferred_element_type=f32) + bfg_ref[l]   # (2*RC, T)
        filt = jnp.tanh(fg[:RC])
        gate = pl.reciprocal(1.0 + jnp.exp(-fg[RC:]), approx=True)           # sigmoid on EUP
        gated = filt * gate

        # eval-mode BatchNorm1d folded into per-channel scale/shift.
        gated = gated * bnsc_ref[l] + bnsh_ref[l]
        # TODO(synk): Dropout is identity in eval/inference mode (no RNG mask applied).

        # skip|residual share one stacked weight; slice rows afterwards.
        sr = jnp.dot(wsr_ref[l], gated, preferred_element_type=f32) + bsr_ref[l]  # (SC+RC, T)
        skip = sr[:SC]
        h = sr[SC:] + h

        skips_ref[l, 0] = skip                                               # lane-dense store
        skip_sum = skip if skip_sum is None else skip_sum + skip

    # relu(skip_sum) -> relu(end_conv_1) -> relu(end_conv_2)
    s = jnp.maximum(skip_sum, 0.0)
    e = jnp.maximum(jnp.dot(e1w_ref[...], s, preferred_element_type=f32) + e1b_ref[...], 0.0)
    e = jnp.maximum(jnp.dot(e2w_ref[...], e, preferred_element_type=f32) + e2b_ref[...], 0.0)
    # e: (EC, T)

    # Heads: first layers of both heads stacked into one matmul, rows sliced after.
    EC2 = hw1_ref.shape[0] // 2
    h1 = jnp.maximum(jnp.dot(hw1_ref[...], e, preferred_element_type=f32)
                     + hb1_ref[...], 0.0)                                    # (2*EC2, T)

    rows = []
    for hi in range(2):                       # 0 = prediction, 1 = local uncertainty
        h1_i = h1[hi * EC2:(hi + 1) * EC2]                                   # (EC2, T)
        h2 = jnp.maximum(jnp.dot(hw2_ref[hi], h1_i, preferred_element_type=f32)
                         + hb2_ref[hi], 0.0)                                 # (EC4, T)
        y = jnp.sum(h2 * hw3_ref[hi], axis=0, keepdims=True) + sc_ref[hi]    # (1, T)
        rows.append(y)

    pred_row = rows[0]

    # local uncertainty: numerically stable softplus
    yu = rows[1]
    yu = jnp.log(1.0 + jnp.exp(-jnp.abs(yu))) + jnp.maximum(yu, 0.0)

    # global context: AdaptiveAvgPool1d(1) -> 1x1 conv -> relu -> 1x1 conv -> sigmoid.
    # conv(mean_t(e)) == mean_t(conv(e)) by linearity, so pool after the first conv
    # (avoids an N=1 matmul / transpose of the pooled column).
    g = jnp.dot(gw1_ref[...], e, preferred_element_type=f32)                 # (EC4, T)
    hg = jnp.maximum(jnp.mean(g, axis=1, keepdims=True) + gb1_ref[...], 0.0)  # (EC4, 1)
    yg = jnp.sum(hg * gw2_ref[...], axis=0, keepdims=True) + sc_ref[2]       # (1, 1)
    gct = 1.0 / (1.0 + jnp.exp(-yg))

    pu_ref[0, 0:1] = pred_row                                                # (1, T)
    pu_ref[0, 1:2] = yu * gct                                                # (1, T)


# ------------------------------ wrapper ----------------------------------------

def wavenet_forward(x, params):
    """x: (B, T) -> (predictions (B,T), uncertainty (B,T), list of L skips (B,SC,T))."""
    B, T = x.shape
    dilations = tuple(params["dilations"])
    L = len(dilations)
    RC = params["start_w"].shape[0]
    GC = params["wd"].shape[2]
    SC = params["wsr"].shape[1] - RC
    EC = params["e1w"].shape[0]
    EC2 = params["hw1"].shape[0] // 2
    EC4 = params["hw2"].shape[1]

    kernel = functools.partial(wavenet_fused_kernel, dilations=dilations)

    c2 = lambda b: (0, 0)
    c3 = lambda b: (0, 0, 0)
    c4 = lambda b: (0, 0, 0, 0)

    pu, skips = pl.pallas_call(
        kernel,
        out_shape=(
            jax.ShapeDtypeStruct((B, 2, T), jnp.float32),       # rows: [pred, uncertainty]
            jax.ShapeDtypeStruct((L, B, SC, T), jnp.float32),   # lane-dense skip outputs
        ),
        grid=(B,),
        in_specs=[
            pl.BlockSpec((1, 1, T), lambda b: (b, 0, 0)),                     # input row
            pl.BlockSpec((RC, 1), c2), pl.BlockSpec((RC, 1), c2),             # start conv
            pl.BlockSpec((L, 2, GC, RC), c4), pl.BlockSpec((L, GC, 1), c3),   # dilated taps
            pl.BlockSpec((L, 2 * RC, GC), c3), pl.BlockSpec((L, 2 * RC, 1), c3),   # filt|gate
            pl.BlockSpec((L, SC + RC, RC), c3), pl.BlockSpec((L, SC + RC, 1), c3),  # skip|res
            pl.BlockSpec((L, RC, 1), c3), pl.BlockSpec((L, RC, 1), c3),       # bn scale/shift
            pl.BlockSpec((EC, SC), c2), pl.BlockSpec((EC, 1), c2),            # end conv 1
            pl.BlockSpec((EC, EC), c2), pl.BlockSpec((EC, 1), c2),            # end conv 2
            pl.BlockSpec((2 * EC2, EC), c2), pl.BlockSpec((2 * EC2, 1), c2),  # heads layer 1 (stacked)
            pl.BlockSpec((2, EC4, EC2), c3), pl.BlockSpec((2, EC4, 1), c3),   # heads layer 2
            pl.BlockSpec((2, EC4, 1), c3),                                    # heads layer 3
            pl.BlockSpec((EC4, EC), c2), pl.BlockSpec((EC4, 1), c2),          # global ctx 1
            pl.BlockSpec((EC4, 1), c2),                                       # global ctx 2
            pl.BlockSpec(memory_space=pltpu.MemorySpace.SMEM),                # scalar biases
        ],
        out_specs=(
            pl.BlockSpec((1, 2, T), lambda b: (b, 0, 0)),
            pl.BlockSpec((L, 1, SC, T), lambda b: (0, b, 0, 0)),
        ),
        compiler_params=pltpu.CompilerParams(dimension_semantics=("parallel",)),
    )(x[:, None, :],
      params["start_w"], params["start_b"],
      params["wd"], params["bd"], params["wfg"], params["bfg"],
      params["wsr"], params["bsr"], params["bn_scale"], params["bn_shift"],
      params["e1w"], params["e1b"], params["e2w"], params["e2b"],
      params["hw1"], params["hb1"], params["hw2"], params["hb2"], params["hw3"],
      params["gw1"], params["gb1"], params["gw2"], params["scalars"])

    predictions = pu[:, 0, :]
    uncertainty = pu[:, 1, :]
    # per-layer skips in PyTorch's NCT layout: (B, SC, T)
    skip_connections = [skips[l] for l in range(L)]
    return predictions, uncertainty, skip_connections


# ------------------------------ parameters -------------------------------------

def make_params(key, layers, blocks, RC, GC, SC, EC):
    """Weights in the fused-kernel (channel-major) layout.

    Mapping from PyTorch:
      * 1x1 Conv1d (Cout, Cin, 1) -> stored (Cout, Cin) so y = W @ x with x (C, T);
        biases stored as (Cout, 1) columns.
      * dilated conv (GC, RC, 2): stored (2, GC, RC); index 0 = tap acting on
        x[:, t-d], index 1 = tap acting on x[:, t].
      * filter|gate and skip|residual 1x1 convs concatenated along output channels.
      * heads' first layers stacked along output channels (2*EC2, EC).
      * BatchNorm1d folded to per-channel scale/shift (eval-mode defaults here).
      * scalar biases [pred_b3, unc_b3, gc_b2] kept in SMEM.
    """
    keys = iter(jax.random.split(key, 64))

    def w(shape, scale=0.1):
        return scale * jax.random.normal(next(keys), shape, jnp.float32)

    EC2, EC4 = EC // 2, EC // 4
    L = layers * blocks
    dilations = tuple(2 ** l for _ in range(blocks) for l in range(layers))
    bn_eps = 1e-5

    return {
        "dilations": dilations,
        "start_w": w((RC, 1)), "start_b": w((RC, 1)),
        "wd": w((L, 2, GC, RC)), "bd": w((L, GC, 1)),
        "wfg": w((L, 2 * RC, GC)), "bfg": w((L, 2 * RC, 1)),
        "wsr": w((L, SC + RC, RC)), "bsr": w((L, SC + RC, 1)),
        "bn_scale": jnp.full((L, RC, 1), 1.0 / math.sqrt(1.0 + bn_eps), jnp.float32),
        "bn_shift": jnp.zeros((L, RC, 1), jnp.float32),
        "e1w": w((EC, SC)), "e1b": w((EC, 1)),
        "e2w": w((EC, EC)), "e2b": w((EC, 1)),
        # heads: rows [0:EC2] = prediction, [EC2:2*EC2] = uncertainty (layer 1 stacked)
        "hw1": w((2 * EC2, EC)), "hb1": w((2 * EC2, 1)),
        "hw2": w((2, EC4, EC2)), "hb2": w((2, EC4, 1)),
        "hw3": w((2, EC4, 1)),
        # global context
        "gw1": w((EC4, EC)), "gb1": w((EC4, 1)),
        "gw2": w((EC4, 1)),
        # scalar biases [pred_b3, unc_b3, gc_b2]
        "scalars": w((3,)),
    }


# ------------------------------ main --------------------------------------------

if __name__ == "__main__":
    # Small WaveNet config (same architecture, reduced hyper-parameters).
    B, T = 2, 128
    layers, blocks = 2, 2
    RC, GC, SC, EC = 32, 32, 64, 64    # residual / dilation / skip / end channels

    key = jax.random.PRNGKey(0)
    k_param, k_x = jax.random.split(key)
    params = make_params(k_param, layers, blocks, RC, GC, SC, EC)
    x = jax.random.normal(k_x, (B, T), jnp.float32)

    fwd = jax.jit(lambda inp: wavenet_forward(inp, params))
    preds, unc, skips = jax.block_until_ready(fwd(x))

    assert preds.shape == (B, T)
    assert unc.shape == (B, T)
    assert len(skips) == layers * blocks and skips[0].shape == (B, SC, T)
    assert bool(jnp.all(jnp.isfinite(preds))) and bool(jnp.all(jnp.isfinite(unc)))
    assert bool(jnp.all(jnp.isfinite(jnp.stack(skips))))
    print("KERNEL_OK")
</pallas_src>

<mosaic_0001>
module attributes {stable_mosaic.version = 11 : i64} {
  func.func @wavenet_fused_kernel(%arg0: i32, %arg1: memref<1x1x128xf32, #tpu.memory_space<vmem>>, %arg2: memref<32x1xf32, #tpu.memory_space<vmem>>, %arg3: memref<32x1xf32, #tpu.memory_space<vmem>>, %arg4: memref<4x2x32x32xf32, #tpu.memory_space<vmem>>, %arg5: memref<4x32x1xf32, #tpu.memory_space<vmem>>, %arg6: memref<4x64x32xf32, #tpu.memory_space<vmem>>, %arg7: memref<4x64x1xf32, #tpu.memory_space<vmem>>, %arg8: memref<4x96x32xf32, #tpu.memory_space<vmem>>, %arg9: memref<4x96x1xf32, #tpu.memory_space<vmem>>, %arg10: memref<4x32x1xf32, #tpu.memory_space<vmem>>, %arg11: memref<4x32x1xf32, #tpu.memory_space<vmem>>, %arg12: memref<64x64xf32, #tpu.memory_space<vmem>>, %arg13: memref<64x1xf32, #tpu.memory_space<vmem>>, %arg14: memref<64x64xf32, #tpu.memory_space<vmem>>, %arg15: memref<64x1xf32, #tpu.memory_space<vmem>>, %arg16: memref<64x64xf32, #tpu.memory_space<vmem>>, %arg17: memref<64x1xf32, #tpu.memory_space<vmem>>, %arg18: memref<2x16x32xf32, #tpu.memory_space<vmem>>, %arg19: memref<2x16x1xf32, #tpu.memory_space<vmem>>, %arg20: memref<2x16x1xf32, #tpu.memory_space<vmem>>, %arg21: memref<16x64xf32, #tpu.memory_space<vmem>>, %arg22: memref<16x1xf32, #tpu.memory_space<vmem>>, %arg23: memref<16x1xf32, #tpu.memory_space<vmem>>, %arg24: memref<3xf32, #tpu.memory_space<smem>>, %arg25: memref<1x2x128xf32, #tpu.memory_space<vmem>>, %arg26: memref<4x1x64x128xf32, #tpu.memory_space<vmem>>) attributes {dimension_semantics = [#tpu.dimension_semantics<parallel>], iteration_bounds = array<i64: 2>, scalar_prefetch = 0 : i64, scratch_operands = 0 : i64, tpu.core_type = #tpu.core_type<tc>, window_params = [{transform_indices = @transform_0, window_bounds = array<i64: 1, 1, 128>}, {pipeline_mode = #tpu.pipeline_mode<synchronous>, transform_indices = @transform_1, window_bounds = array<i64: 32, 1>}, {pipeline_mode = #tpu.pipeline_mode<synchronous>, transform_indices = @transform_2, window_bounds = array<i64: 32, 1>}, {pipeline_mode = #tpu.pipeline_mode<synchronous>, transform_indices = @transform_3, window_bounds = array<i64: 4, 2, 32, 32>}, {pipeline_mode = #tpu.pipeline_mode<synchronous>, transform_indices = @transform_4, window_bounds = array<i64: 4, 32, 1>}, {pipeline_mode = #tpu.pipeline_mode<synchronous>, transform_indices = @transform_5, window_bounds = array<i64: 4, 64, 32>}, {pipeline_mode = #tpu.pipeline_mode<synchronous>, transform_indices = @transform_6, window_bounds = array<i64: 4, 64, 1>}, {pipeline_mode = #tpu.pipeline_mode<synchronous>, transform_indices = @transform_7, window_bounds = array<i64: 4, 96, 32>}, {pipeline_mode = #tpu.pipeline_mode<synchronous>, transform_indices = @transform_8, window_bounds = array<i64: 4, 96, 1>}, {pipeline_mode = #tpu.pipeline_mode<synchronous>, transform_indices = @transform_9, window_bounds = array<i64: 4, 32, 1>}, {pipeline_mode = #tpu.pipeline_mode<synchronous>, transform_indices = @transform_10, window_bounds = array<i64: 4, 32, 1>}, {pipeline_mode = #tpu.pipeline_mode<synchronous>, transform_indices = @transform_11, window_bounds = array<i64: 64, 64>}, {pipeline_mode = #tpu.pipeline_mode<synchronous>, transform_indices = @transform_12, window_bounds = array<i64: 64, 1>}, {pipeline_mode = #tpu.pipeline_mode<synchronous>, transform_indices = @transform_13, window_bounds = array<i64: 64, 64>}, {pipeline_mode = #tpu.pipeline_mode<synchronous>, transform_indices = @transform_14, window_bounds = array<i64: 64, 1>}, {pipeline_mode = #tpu.pipeline_mode<synchronous>, transform_indices = @transform_15, window_bounds = array<i64: 64, 64>}, {pipeline_mode = #tpu.pipeline_mode<synchronous>, transform_indices = @transform_16, window_bounds = array<i64: 64, 1>}, {pipeline_mode = #tpu.pipeline_mode<synchronous>, transform_indices = @transform_17, window_bounds = array<i64: 2, 16, 32>}, {pipeline_mode = #tpu.pipeline_mode<synchronous>, transform_indices = @transform_18, window_bounds = array<i64: 2, 16, 1>}, {pipeline_mode = #tpu.pipeline_mode<synchronous>, transform_indices = @transform_19, window_bounds = array<i64: 2, 16, 1>}, {pipeline_mode = #tpu.pipeline_mode<synchronous>, transform_indices = @transform_20, window_bounds = array<i64: 16, 64>}, {pipeline_mode = #tpu.pipeline_mode<synchronous>, transform_indices = @transform_21, window_bounds = array<i64: 16, 1>}, {pipeline_mode = #tpu.pipeline_mode<synchronous>, transform_indices = @transform_22, window_bounds = array<i64: 16, 1>}, {transform_indices = @transform_23, window_bounds = array<i64: 3>}, {transform_indices = @transform_24, window_bounds = array<i64: 1, 2, 128>}, {transform_indices = @transform_25, window_bounds = array<i64: 4, 1, 64, 128>}]} {
    %c0 = arith.constant 0 : index
    %c0_0 = arith.constant 0 : index
    %c0_1 = arith.constant 0 : index
    %0 = vector.load %arg1[%c0, %c0_0, %c0_1] : memref<1x1x128xf32, #tpu.memory_space<vmem>>, vector<1x1x128xf32>
    %1 = vector.shape_cast %0 : vector<1x1x128xf32> to vector<1x128xf32>
    %c0_2 = arith.constant 0 : index
    %c0_3 = arith.constant 0 : index
    %2 = vector.load %arg2[%c0_2, %c0_3] : memref<32x1xf32, #tpu.memory_space<vmem>>, vector<32x1xf32>
    %3 = vector.broadcast %2 : vector<32x1xf32> to vector<32x128xf32>
    %4 = vector.broadcast %1 : vector<1x128xf32> to vector<32x128xf32>
    %5 = arith.mulf %3, %4 : vector<32x128xf32>
    %c0_4 = arith.constant 0 : index
    %c0_5 = arith.constant 0 : index
    %6 = vector.load %arg3[%c0_4, %c0_5] : memref<32x1xf32, #tpu.memory_space<vmem>>, vector<32x1xf32>
    %7 = vector.broadcast %6 : vector<32x1xf32> to vector<32x128xf32>
    %8 = arith.addf %5, %7 : vector<32x128xf32>
    %9 = tpu.iota {dimensions = array<i32: 1>} : vector<32x128xi32>
    %c1_i32 = arith.constant 1 : i32
    %10 = tpu.dynamic_rotate %8 by %c1_i32 dim 1 : vector<32x128xf32>, i32 -> vector<32x128xf32>
    %c1_i32_6 = arith.constant 1 : i32
    %11 = vector.broadcast %c1_i32_6 : i32 to vector<32x128xi32>
    %12 = arith.cmpi slt, %9, %11 : vector<32x128xi32>
    %cst = arith.constant 0.000000e+00 : f32
    %13 = vector.broadcast %cst : f32 to vector<32x128xf32>
    %14 = arith.select %12, %13, %10 : vector<32x128xi1>, vector<32x128xf32>
    %c0_7 = arith.constant 0 : index
    %c0_8 = arith.constant 0 : index
    %c0_9 = arith.constant 0 : index
    %c0_10 = arith.constant 0 : index
    %15 = vector.load %arg4[%c0_7, %c0_8, %c0_9, %c0_10] : memref<4x2x32x32xf32, #tpu.memory_space<vmem>>, vector<1x1x32x32xf32>
    %16 = vector.shape_cast %15 : vector<1x1x32x32xf32> to vector<32x32xf32>
    %cst_11 = arith.constant dense<0.000000e+00> : vector<32x128xf32>
    %17 = tpu.matmul %16, %14, %cst_11 {dimension_numbers = #tpu.dot_dimension_numbers<[1], [0], [0], [1], [0, 0, 1, 1], [], []>} : vector<32x32xf32>, vector<32x128xf32>, vector<32x128xf32> -> vector<32x128xf32>
    %c0_12 = arith.constant 0 : index
    %c1 = arith.constant 1 : index
    %c0_13 = arith.constant 0 : index
    %c0_14 = arith.constant 0 : index
    %18 = vector.load %arg4[%c0_12, %c1, %c0_13, %c0_14] : memref<4x2x32x32xf32, #tpu.memory_space<vmem>>, vector<1x1x32x32xf32>
    %19 = vector.shape_cast %18 : vector<1x1x32x32xf32> to vector<32x32xf32>
    %cst_15 = arith.constant dense<0.000000e+00> : vector<32x128xf32>
    %20 = tpu.matmul %19, %8, %cst_15 {dimension_numbers = #tpu.dot_dimension_numbers<[1], [0], [0], [1], [0, 0, 1, 1], [], []>} : vector<32x32xf32>, vector<32x128xf32>, vector<32x128xf32> -> vector<32x128xf32>
    %21 = arith.addf %17, %20 : vector<32x128xf32>
    %c0_16 = arith.constant 0 : index
    %c0_17 = arith.constant 0 : index
    %c0_18 = arith.constant 0 : index
    %22 = vector.load %arg5[%c0_16, %c0_17, %c0_18] : memref<4x32x1xf32, #tpu.memory_space<vmem>>, vector<1x32x1xf32>
    %23 = vector.shape_cast %22 : vector<1x32x1xf32> to vector<32x1xf32>
    %24 = vector.broadcast %23 : vector<32x1xf32> to vector<32x128xf32>
    %25 = arith.addf %21, %24 : vector<32x128xf32>
    %c0_19 = arith.constant 0 : index
    %c0_20 = arith.constant 0 : index
    %c0_21 = arith.constant 0 : index
    %26 = vector.load %arg6[%c0_19, %c0_20, %c0_21] : memref<4x64x32xf32, #tpu.memory_space<vmem>>, vector<1x64x32xf32>
    %27 = vector.shape_cast %26 : vector<1x64x32xf32> to vector<64x32xf32>
    %cst_22 = arith.constant dense<0.000000e+00> : vector<64x128xf32>
    %28 = tpu.matmul %27, %25, %cst_22 {dimension_numbers = #tpu.dot_dimension_numbers<[1], [0], [0], [1], [0, 0, 1, 1], [], []>} : vector<64x32xf32>, vector<32x128xf32>, vector<64x128xf32> -> vector<64x128xf32>
    %c0_23 = arith.constant 0 : index
    %c0_24 = arith.constant 0 : index
    %c0_25 = arith.constant 0 : index
    %29 = vector.load %arg7[%c0_23, %c0_24, %c0_25] : memref<4x64x1xf32, #tpu.memory_space<vmem>>, vector<1x64x1xf32>
    %30 = vector.shape_cast %29 : vector<1x64x1xf32> to vector<64x1xf32>
    %31 = vector.broadcast %30 : vector<64x1xf32> to vector<64x128xf32>
    %32 = arith.addf %28, %31 : vector<64x128xf32>
    %33 = vector.extract_strided_slice %32 {offsets = [0, 0], sizes = [32, 128], strides = [1, 1]} : vector<64x128xf32> to vector<32x128xf32>
    %34 = math.tanh %33 : vector<32x128xf32>
    %35 = vector.extract_strided_slice %32 {offsets = [32, 0], sizes = [32, 128], strides = [1, 1]} : vector<64x128xf32> to vector<32x128xf32>
    %cst_26 = arith.constant 0.000000e+00 : f32
    %36 = vector.broadcast %cst_26 : f32 to vector<32x128xf32>
    %37 = arith.subf %36, %35 : vector<32x128xf32>
    %38 = math.exp %37 : vector<32x128xf32>
    %cst_27 = arith.constant 1.000000e+00 : f32
    %39 = vector.broadcast %cst_27 : f32 to vector<32x128xf32>
    %40 = arith.addf %39, %38 : vector<32x128xf32>
    %41 = tpu.reciprocal %40 {approx = true} : vector<32x128xf32> -> vector<32x128xf32>
    %42 = arith.mulf %34, %41 : vector<32x128xf32>
    %c0_28 = arith.constant 0 : index
    %c0_29 = arith.constant 0 : index
    %c0_30 = arith.constant 0 : index
    %43 = vector.load %arg10[%c0_28, %c0_29, %c0_30] : memref<4x32x1xf32, #tpu.memory_space<vmem>>, vector<1x32x1xf32>
    %44 = vector.shape_cast %43 : vector<1x32x1xf32> to vector<32x1xf32>
    %45 = vector.broadcast %44 : vector<32x1xf32> to vector<32x128xf32>
    %46 = arith.mulf %42, %45 : vector<32x128xf32>
    %c0_31 = arith.constant 0 : index
    %c0_32 = arith.constant 0 : index
    %c0_33 = arith.constant 0 : index
    %47 = vector.load %arg11[%c0_31, %c0_32, %c0_33] : memref<4x32x1xf32, #tpu.memory_space<vmem>>, vector<1x32x1xf32>
    %48 = vector.shape_cast %47 : vector<1x32x1xf32> to vector<32x1xf32>
    %49 = vector.broadcast %48 : vector<32x1xf32> to vector<32x128xf32>
    %50 = arith.addf %46, %49 : vector<32x128xf32>
    %c0_34 = arith.constant 0 : index
    %c0_35 = arith.constant 0 : index
    %c0_36 = arith.constant 0 : index
    %51 = vector.load %arg8[%c0_34, %c0_35, %c0_36] : memref<4x96x32xf32, #tpu.memory_space<vmem>>, vector<1x96x32xf32>
    %52 = vector.shape_cast %51 : vector<1x96x32xf32> to vector<96x32xf32>
    %cst_37 = arith.constant dense<0.000000e+00> : vector<96x128xf32>
    %53 = tpu.matmul %52, %50, %cst_37 {dimension_numbers = #tpu.dot_dimension_numbers<[1], [0], [0], [1], [0, 0, 1, 1], [], []>} : vector<96x32xf32>, vector<32x128xf32>, vector<96x128xf32> -> vector<96x128xf32>
    %c0_38 = arith.constant 0 : index
    %c0_39 = arith.constant 0 : index
    %c0_40 = arith.constant 0 : index
    %54 = vector.load %arg9[%c0_38, %c0_39, %c0_40] : memref<4x96x1xf32, #tpu.memory_space<vmem>>, vector<1x96x1xf32>
    %55 = vector.shape_cast %54 : vector<1x96x1xf32> to vector<96x1xf32>
    %56 = vector.broadcast %55 : vector<96x1xf32> to vector<96x128xf32>
    %57 = arith.addf %53, %56 : vector<96x128xf32>
    %58 = vector.extract_strided_slice %57 {offsets = [0, 0], sizes = [64, 128], strides = [1, 1]} : vector<96x128xf32> to vector<64x128xf32>
    %59 = vector.extract_strided_slice %57 {offsets = [64, 0], sizes = [32, 128], strides = [1, 1]} : vector<96x128xf32> to vector<32x128xf32>
    %60 = arith.addf %59, %8 : vector<32x128xf32>
    %c0_41 = arith.constant 0 : index
    %c0_42 = arith.constant 0 : index
    %c0_43 = arith.constant 0 : index
    %c0_44 = arith.constant 0 : index
    %61 = vector.load %arg26[%c0_41, %c0_42, %c0_43, %c0_44] : memref<4x1x64x128xf32, #tpu.memory_space<vmem>>, vector<1x1x64x128xf32>
    %62 = vector.shape_cast %61 : vector<1x1x64x128xf32> to vector<64x128xf32>
    %63 = vector.shape_cast %58 : vector<64x128xf32> to vector<1x1x64x128xf32>
    tpu.vector_store %arg26[%c0_41, %c0_42, %c0_43, %c0_44], %63 {strides = array<i32>} : memref<4x1x64x128xf32, #tpu.memory_space<vmem>>, vector<1x1x64x128xf32>,
    %c2_i32 = arith.constant 2 : i32
    %64 = tpu.dynamic_rotate %60 by %c2_i32 dim 1 : vector<32x128xf32>, i32 -> vector<32x128xf32>
    %c2_i32_45 = arith.constant 2 : i32
    %65 = vector.broadcast %c2_i32_45 : i32 to vector<32x128xi32>
    %66 = arith.cmpi slt, %9, %65 : vector<32x128xi32>
    %cst_46 = arith.constant 0.000000e+00 : f32
    %67 = vector.broadcast %cst_46 : f32 to vector<32x128xf32>
    %68 = arith.select %66, %67, %64 : vector<32x128xi1>, vector<32x128xf32>
    %c1_47 = arith.constant 1 : index
    %c0_48 = arith.constant 0 : index
    %c0_49 = arith.constant 0 : index
    %c0_50 = arith.constant 0 : index
    %69 = vector.load %arg4[%c1_47, %c0_48, %c0_49, %c0_50] : memref<4x2x32x32xf32, #tpu.memory_space<vmem>>, vector<1x1x32x32xf32>
    %70 = vector.shape_cast %69 : vector<1x1x32x32xf32> to vector<32x32xf32>
    %cst_51 = arith.constant dense<0.000000e+00> : vector<32x128xf32>
    %71 = tpu.matmul %70, %68, %cst_51 {dimension_numbers = #tpu.dot_dimension_numbers<[1], [0], [0], [1], [0, 0, 1, 1], [], []>} : vector<32x32xf32>, vector<32x128xf32>, vector<32x128xf32> -> vector<32x128xf32>
    %c1_52 = arith.constant 1 : index
    %c1_53 = arith.constant 1 : index
    %c0_54 = arith.constant 0 : index
    %c0_55 = arith.constant 0 : index
    %72 = vector.load %arg4[%c1_52, %c1_53, %c0_54, %c0_55] : memref<4x2x32x32xf32, #tpu.memory_space<vmem>>, vector<1x1x32x32xf32>
    %73 = vector.shape_cast %72 : vector<1x1x32x32xf32> to vector<32x32xf32>
    %cst_56 = arith.constant dense<0.000000e+00> : vector<32x128xf32>
    %74 = tpu.matmul %73, %60, %cst_56 {dimension_numbers = #tpu.dot_dimension_numbers<[1], [0], [0], [1], [0, 0, 1, 1], [], []>} : vector<32x32xf32>, vector<32x128xf32>, vector<32x128xf32> -> vector<32x128xf32>
    %75 = arith.addf %71, %74 : vector<32x128xf32>
    %c1_57 = arith.constant 1 : index
    %c0_58 = arith.constant 0 : index
    %c0_59 = arith.constant 0 : index
    %76 = vector.load %arg5[%c1_57, %c0_58, %c0_59] : memref<4x32x1xf32, #tpu.memory_space<vmem>>, vector<1x32x1xf32>
    %77 = vector.shape_cast %76 : vector<1x32x1xf32> to vector<32x1xf32>
    %78 = vector.broadcast %77 : vector<32x1xf32> to vector<32x128xf32>
    %79 = arith.addf %75, %78 : vector<32x128xf32>
    %c1_60 = arith.constant 1 : index
    %c0_61 = arith.constant 0 : index
    %c0_62 = arith.constant 0 : index
    %80 = vector.load %arg6[%c1_60, %c0_61, %c0_62] : memref<4x64x32xf32, #tpu.memory_space<vmem>>, vector<1x64x32xf32>
    %81 = vector.shape_cast %80 : vector<1x64x32xf32> to vector<64x32xf32>
    %cst_63 = arith.constant dense<0.000000e+00> : vector<64x128xf32>
    %82 = tpu.matmul %81, %79, %cst_63 {dimension_numbers = #tpu.dot_dimension_numbers<[1], [0], [0], [1], [0, 0, 1, 1], [], []>} : vector<64x32xf32>, vector<32x128xf32>, vector<64x128xf32> -> vector<64x128xf32>
    %c1_64 = arith.constant 1 : index
    %c0_65 = arith.constant 0 : index
    %c0_66 = arith.constant 0 : index
    %83 = vector.load %arg7[%c1_64, %c0_65, %c0_66] : memref<4x64x1xf32, #tpu.memory_space<vmem>>, vector<1x64x1xf32>
    %84 = vector.shape_cast %83 : vector<1x64x1xf32> to vector<64x1xf32>
    %85 = vector.broadcast %84 : vector<64x1xf32> to vector<64x128xf32>
    %86 = arith.addf %82, %85 : vector<64x128xf32>
    %87 = vector.extract_strided_slice %86 {offsets = [0, 0], sizes = [32, 128], strides = [1, 1]} : vector<64x128xf32> to vector<32x128xf32>
    %88 = math.tanh %87 : vector<32x128xf32>
    %89 = vector.extract_strided_slice %86 {offsets = [32, 0], sizes = [32, 128], strides = [1, 1]} : vector<64x128xf32> to vector<32x128xf32>
    %cst_67 = arith.constant 0.000000e+00 : f32
    %90 = vector.broadcast %cst_67 : f32 to vector<32x128xf32>
    %91 = arith.subf %90, %89 : vector<32x128xf32>
    %92 = math.exp %91 : vector<32x128xf32>
    %cst_68 = arith.constant 1.000000e+00 : f32
    %93 = vector.broadcast %cst_68 : f32 to vector<32x128xf32>
    %94 = arith.addf %93, %92 : vector<32x128xf32>
    %95 = tpu.reciprocal %94 {approx = true} : vector<32x128xf32> -> vector<32x128xf32>
    %96 = arith.mulf %88, %95 : vector<32x128xf32>
    %c1_69 = arith.constant 1 : index
    %c0_70 = arith.constant 0 : index
    %c0_71 = arith.constant 0 : index
    %97 = vector.load %arg10[%c1_69, %c0_70, %c0_71] : memref<4x32x1xf32, #tpu.memory_space<vmem>>, vector<1x32x1xf32>
    %98 = vector.shape_cast %97 : vector<1x32x1xf32> to vector<32x1xf32>
    %99 = vector.broadcast %98 : vector<32x1xf32> to vector<32x128xf32>
    %100 = arith.mulf %96, %99 : vector<32x128xf32>
    %c1_72 = arith.constant 1 : index
    %c0_73 = arith.constant 0 : index
    %c0_74 = arith.constant 0 : index
    %101 = vector.load %arg11[%c1_72, %c0_73, %c0_74] : memref<4x32x1xf32, #tpu.memory_space<vmem>>, vector<1x32x1xf32>
    %102 = vector.shape_cast %101 : vector<1x32x1xf32> to vector<32x1xf32>
    %103 = vector.broadcast %102 : vector<32x1xf32> to vector<32x128xf32>
    %104 = arith.addf %100, %103 : vector<32x128xf32>
    %c1_75 = arith.constant 1 : index
    %c0_76 = arith.constant 0 : index
    %c0_77 = arith.constant 0 : index
    %105 = vector.load %arg8[%c1_75, %c0_76, %c0_77] : memref<4x96x32xf32, #tpu.memory_space<vmem>>, vector<1x96x32xf32>
    %106 = vector.shape_cast %105 : vector<1x96x32xf32> to vector<96x32xf32>
    %cst_78 = arith.constant dense<0.000000e+00> : vector<96x128xf32>
    %107 = tpu.matmul %106, %104, %cst_78 {dimension_numbers = #tpu.dot_dimension_numbers<[1], [0], [0], [1], [0, 0, 1, 1], [], []>} : vector<96x32xf32>, vector<32x128xf32>, vector<96x128xf32> -> vector<96x128xf32>
    %c1_79 = arith.constant 1 : index
    %c0_80 = arith.constant 0 : index
    %c0_81 = arith.constant 0 : index
    %108 = vector.load %arg9[%c1_79, %c0_80, %c0_81] : memref<4x96x1xf32, #tpu.memory_space<vmem>>, vector<1x96x1xf32>
    %109 = vector.shape_cast %108 : vector<1x96x1xf32> to vector<96x1xf32>
    %110 = vector.broadcast %109 : vector<96x1xf32> to vector<96x128xf32>
    %111 = arith.addf %107, %110 : vector<96x128xf32>
    %112 = vector.extract_strided_slice %111 {offsets = [0, 0], sizes = [64, 128], strides = [1, 1]} : vector<96x128xf32> to vector<64x128xf32>
    %113 = vector.extract_strided_slice %111 {offsets = [64, 0], sizes = [32, 128], strides = [1, 1]} : vector<96x128xf32> to vector<32x128xf32>
    %114 = arith.addf %113, %60 : vector<32x128xf32>
    %c1_82 = arith.constant 1 : index
    %c0_83 = arith.constant 0 : index
    %c0_84 = arith.constant 0 : index
    %c0_85 = arith.constant 0 : index
    %115 = vector.load %arg26[%c1_82, %c0_83, %c0_84, %c0_85] : memref<4x1x64x128xf32, #tpu.memory_space<vmem>>, vector<1x1x64x128xf32>
    %116 = vector.shape_cast %115 : vector<1x1x64x128xf32> to vector<64x128xf32>
    %117 = vector.shape_cast %112 : vector<64x128xf32> to vector<1x1x64x128xf32>
    tpu.vector_store %arg26[%c1_82, %c0_83, %c0_84, %c0_85], %117 {strides = array<i32>} : memref<4x1x64x128xf32, #tpu.memory_space<vmem>>, vector<1x1x64x128xf32>,
    %118 = arith.addf %58, %112 : vector<64x128xf32>
    %c1_i32_86 = arith.constant 1 : i32
    %119 = tpu.dynamic_rotate %114 by %c1_i32_86 dim 1 : vector<32x128xf32>, i32 -> vector<32x128xf32>
    %c1_i32_87 = arith.constant 1 : i32
    %120 = vector.broadcast %c1_i32_87 : i32 to vector<32x128xi32>
    %121 = arith.cmpi slt, %9, %120 : vector<32x128xi32>
    %cst_88 = arith.constant 0.000000e+00 : f32
    %122 = vector.broadcast %cst_88 : f32 to vector<32x128xf32>
    %123 = arith.select %121, %122, %119 : vector<32x128xi1>, vector<32x128xf32>
    %c2 = arith.constant 2 : index
    %c0_89 = arith.constant 0 : index
    %c0_90 = arith.constant 0 : index
    %c0_91 = arith.constant 0 : index
    %124 = vector.load %arg4[%c2, %c0_89, %c0_90, %c0_91] : memref<4x2x32x32xf32, #tpu.memory_space<vmem>>, vector<1x1x32x32xf32>
    %125 = vector.shape_cast %124 : vector<1x1x32x32xf32> to vector<32x32xf32>
    %cst_92 = arith.constant dense<0.000000e+00> : vector<32x128xf32>
    %126 = tpu.matmul %125, %123, %cst_92 {dimension_numbers = #tpu.dot_dimension_numbers<[1], [0], [0], [1], [0, 0, 1, 1], [], []>} : vector<32x32xf32>, vector<32x128xf32>, vector<32x128xf32> -> vector<32x128xf32>
    %c2_93 = arith.constant 2 : index
    %c1_94 = arith.constant 1 : index
    %c0_95 = arith.constant 0 : index
    %c0_96 = arith.constant 0 : index
    %127 = vector.load %arg4[%c2_93, %c1_94, %c0_95, %c0_96] : memref<4x2x32x32xf32, #tpu.memory_space<vmem>>, vector<1x1x32x32xf32>
    %128 = vector.shape_cast %127 : vector<1x1x32x32xf32> to vector<32x32xf32>
    %cst_97 = arith.constant dense<0.000000e+00> : vector<32x128xf32>
    %129 = tpu.matmul %128, %114, %cst_97 {dimension_numbers = #tpu.dot_dimension_numbers<[1], [0], [0], [1], [0, 0, 1, 1], [], []>} : vector<32x32xf32>, vector<32x128xf32>, vector<32x128xf32> -> vector<32x128xf32>
    %130 = arith.addf %126, %129 : vector<32x128xf32>
    %c2_98 = arith.constant 2 : index
    %c0_99 = arith.constant 0 : index
    %c0_100 = arith.constant 0 : index
    %131 = vector.load %arg5[%c2_98, %c0_99, %c0_100] : memref<4x32x1xf32, #tpu.memory_space<vmem>>, vector<1x32x1xf32>
    %132 = vector.shape_cast %131 : vector<1x32x1xf32> to vector<32x1xf32>
    %133 = vector.broadcast %132 : vector<32x1xf32> to vector<32x128xf32>
    %134 = arith.addf %130, %133 : vector<32x128xf32>
    %c2_101 = arith.constant 2 : index
    %c0_102 = arith.constant 0 : index
    %c0_103 = arith.constant 0 : index
    %135 = vector.load %arg6[%c2_101, %c0_102, %c0_103] : memref<4x64x32xf32, #tpu.memory_space<vmem>>, vector<1x64x32xf32>
    %136 = vector.shape_cast %135 : vector<1x64x32xf32> to vector<64x32xf32>
    %cst_104 = arith.constant dense<0.000000e+00> : vector<64x128xf32>
    %137 = tpu.matmul %136, %134, %cst_104 {dimension_numbers = #tpu.dot_dimension_numbers<[1], [0], [0], [1], [0, 0, 1, 1], [], []>} : vector<64x32xf32>, vector<32x128xf32>, vector<64x128xf32> -> vector<64x128xf32>
    %c2_105 = arith.constant 2 : index
    %c0_106 = arith.constant 0 : index
    %c0_107 = arith.constant 0 : index
    %138 = vector.load %arg7[%c2_105, %c0_106, %c0_107] : memref<4x64x1xf32, #tpu.memory_space<vmem>>, vector<1x64x1xf32>
    %139 = vector.shape_cast %138 : vector<1x64x1xf32> to vector<64x1xf32>
    %140 = vector.broadcast %139 : vector<64x1xf32> to vector<64x128xf32>
    %141 = arith.addf %137, %140 : vector<64x128xf32>
    %142 = vector.extract_strided_slice %141 {offsets = [0, 0], sizes = [32, 128], strides = [1, 1]} : vector<64x128xf32> to vector<32x128xf32>
    %143 = math.tanh %142 : vector<32x128xf32>
    %144 = vector.extract_strided_slice %141 {offsets = [32, 0], sizes = [32, 128], strides = [1, 1]} : vector<64x128xf32> to vector<32x128xf32>
    %cst_108 = arith.constant 0.000000e+00 : f32
    %145 = vector.broadcast %cst_108 : f32 to vector<32x128xf32>
    %146 = arith.subf %145, %144 : vector<32x128xf32>
    %147 = math.exp %146 : vector<32x128xf32>
    %cst_109 = arith.constant 1.000000e+00 : f32
    %148 = vector.broadcast %cst_109 : f32 to vector<32x128xf32>
    %149 = arith.addf %148, %147 : vector<32x128xf32>
    %150 = tpu.reciprocal %149 {approx = true} : vector<32x128xf32> -> vector<32x128xf32>
    %151 = arith.mulf %143, %150 : vector<32x128xf32>
    %c2_110 = arith.constant 2 : index
    %c0_111 = arith.constant 0 : index
    %c0_112 = arith.constant 0 : index
    %152 = vector.load %arg10[%c2_110, %c0_111, %c0_112] : memref<4x32x1xf32, #tpu.memory_space<vmem>>, vector<1x32x1xf32>
    %153 = vector.shape_cast %152 : vector<1x32x1xf32> to vector<32x1xf32>
    %154 = vector.broadcast %153 : vector<32x1xf32> to vector<32x128xf32>
    %155 = arith.mulf %151, %154 : vector<32x128xf32>
    %c2_113 = arith.constant 2 : index
    %c0_114 = arith.constant 0 : index
    %c0_115 = arith.constant 0 : index
    %156 = vector.load %arg11[%c2_113, %c0_114, %c0_115] : memref<4x32x1xf32, #tpu.memory_space<vmem>>, vector<1x32x1xf32>
    %157 = vector.shape_cast %156 : vector<1x32x1xf32> to vector<32x1xf32>
    %158 = vector.broadcast %157 : vector<32x1xf32> to vector<32x128xf32>
    %159 = arith.addf %155, %158 : vector<32x128xf32>
    %c2_116 = arith.constant 2 : index
    %c0_117 = arith.constant 0 : index
    %c0_118 = arith.constant 0 : index
    %160 = vector.load %arg8[%c2_116, %c0_117, %c0_118] : memref<4x96x32xf32, #tpu.memory_space<vmem>>, vector<1x96x32xf32>
    %161 = vector.shape_cast %160 : vector<1x96x32xf32> to vector<96x32xf32>
    %cst_119 = arith.constant dense<0.000000e+00> : vector<96x128xf32>
    %162 = tpu.matmul %161, %159, %cst_119 {dimension_numbers = #tpu.dot_dimension_numbers<[1], [0], [0], [1], [0, 0, 1, 1], [], []>} : vector<96x32xf32>, vector<32x128xf32>, vector<96x128xf32> -> vector<96x128xf32>
    %c2_120 = arith.constant 2 : index
    %c0_121 = arith.constant 0 : index
    %c0_122 = arith.constant 0 : index
    %163 = vector.load %arg9[%c2_120, %c0_121, %c0_122] : memref<4x96x1xf32, #tpu.memory_space<vmem>>, vector<1x96x1xf32>
    %164 = vector.shape_cast %163 : vector<1x96x1xf32> to vector<96x1xf32>
    %165 = vector.broadcast %164 : vector<96x1xf32> to vector<96x128xf32>
    %166 = arith.addf %162, %165 : vector<96x128xf32>
    %167 = vector.extract_strided_slice %166 {offsets = [0, 0], sizes = [64, 128], strides = [1, 1]} : vector<96x128xf32> to vector<64x128xf32>
    %168 = vector.extract_strided_slice %166 {offsets = [64, 0], sizes = [32, 128], strides = [1, 1]} : vector<96x128xf32> to vector<32x128xf32>
    %169 = arith.addf %168, %114 : vector<32x128xf32>
    %c2_123 = arith.constant 2 : index
    %c0_124 = arith.constant 0 : index
    %c0_125 = arith.constant 0 : index
    %c0_126 = arith.constant 0 : index
    %170 = vector.load %arg26[%c2_123, %c0_124, %c0_125, %c0_126] : memref<4x1x64x128xf32, #tpu.memory_space<vmem>>, vector<1x1x64x128xf32>
    %171 = vector.shape_cast %170 : vector<1x1x64x128xf32> to vector<64x128xf32>
    %172 = vector.shape_cast %167 : vector<64x128xf32> to vector<1x1x64x128xf32>
    tpu.vector_store %arg26[%c2_123, %c0_124, %c0_125, %c0_126], %172 {strides = array<i32>} : memref<4x1x64x128xf32, #tpu.memory_space<vmem>>, vector<1x1x64x128xf32>,
    %173 = arith.addf %118, %167 : vector<64x128xf32>
    %c2_i32_127 = arith.constant 2 : i32
    %174 = tpu.dynamic_rotate %169 by %c2_i32_127 dim 1 : vector<32x128xf32>, i32 -> vector<32x128xf32>
    %c2_i32_128 = arith.constant 2 : i32
    %175 = vector.broadcast %c2_i32_128 : i32 to vector<32x128xi32>
    %176 = arith.cmpi slt, %9, %175 : vector<32x128xi32>
    %cst_129 = arith.constant 0.000000e+00 : f32
    %177 = vector.broadcast %cst_129 : f32 to vector<32x128xf32>
    %178 = arith.select %176, %177, %174 : vector<32x128xi1>, vector<32x128xf32>
    %c3 = arith.constant 3 : index
    %c0_130 = arith.constant 0 : index
    %c0_131 = arith.constant 0 : index
    %c0_132 = arith.constant 0 : index
    %179 = vector.load %arg4[%c3, %c0_130, %c0_131, %c0_132] : memref<4x2x32x32xf32, #tpu.memory_space<vmem>>, vector<1x1x32x32xf32>
    %180 = vector.shape_cast %179 : vector<1x1x32x32xf32> to vector<32x32xf32>
    %cst_133 = arith.constant dense<0.000000e+00> : vector<32x128xf32>
    %181 = tpu.matmul %180, %178, %cst_133 {dimension_numbers = #tpu.dot_dimension_numbers<[1], [0], [0], [1], [0, 0, 1, 1], [], []>} : vector<32x32xf32>, vector<32x128xf32>, vector<32x128xf32> -> vector<32x128xf32>
    %c3_134 = arith.constant 3 : index
    %c1_135 = arith.constant 1 : index
    %c0_136 = arith.constant 0 : index
    %c0_137 = arith.constant 0 : index
    %182 = vector.load %arg4[%c3_134, %c1_135, %c0_136, %c0_137] : memref<4x2x32x32xf32, #tpu.memory_space<vmem>>, vector<1x1x32x32xf32>
    %183 = vector.shape_cast %182 : vector<1x1x32x32xf32> to vector<32x32xf32>
    %cst_138 = arith.constant dense<0.000000e+00> : vector<32x128xf32>
    %184 = tpu.matmul %183, %169, %cst_138 {dimension_numbers = #tpu.dot_dimension_numbers<[1], [0], [0], [1], [0, 0, 1, 1], [], []>} : vector<32x32xf32>, vector<32x128xf32>, vector<32x128xf32> -> vector<32x128xf32>
    %185 = arith.addf %181, %184 : vector<32x128xf32>
    %c3_139 = arith.constant 3 : index
    %c0_140 = arith.constant 0 : index
    %c0_141 = arith.constant 0 : index
    %186 = vector.load %arg5[%c3_139, %c0_140, %c0_141] : memref<4x32x1xf32, #tpu.memory_space<vmem>>, vector<1x32x1xf32>
    %187 = vector.shape_cast %186 : vector<1x32x1xf32> to vector<32x1xf32>
    %188 = vector.broadcast %187 : vector<32x1xf32> to vector<32x128xf32>
    %189 = arith.addf %185, %188 : vector<32x128xf32>
    %c3_142 = arith.constant 3 : index
    %c0_143 = arith.constant 0 : index
    %c0_144 = arith.constant 0 : index
    %190 = vector.load %arg6[%c3_142, %c0_143, %c0_144] : memref<4x64x32xf32, #tpu.memory_space<vmem>>, vector<1x64x32xf32>
    %191 = vector.shape_cast %190 : vector<1x64x32xf32> to vector<64x32xf32>
    %cst_145 = arith.constant dense<0.000000e+00> : vector<64x128xf32>
    %192 = tpu.matmul %191, %189, %cst_145 {dimension_numbers = #tpu.dot_dimension_numbers<[1], [0], [0], [1], [0, 0, 1, 1], [], []>} : vector<64x32xf32>, vector<32x128xf32>, vector<64x128xf32> -> vector<64x128xf32>
    %c3_146 = arith.constant 3 : index
    %c0_147 = arith.constant 0 : index
    %c0_148 = arith.constant 0 : index
    %193 = vector.load %arg7[%c3_146, %c0_147, %c0_148] : memref<4x64x1xf32, #tpu.memory_space<vmem>>, vector<1x64x1xf32>
    %194 = vector.shape_cast %193 : vector<1x64x1xf32> to vector<64x1xf32>
    %195 = vector.broadcast %194 : vector<64x1xf32> to vector<64x128xf32>
    %196 = arith.addf %192, %195 : vector<64x128xf32>
    %197 = vector.extract_strided_slice %196 {offsets = [0, 0], sizes = [32, 128], strides = [1, 1]} : vector<64x128xf32> to vector<32x128xf32>
    %198 = math.tanh %197 : vector<32x128xf32>
    %199 = vector.extract_strided_slice %196 {offsets = [32, 0], sizes = [32, 128], strides = [1, 1]} : vector<64x128xf32> to vector<32x128xf32>
    %cst_149 = arith.constant 0.000000e+00 : f32
    %200 = vector.broadcast %cst_149 : f32 to vector<32x128xf32>
    %201 = arith.subf %200, %199 : vector<32x128xf32>
    %202 = math.exp %201 : vector<32x128xf32>
    %cst_150 = arith.constant 1.000000e+00 : f32
    %203 = vector.broadcast %cst_150 : f32 to vector<32x128xf32>
    %204 = arith.addf %203, %202 : vector<32x128xf32>
    %205 = tpu.reciprocal %204 {approx = true} : vector<32x128xf32> -> vector<32x128xf32>
    %206 = arith.mulf %198, %205 : vector<32x128xf32>
    %c3_151 = arith.constant 3 : index
    %c0_152 = arith.constant 0 : index
    %c0_153 = arith.constant 0 : index
    %207 = vector.load %arg10[%c3_151, %c0_152, %c0_153] : memref<4x32x1xf32, #tpu.memory_space<vmem>>, vector<1x32x1xf32>
    %208 = vector.shape_cast %207 : vector<1x32x1xf32> to vector<32x1xf32>
    %209 = vector.broadcast %208 : vector<32x1xf32> to vector<32x128xf32>
    %210 = arith.mulf %206, %209 : vector<32x128xf32>
    %c3_154 = arith.constant 3 : index
    %c0_155 = arith.constant 0 : index
    %c0_156 = arith.constant 0 : index
    %211 = vector.load %arg11[%c3_154, %c0_155, %c0_156] : memref<4x32x1xf32, #tpu.memory_space<vmem>>, vector<1x32x1xf32>
    %212 = vector.shape_cast %211 : vector<1x32x1xf32> to vector<32x1xf32>
    %213 = vector.broadcast %212 : vector<32x1xf32> to vector<32x128xf32>
    %214 = arith.addf %210, %213 : vector<32x128xf32>
    %c3_157 = arith.constant 3 : index
    %c0_158 = arith.constant 0 : index
    %c0_159 = arith.constant 0 : index
    %215 = vector.load %arg8[%c3_157, %c0_158, %c0_159] : memref<4x96x32xf32, #tpu.memory_space<vmem>>, vector<1x96x32xf32>
    %216 = vector.shape_cast %215 : vector<1x96x32xf32> to vector<96x32xf32>
    %cst_160 = arith.constant dense<0.000000e+00> : vector<96x128xf32>
    %217 = tpu.matmul %216, %214, %cst_160 {dimension_numbers = #tpu.dot_dimension_numbers<[1], [0], [0], [1], [0, 0, 1, 1], [], []>} : vector<96x32xf32>, vector<32x128xf32>, vector<96x128xf32> -> vector<96x128xf32>
    %c3_161 = arith.constant 3 : index
    %c0_162 = arith.constant 0 : index
    %c0_163 = arith.constant 0 : index
    %218 = vector.load %arg9[%c3_161, %c0_162, %c0_163] : memref<4x96x1xf32, #tpu.memory_space<vmem>>, vector<1x96x1xf32>
    %219 = vector.shape_cast %218 : vector<1x96x1xf32> to vector<96x1xf32>
    %220 = vector.broadcast %219 : vector<96x1xf32> to vector<96x128xf32>
    %221 = arith.addf %217, %220 : vector<96x128xf32>
    %222 = vector.extract_strided_slice %221 {offsets = [0, 0], sizes = [64, 128], strides = [1, 1]} : vector<96x128xf32> to vector<64x128xf32>
    %c3_164 = arith.constant 3 : index
    %c0_165 = arith.constant 0 : index
    %c0_166 = arith.constant 0 : index
    %c0_167 = arith.constant 0 : index
    %223 = vector.load %arg26[%c3_164, %c0_165, %c0_166, %c0_167] : memref<4x1x64x128xf32, #tpu.memory_space<vmem>>, vector<1x1x64x128xf32>
    %224 = vector.shape_cast %223 : vector<1x1x64x128xf32> to vector<64x128xf32>
    %225 = vector.shape_cast %222 : vector<64x128xf32> to vector<1x1x64x128xf32>
    tpu.vector_store %arg26[%c3_164, %c0_165, %c0_166, %c0_167], %225 {strides = array<i32>} : memref<4x1x64x128xf32, #tpu.memory_space<vmem>>, vector<1x1x64x128xf32>,
    %226 = arith.addf %173, %222 : vector<64x128xf32>
    %cst_168 = arith.constant 0.000000e+00 : f32
    %227 = vector.broadcast %cst_168 : f32 to vector<64x128xf32>
    %228 = arith.maximumf %226, %227 : vector<64x128xf32>
    %c0_169 = arith.constant 0 : index
    %c0_170 = arith.constant 0 : index
    %229 = vector.load %arg12[%c0_169, %c0_170] : memref<64x64xf32, #tpu.memory_space<vmem>>, vector<64x64xf32>
    %cst_171 = arith.constant dense<0.000000e+00> : vector<64x128xf32>
    %230 = tpu.matmul %229, %228, %cst_171 {dimension_numbers = #tpu.dot_dimension_numbers<[1], [0], [0], [1], [0, 0, 1, 1], [], []>} : vector<64x64xf32>, vector<64x128xf32>, vector<64x128xf32> -> vector<64x128xf32>
    %c0_172 = arith.constant 0 : index
    %c0_173 = arith.constant 0 : index
    %231 = vector.load %arg13[%c0_172, %c0_173] : memref<64x1xf32, #tpu.memory_space<vmem>>, vector<64x1xf32>
    %232 = vector.broadcast %231 : vector<64x1xf32> to vector<64x128xf32>
    %233 = arith.addf %230, %232 : vector<64x128xf32>
    %cst_174 = arith.constant 0.000000e+00 : f32
    %234 = vector.broadcast %cst_174 : f32 to vector<64x128xf32>
    %235 = arith.maximumf %233, %234 : vector<64x128xf32>
    %c0_175 = arith.constant 0 : index
    %c0_176 = arith.constant 0 : index
    %236 = vector.load %arg14[%c0_175, %c0_176] : memref<64x64xf32, #tpu.memory_space<vmem>>, vector<64x64xf32>
    %cst_177 = arith.constant dense<0.000000e+00> : vector<64x128xf32>
    %237 = tpu.matmul %236, %235, %cst_177 {dimension_numbers = #tpu.dot_dimension_numbers<[1], [0], [0], [1], [0, 0, 1, 1], [], []>} : vector<64x64xf32>, vector<64x128xf32>, vector<64x128xf32> -> vector<64x128xf32>
    %c0_178 = arith.constant 0 : index
    %c0_179 = arith.constant 0 : index
    %238 = vector.load %arg15[%c0_178, %c0_179] : memref<64x1xf32, #tpu.memory_space<vmem>>, vector<64x1xf32>
    %239 = vector.broadcast %238 : vector<64x1xf32> to vector<64x128xf32>
    %240 = arith.addf %237, %239 : vector<64x128xf32>
    %cst_180 = arith.constant 0.000000e+00 : f32
    %241 = vector.broadcast %cst_180 : f32 to vector<64x128xf32>
    %242 = arith.maximumf %240, %241 : vector<64x128xf32>
    %c0_181 = arith.constant 0 : index
    %c0_182 = arith.constant 0 : index
    %243 = vector.load %arg16[%c0_181, %c0_182] : memref<64x64xf32, #tpu.memory_space<vmem>>, vector<64x64xf32>
    %cst_183 = arith.constant dense<0.000000e+00> : vector<64x128xf32>
    %244 = tpu.matmul %243, %242, %cst_183 {dimension_numbers = #tpu.dot_dimension_numbers<[1], [0], [0], [1], [0, 0, 1, 1], [], []>} : vector<64x64xf32>, vector<64x128xf32>, vector<64x128xf32> -> vector<64x128xf32>
    %c0_184 = arith.constant 0 : index
    %c0_185 = arith.constant 0 : index
    %245 = vector.load %arg17[%c0_184, %c0_185] : memref<64x1xf32, #tpu.memory_space<vmem>>, vector<64x1xf32>
    %246 = vector.broadcast %245 : vector<64x1xf32> to vector<64x128xf32>
    %247 = arith.addf %244, %246 : vector<64x128xf32>
    %cst_186 = arith.constant 0.000000e+00 : f32
    %248 = vector.broadcast %cst_186 : f32 to vector<64x128xf32>
    %249 = arith.maximumf %247, %248 : vector<64x128xf32>
    %250 = vector.extract_strided_slice %249 {offsets = [0, 0], sizes = [32, 128], strides = [1, 1]} : vector<64x128xf32> to vector<32x128xf32>
    %c0_187 = arith.constant 0 : index
    %c0_188 = arith.constant 0 : index
    %c0_189 = arith.constant 0 : index
    %251 = vector.load %arg18[%c0_187, %c0_188, %c0_189] : memref<2x16x32xf32, #tpu.memory_space<vmem>>, vector<1x16x32xf32>
    %252 = vector.shape_cast %251 : vector<1x16x32xf32> to vector<16x32xf32>
    %cst_190 = arith.constant dense<0.000000e+00> : vector<16x128xf32>
    %253 = tpu.matmul %252, %250, %cst_190 {dimension_numbers = #tpu.dot_dimension_numbers<[1], [0], [0], [1], [0, 0, 1, 1], [], []>} : vector<16x32xf32>, vector<32x128xf32>, vector<16x128xf32> -> vector<16x128xf32>
    %c0_191 = arith.constant 0 : index
    %c0_192 = arith.constant 0 : index
    %c0_193 = arith.constant 0 : index
    %254 = vector.load %arg19[%c0_191, %c0_192, %c0_193] : memref<2x16x1xf32, #tpu.memory_space<vmem>>, vector<1x16x1xf32>
    %255 = vector.shape_cast %254 : vector<1x16x1xf32> to vector<16x1xf32>
    %256 = vector.broadcast %255 : vector<16x1xf32> to vector<16x128xf32>
    %257 = arith.addf %253, %256 : vector<16x128xf32>
    %cst_194 = arith.constant 0.000000e+00 : f32
    %258 = vector.broadcast %cst_194 : f32 to vector<16x128xf32>
    %259 = arith.maximumf %257, %258 : vector<16x128xf32>
    %c0_195 = arith.constant 0 : index
    %c0_196 = arith.constant 0 : index
    %c0_197 = arith.constant 0 : index
    %260 = vector.load %arg20[%c0_195, %c0_196, %c0_197] : memref<2x16x1xf32, #tpu.memory_space<vmem>>, vector<1x16x1xf32>
    %261 = vector.shape_cast %260 : vector<1x16x1xf32> to vector<16x1xf32>
    %262 = vector.broadcast %261 : vector<16x1xf32> to vector<16x128xf32>
    %263 = arith.mulf %259, %262 : vector<16x128xf32>
    %cst_198 = arith.constant dense<0.000000e+00> : vector<128xf32>
    %264 = vector.multi_reduction <add>, %263, %cst_198 [0] : vector<16x128xf32> to vector<128xf32>
    %265 = vector.shape_cast %264 : vector<128xf32> to vector<1x128xf32>
    %c0_199 = arith.constant 0 : index
    %266 = memref.load %arg24[%c0_199] : memref<3xf32, #tpu.memory_space<smem>>
    %267 = vector.broadcast %266 : f32 to vector<1x128xf32>
    %268 = arith.addf %265, %267 : vector<1x128xf32>
    %269 = vector.extract_strided_slice %249 {offsets = [32, 0], sizes = [32, 128], strides = [1, 1]} : vector<64x128xf32> to vector<32x128xf32>
    %c1_200 = arith.constant 1 : index
    %c0_201 = arith.constant 0 : index
    %c0_202 = arith.constant 0 : index
    %270 = vector.load %arg18[%c1_200, %c0_201, %c0_202] : memref<2x16x32xf32, #tpu.memory_space<vmem>>, vector<1x16x32xf32>
    %271 = vector.shape_cast %270 : vector<1x16x32xf32> to vector<16x32xf32>
    %cst_203 = arith.constant dense<0.000000e+00> : vector<16x128xf32>
    %272 = tpu.matmul %271, %269, %cst_203 {dimension_numbers = #tpu.dot_dimension_numbers<[1], [0], [0], [1], [0, 0, 1, 1], [], []>} : vector<16x32xf32>, vector<32x128xf32>, vector<16x128xf32> -> vector<16x128xf32>
    %c1_204 = arith.constant 1 : index
    %c0_205 = arith.constant 0 : index
    %c0_206 = arith.constant 0 : index
    %273 = vector.load %arg19[%c1_204, %c0_205, %c0_206] : memref<2x16x1xf32, #tpu.memory_space<vmem>>, vector<1x16x1xf32>
    %274 = vector.shape_cast %273 : vector<1x16x1xf32> to vector<16x1xf32>
    %275 = vector.broadcast %274 : vector<16x1xf32> to vector<16x128xf32>
    %276 = arith.addf %272, %275 : vector<16x128xf32>
    %cst_207 = arith.constant 0.000000e+00 : f32
    %277 = vector.broadcast %cst_207 : f32 to vector<16x128xf32>
    %278 = arith.maximumf %276, %277 : vector<16x128xf32>
    %c1_208 = arith.constant 1 : index
    %c0_209 = arith.constant 0 : index
    %c0_210 = arith.constant 0 : index
    %279 = vector.load %arg20[%c1_208, %c0_209, %c0_210] : memref<2x16x1xf32, #tpu.memory_space<vmem>>, vector<1x16x1xf32>
    %280 = vector.shape_cast %279 : vector<1x16x1xf32> to vector<16x1xf32>
    %281 = vector.broadcast %280 : vector<16x1xf32> to vector<16x128xf32>
    %282 = arith.mulf %278, %281 : vector<16x128xf32>
    %cst_211 = arith.constant dense<0.000000e+00> : vector<128xf32>
    %283 = vector.multi_reduction <add>, %282, %cst_211 [0] : vector<16x128xf32> to vector<128xf32>
    %284 = vector.shape_cast %283 : vector<128xf32> to vector<1x128xf32>
    %c1_212 = arith.constant 1 : index
    %285 = memref.load %arg24[%c1_212] : memref<3xf32, #tpu.memory_space<smem>>
    %286 = vector.broadcast %285 : f32 to vector<1x128xf32>
    %287 = arith.addf %284, %286 : vector<1x128xf32>
    %288 = math.absf %287 : vector<1x128xf32>
    %cst_213 = arith.constant 0.000000e+00 : f32
    %289 = vector.broadcast %cst_213 : f32 to vector<1x128xf32>
    %290 = arith.subf %289, %288 : vector<1x128xf32>
    %291 = math.exp %290 : vector<1x128xf32>
    %cst_214 = arith.constant 1.000000e+00 : f32
    %292 = vector.broadcast %cst_214 : f32 to vector<1x128xf32>
    %293 = arith.addf %292, %291 : vector<1x128xf32>
    %294 = math.log %293 : vector<1x128xf32>
    %cst_215 = arith.constant 0.000000e+00 : f32
    %295 = vector.broadcast %cst_215 : f32 to vector<1x128xf32>
    %296 = arith.maximumf %287, %295 : vector<1x128xf32>
    %297 = arith.addf %294, %296 : vector<1x128xf32>
    %c0_216 = arith.constant 0 : index
    %c0_217 = arith.constant 0 : index
    %298 = vector.load %arg21[%c0_216, %c0_217] : memref<16x64xf32, #tpu.memory_space<vmem>>, vector<16x64xf32>
    %cst_218 = arith.constant dense<0.000000e+00> : vector<16x128xf32>
    %299 = tpu.matmul %298, %242, %cst_218 {dimension_numbers = #tpu.dot_dimension_numbers<[1], [0], [0], [1], [0, 0, 1, 1], [], []>} : vector<16x64xf32>, vector<64x128xf32>, vector<16x128xf32> -> vector<16x128xf32>
    %cst_219 = arith.constant dense<0.000000e+00> : vector<16xf32>
    %300 = vector.multi_reduction <add>, %299, %cst_219 [1] : vector<16x128xf32> to vector<16xf32>
    %301 = vector.shape_cast %300 : vector<16xf32> to vector<16x1xf32>
    %cst_220 = arith.constant 1.280000e+02 : f32
    %302 = vector.broadcast %cst_220 : f32 to vector<16x1xf32>
    %303 = arith.divf %301, %302 : vector<16x1xf32>
    %c0_221 = arith.constant 0 : index
    %c0_222 = arith.constant 0 : index
    %304 = vector.load %arg22[%c0_221, %c0_222] : memref<16x1xf32, #tpu.memory_space<vmem>>, vector<16x1xf32>
    %305 = arith.addf %303, %304 : vector<16x1xf32>
    %cst_223 = arith.constant 0.000000e+00 : f32
    %306 = vector.broadcast %cst_223 : f32 to vector<16x1xf32>
    %307 = arith.maximumf %305, %306 : vector<16x1xf32>
    %c0_224 = arith.constant 0 : index
    %c0_225 = arith.constant 0 : index
    %308 = vector.load %arg23[%c0_224, %c0_225] : memref<16x1xf32, #tpu.memory_space<vmem>>, vector<16x1xf32>
    %309 = arith.mulf %307, %308 : vector<16x1xf32>
    %cst_226 = arith.constant dense<0.000000e+00> : vector<1xf32>
    %310 = vector.multi_reduction <add>, %309, %cst_226 [0] : vector<16x1xf32> to vector<1xf32>
    %311 = vector.shape_cast %310 : vector<1xf32> to vector<1x1xf32>
    %c2_227 = arith.constant 2 : index
    %312 = memref.load %arg24[%c2_227] : memref<3xf32, #tpu.memory_space<smem>>
    %313 = vector.broadcast %312 : f32 to vector<1x1xf32>
    %314 = arith.addf %311, %313 : vector<1x1xf32>
    %cst_228 = arith.constant 0.000000e+00 : f32
    %315 = vector.broadcast %cst_228 : f32 to vector<1x1xf32>
    %316 = arith.subf %315, %314 : vector<1x1xf32>
    %317 = math.exp %316 : vector<1x1xf32>
    %cst_229 = arith.constant 1.000000e+00 : f32
    %318 = vector.broadcast %cst_229 : f32 to vector<1x1xf32>
    %319 = arith.addf %318, %317 : vector<1x1xf32>
    %cst_230 = arith.constant 1.000000e+00 : f32
    %320 = vector.broadcast %cst_230 : f32 to vector<1x1xf32>
    %321 = arith.divf %320, %319 : vector<1x1xf32>
    %c0_231 = arith.constant 0 : index
    %c0_232 = arith.constant 0 : index
    %c0_233 = arith.constant 0 : index
    %322 = vector.load %arg25[%c0_231, %c0_232, %c0_233] : memref<1x2x128xf32, #tpu.memory_space<vmem>>, vector<1x1x128xf32>
    %323 = vector.shape_cast %322 : vector<1x1x128xf32> to vector<1x128xf32>
    %324 = vector.shape_cast %268 : vector<1x128xf32> to vector<1x1x128xf32>
    tpu.vector_store %arg25[%c0_231, %c0_232, %c0_233], %324 {strides = array<i32>} : memref<1x2x128xf32, #tpu.memory_space<vmem>>, vector<1x1x128xf32>,
    %325 = vector.broadcast %321 : vector<1x1xf32> to vector<1x128xf32>
    %326 = arith.mulf %297, %325 : vector<1x128xf32>
    %c0_234 = arith.constant 0 : index
    %c1_235 = arith.constant 1 : index
    %c0_236 = arith.constant 0 : index
    %327 = vector.load %arg25[%c0_234, %c1_235, %c0_236] : memref<1x2x128xf32, #tpu.memory_space<vmem>>, vector<1x1x128xf32>
    %328 = vector.shape_cast %327 : vector<1x1x128xf32> to vector<1x128xf32>
    %329 = vector.shape_cast %326 : vector<1x128xf32> to vector<1x1x128xf32>
    tpu.vector_store %arg25[%c0_234, %c1_235, %c0_236], %329 {strides = array<i32>} : memref<1x2x128xf32, #tpu.memory_space<vmem>>, vector<1x1x128xf32>,
    return
  }
  func.func @transform_0(%arg0: i32) -> (i32, i32, i32) {
    %c0_i32 = arith.constant 0 : i32
    %c0_i32_0 = arith.constant 0 : i32
    %c0_i32_1 = arith.constant 0 : i32
    return %arg0, %c0_i32, %c0_i32_0 : i32, i32, i32
  }
  func.func @transform_1(%arg0: i32) -> (i32, i32) {
    %c0_i32 = arith.constant 0 : i32
    %c0_i32_0 = arith.constant 0 : i32
    %c0_i32_1 = arith.constant 0 : i32
    return %c0_i32, %c0_i32_0 : i32, i32
  }
  func.func @transform_2(%arg0: i32) -> (i32, i32) {
    %c0_i32 = arith.constant 0 : i32
    %c0_i32_0 = arith.constant 0 : i32
    %c0_i32_1 = arith.constant 0 : i32
    return %c0_i32, %c0_i32_0 : i32, i32
  }
  func.func @transform_3(%arg0: i32) -> (i32, i32, i32, i32) {
    %c0_i32 = arith.constant 0 : i32
    %c0_i32_0 = arith.constant 0 : i32
    %c0_i32_1 = arith.constant 0 : i32
    %c0_i32_2 = arith.constant 0 : i32
    %c0_i32_3 = arith.constant 0 : i32
    return %c0_i32, %c0_i32_0, %c0_i32_1, %c0_i32_2 : i32, i32, i32, i32
  }
  func.func @transform_4(%arg0: i32) -> (i32, i32, i32) {
    %c0_i32 = arith.constant 0 : i32
    %c0_i32_0 = arith.constant 0 : i32
    %c0_i32_1 = arith.constant 0 : i32
    %c0_i32_2 = arith.constant 0 : i32
    return %c0_i32, %c0_i32_0, %c0_i32_1 : i32, i32, i32
  }
  func.func @transform_5(%arg0: i32) -> (i32, i32, i32) {
    %c0_i32 = arith.constant 0 : i32
    %c0_i32_0 = arith.constant 0 : i32
    %c0_i32_1 = arith.constant 0 : i32
    %c0_i32_2 = arith.constant 0 : i32
    return %c0_i32, %c0_i32_0, %c0_i32_1 : i32, i32, i32
  }
  func.func @transform_6(%arg0: i32) -> (i32, i32, i32) {
    %c0_i32 = arith.constant 0 : i32
    %c0_i32_0 = arith.constant 0 : i32
    %c0_i32_1 = arith.constant 0 : i32
    %c0_i32_2 = arith.constant 0 : i32
    return %c0_i32, %c0_i32_0, %c0_i32_1 : i32, i32, i32
  }
  func.func @transform_7(%arg0: i32) -> (i32, i32, i32) {
    %c0_i32 = arith.constant 0 : i32
    %c0_i32_0 = arith.constant 0 : i32
    %c0_i32_1 = arith.constant 0 : i32
    %c0_i32_2 = arith.constant 0 : i32
    return %c0_i32, %c0_i32_0, %c0_i32_1 : i32, i32, i32
  }
  func.func @transform_8(%arg0: i32) -> (i32, i32, i32) {
    %c0_i32 = arith.constant 0 : i32
    %c0_i32_0 = arith.constant 0 : i32
    %c0_i32_1 = arith.constant 0 : i32
    %c0_i32_2 = arith.constant 0 : i32
    return %c0_i32, %c0_i32_0, %c0_i32_1 : i32, i32, i32
  }
  func.func @transform_9(%arg0: i32) -> (i32, i32, i32) {
    %c0_i32 = arith.constant 0 : i32
    %c0_i32_0 = arith.constant 0 : i32
    %c0_i32_1 = arith.constant 0 : i32
    %c0_i32_2 = arith.constant 0 : i32
    return %c0_i32, %c0_i32_0, %c0_i32_1 : i32, i32, i32
  }
  func.func @transform_10(%arg0: i32) -> (i32, i32, i32) {
    %c0_i32 = arith.constant 0 : i32
    %c0_i32_0 = arith.constant 0 : i32
    %c0_i32_1 = arith.constant 0 : i32
    %c0_i32_2 = arith.constant 0 : i32
    return %c0_i32, %c0_i32_0, %c0_i32_1 : i32, i32, i32
  }
  func.func @transform_11(%arg0: i32) -> (i32, i32) {
    %c0_i32 = arith.constant 0 : i32
    %c0_i32_0 = arith.constant 0 : i32
    %c0_i32_1 = arith.constant 0 : i32
    return %c0_i32, %c0_i32_0 : i32, i32
  }
  func.func @transform_12(%arg0: i32) -> (i32, i32) {
    %c0_i32 = arith.constant 0 : i32
    %c0_i32_0 = arith.constant 0 : i32
    %c0_i32_1 = arith.constant 0 : i32
    return %c0_i32, %c0_i32_0 : i32, i32
  }
  func.func @transform_13(%arg0: i32) -> (i32, i32) {
    %c0_i32 = arith.constant 0 : i32
    %c0_i32_0 = arith.constant 0 : i32
    %c0_i32_1 = arith.constant 0 : i32
    return %c0_i32, %c0_i32_0 : i32, i32
  }
  func.func @transform_14(%arg0: i32) -> (i32, i32) {
    %c0_i32 = arith.constant 0 : i32
    %c0_i32_0 = arith.constant 0 : i32
    %c0_i32_1 = arith.constant 0 : i32
    return %c0_i32, %c0_i32_0 : i32, i32
  }
  func.func @transform_15(%arg0: i32) -> (i32, i32) {
    %c0_i32 = arith.constant 0 : i32
    %c0_i32_0 = arith.constant 0 : i32
    %c0_i32_1 = arith.constant 0 : i32
    return %c0_i32, %c0_i32_0 : i32, i32
  }
  func.func @transform_16(%arg0: i32) -> (i32, i32) {
    %c0_i32 = arith.constant 0 : i32
    %c0_i32_0 = arith.constant 0 : i32
    %c0_i32_1 = arith.constant 0 : i32
    return %c0_i32, %c0_i32_0 : i32, i32
  }
  func.func @transform_17(%arg0: i32) -> (i32, i32, i32) {
    %c0_i32 = arith.constant 0 : i32
    %c0_i32_0 = arith.constant 0 : i32
    %c0_i32_1 = arith.constant 0 : i32
    %c0_i32_2 = arith.constant 0 : i32
    return %c0_i32, %c0_i32_0, %c0_i32_1 : i32, i32, i32
  }
  func.func @transform_18(%arg0: i32) -> (i32, i32, i32) {
    %c0_i32 = arith.constant 0 : i32
    %c0_i32_0 = arith.constant 0 : i32
    %c0_i32_1 = arith.constant 0 : i32
    %c0_i32_2 = arith.constant 0 : i32
    return %c0_i32, %c0_i32_0, %c0_i32_1 : i32, i32, i32
  }
  func.func @transform_19(%arg0: i32) -> (i32, i32, i32) {
    %c0_i32 = arith.constant 0 : i32
    %c0_i32_0 = arith.constant 0 : i32
    %c0_i32_1 = arith.constant 0 : i32
    %c0_i32_2 = arith.constant 0 : i32
    return %c0_i32, %c0_i32_0, %c0_i32_1 : i32, i32, i32
  }
  func.func @transform_20(%arg0: i32) -> (i32, i32) {
    %c0_i32 = arith.constant 0 : i32
    %c0_i32_0 = arith.constant 0 : i32
    %c0_i32_1 = arith.constant 0 : i32
    return %c0_i32, %c0_i32_0 : i32, i32
  }
  func.func @transform_21(%arg0: i32) -> (i32, i32) {
    %c0_i32 = arith.constant 0 : i32
    %c0_i32_0 = arith.constant 0 : i32
    %c0_i32_1 = arith.constant 0 : i32
    return %c0_i32, %c0_i32_0 : i32, i32
  }
  func.func @transform_22(%arg0: i32) -> (i32, i32) {
    %c0_i32 = arith.constant 0 : i32
    %c0_i32_0 = arith.constant 0 : i32
    %c0_i32_1 = arith.constant 0 : i32
    return %c0_i32, %c0_i32_0 : i32, i32
  }
  func.func @transform_23(%arg0: i32) -> i32 {
    %c0_i32 = arith.constant 0 : i32
    %c0_i32_0 = arith.constant 0 : i32
    return %c0_i32 : i32
  }
  func.func @transform_24(%arg0: i32) -> (i32, i32, i32) {
    %c0_i32 = arith.constant 0 : i32
    %c0_i32_0 = arith.constant 0 : i32
    %c0_i32_1 = arith.constant 0 : i32
    return %arg0, %c0_i32, %c0_i32_0 : i32, i32, i32
  }
  func.func @transform_25(%arg0: i32) -> (i32, i32, i32, i32) {
    %c0_i32 = arith.constant 0 : i32
    %c0_i32_0 = arith.constant 0 : i32
    %c0_i32_1 = arith.constant 0 : i32
    %c0_i32_2 = arith.constant 0 : i32
    return %c0_i32, %arg0, %c0_i32_0, %c0_i32_1 : i32, i32, i32, i32
  }
}

</mosaic_0001>

<bundles_post_ra>
// kernel: _lambda_.1
= control target key start
LH: loop header
LB: loop body
LE: loop exit
PB: predicated region body
PF: predicated region fallthrough
CT: control target
= control target key end

     0   :  { %s9301_s0 = inlined_call_operand.hbm [shape: f32[2,1,128], index: 0, kind: input, shape index: {}]   ;;  %s9302_s1 = inlined_call_operand.hbm [shape: f32[32,1], index: 1, kind: input, shape index: {}]   ;;  %s9303_s2 = inlined_call_operand.hbm [shape: f32[32,1], index: 2, kind: input, shape index: {}]   ;;  %s9304_s3 = inlined_call_operand.hbm [shape: f32[4,2,32,32], index: 3, kind: input, shape index: {}]   ;;  %s9305_s4 = inlined_call_operand.hbm [shape: f32[4,32,1], index: 4, kind: input, shape index: {}]   ;;  %s9306_s5 = inlined_call_operand.hbm [shape: f32[4,64,32], index: 5, kind: input, shape index: {}]   ;;  %s9307_s6 = inlined_call_operand.vmem [shape: f32[4,64,1], index: 6, kind: input, shape index: {}]   ;;  %s9308_s7 = inlined_call_operand.hbm [shape: f32[4,96,32], index: 7, kind: input, shape index: {}]   ;;  %s9309_s8 = inlined_call_operand.hbm [shape: f32[4,96,1], index: 8, kind: input, shape index: {}]   ;;  %s9310_s9 = inlined_call_operand.vmem [shape: f32[4,32,1], index: 9, kind: input, shape index: {}]   ;;  %s9311_s10 = inlined_call_operand.vmem [shape: f32[4,32,1], index: 10, kind: input, shape index: {}]   ;;  %s9312_s11 = inlined_call_operand.hbm [shape: f32[64,64], index: 11, kind: input, shape index: {}]   ;;  %s9313_s12 = inlined_call_operand.hbm [shape: f32[64,1], index: 12, kind: input, shape index: {}]   ;;  %s9314_s13 = inlined_call_operand.hbm [shape: f32[64,64], index: 13, kind: input, shape index: {}]   ;;  %s9315_s14 = inlined_call_operand.hbm [shape: f32[64,1], index: 14, kind: input, shape index: {}]   ;;  %s9316_s15 = inlined_call_operand.hbm [shape: f32[64,64], index: 15, kind: input, shape index: {}]   ;;  %s9317_s16 = inlined_call_operand.vmem [shape: f32[64,1], index: 16, kind: input, shape index: {}]   ;;  %s9318_s17 = inlined_call_operand.hbm [shape: f32[2,16,32], index: 17, kind: input, shape index: {}]   ;;  %s9319_s18 = inlined_call_operand.hbm [shape: f32[2,16,1], index: 18, kind: input, shape index: {}]   ;;  %s9320_s19 = inlined_call_operand.hbm [shape: f32[2,16,1], index: 19, kind: input, shape index: {}]   ;;  %s9321_s20 = inlined_call_operand.hbm [shape: f32[16,64], index: 20, kind: input, shape index: {}]   ;;  %s9322_s21 = inlined_call_operand.hbm [shape: f32[16,1], index: 21, kind: input, shape index: {}]   ;;  %s9323_s22 = inlined_call_operand.vmem [shape: f32[16,1], index: 22, kind: input, shape index: {}]   ;;  %s9324_s23 = inlined_call_operand.vmem [shape: f32[3], index: 23, kind: input, shape index: {}]   ;;  %s9325_s24 = inlined_call_operand.vmem [shape: f32[2,2,128], index: 24, kind: output, shape index: {0}]   ;;  %s9326_s25 = inlined_call_operand.vmem [shape: f32[4,2,64,128], index: 25, kind: output, shape index: {1}]  }
   0x1   :  { %9356 = sst [smem:[#allocation49_spill]] %s9301_s0 }
   0x2   :  { %9357 = sst [smem:[#allocation50_spill]] %s9302_s1 }
   0x3   :  { %9358 = sst [smem:[#allocation51_spill]] %s9303_s2 }
   0x4   :  { %9359 = sst [smem:[#allocation52_spill]] %s9304_s3 }
   0x5   :  { %9360 = sst [smem:[#allocation53_spill]] %s9305_s4 }
   0x6   :  { %9361 = sst [smem:[#allocation54_spill]] %s9306_s5 }
   0x7   :  { %9362 = sst [smem:[#allocation55_spill]] %s9307_s6 }
   0x8   :  { %9363 = sst [smem:[#allocation56_spill]] %s9308_s7 }
   0x9   :  { %9364 = sst [smem:[#allocation57_spill]] %s9309_s8 }
   0xa   :  { %9365 = sst [smem:[#allocation58_spill]] %s9310_s9 }
   0xb   :  { %9366 = sst [smem:[#allocation59_spill]] %s9311_s10 }
   0xc   :  { %9367 = sst [smem:[#allocation60_spill]] %s9313_s12 }
   0xd   :  { %9368 = sst [smem:[#allocation61_spill]] %s9317_s16 }
   0xe   :  { %9369 = sst [smem:[#allocation62_spill]] %s9323_s22 }
   0xf   :  { %9370 = sst [smem:[#allocation63_spill]] %s9325_s24 }
  0x10   :  { %9371 = sst [smem:[#allocation64_spill]] %s9326_s25 }
  0x11   :  { %31 = vsyncpa [#allocation3], 0 }
  0x12   :  { %33 = vsyncpa [#allocation3 + $0x1], 0 }
  0x13   :  { %34 = vsyncpa [#allocation6], 0 }
  0x14   :  { %35 = vsyncpa [#allocation9], 0 }
  0x15   :  { %36 = vsyncpa [#allocation12], 0 }
  0x16   :  { %37 = vsyncpa [#allocation15], 0 }
  0x17   :  { %38 = vsyncpa [#allocation18], 0 }
  0x18   :  { %39 = vsyncpa [#allocation21], 0 }
  0x19   :  { %40 = vsyncpa [#allocation24], 0 }
  0x1a   :  { %41 = vsyncpa [#allocation27], 0 }
  0x1b   :  { %42 = vsyncpa [#allocation30], 0 }
  0x1c   :  { %43 = vsyncpa [#allocation4], 0  ;;  %s7956_s29 = smov 0   ;;  %s7958_s2 = smov 0  }
  0x1d   :  { %s7960_s6 = smov 0   ;;  %s7962_s30 = smov 0  }
  0x1e LB: > { %9372 = sst [smem:[#allocation44_spill]] %s7788_s29  ;;  %s7802_s7 = smov [#allocation5]   ;;  %s7800_s30 = sphi %s7962_s30, %s9440_s30   ;;  %s7796_s6 = sphi %s7960_s6, %s9439_s6   ;;  %s7792_s2 = sphi %s7958_s2, %s9438_s2   ;;  %s7788_s29 = sphi %s7956_s29, %s9437_s29  }
  0x1f   : > { %9373 = sst [smem:[#allocation45_spill]] %s7792_s2  ;;  %s627_s3 = sshll.u32 %s7802_s7, 4  ;;  %s7982_s3 = int_to_ptr.vmem [resolvable:$true] %s627_s3 }
  0x20   : > { %9374 = sst [smem:[#allocation46_spill]] %s7796_s6  ;;  %s7977_s26 = sadd.s32 4294967295, %s7800_s30  }
  0x21   : > { %9375 = sst [smem:[#allocation47_spill]] %s7977_s26  ;;  %p5628_p0 = scmp.ge.s32.totalorder %s7800_s30, 1 }
  0x22   : > { %p9348_p1 = scmp.eq.s32.totalorder %s7977_s26, 0  ;;  %p615_p2 = scmp.lt.s32.totalorder %s7800_s30, 3 }
  0x23   : > { %s7803_s8 = smov [#allocation8]   ;;  %s7804_s28 = smov [#allocation11]  }
  0x24   : > { %p7984_p3 = pnand %p5628_p0, %p615_p2  ;;  %s653_s27 = sshll.u32 %s7803_s8, 4  ;;  %s7996_s27 = int_to_ptr.vmem [resolvable:$true] %s653_s27 }
  0x25   : > { %s679_s9 = sshll.u32 %s7804_s28, 4  ;;  %s9379_s7 = sld [smem:[#allocation50_spill]]  ;;  %s7998_s9 = int_to_ptr.vmem [resolvable:$true] %s679_s9 }
  0x26   : > { %s9376_s1 = scalar_select %p7984_p3, 1, 0 }
  0x27   : > { %p6908_p4 = pneg %p7984_p3 }
  0x28   : > { %9377 = sst [smem:[#allocation48_spill]] %s9376_s1 }
  0x29   : > { %p7992_p5 = pnand %p6908_p4, %p9348_p1 }
  0x2b   : > { %s7205_s25 = scalar_lea.hbm %s9379_s7, 512  ;;  %p8008_p7 = pneg %p7992_p5 }
  0x2c   : > { %p7206_p6 = scmp.ne.s32.totalorder %s9379_s7, %s7205_s25  ;;  %p7212_p10 = scmp.lt.u32.totalorder %s7205_s25, %s9379_s7 }
  0x2e   : > { %p7208_p8 = pnand %p8008_p7, %p7206_p6 }
  0x30   : > { %p7209_p9 = pneg %p7208_p8 }
  0x32   : > { %p7214_p11 = pnand %p7212_p10, %p7209_p9 }
  0x34   : > { %7217 = shalt.err (!%p7214_p11)
}
  0x35   : > { %s7218_s22 = scalar_lea.vmem %s7982_s3, 512  ;;  %p7226_p2 = scmp.lt.s32.totalorder %s7982_s3, %s7982_s3 }
  0x36   : > { %p7219_p12 = scmp.ne.s32.totalorder %s7982_s3, %s7218_s22  ;;  %p7227_p4 = scmp.lt.s32.totalorder %s7218_s22, %s7218_s22 }
  0x38   : > { %p7221_p13 = pnand %p7219_p12, %p8008_p7  ;;  %p7228_p6 = por %p7227_p4, %p7226_p2 }
  0x3a   : > { %p7222_p0 = pneg %p7221_p13 }
  0x3c   : > { %p7229_p8 = pnand %p7228_p6, %p7222_p0 }
  0x3e   : > { %7232 = shalt.err (!%p7229_p8)
}
  0x3f   : > { %s7805_s24 = smov 128   ;;  %s7806_s16 = smov 8  }
  0x40   : > { %6911 = dma.hbm_to_vmem [thread:$0]  (!%p7992_p5), %s9379_s7, 512, %s7982_s3, [#allocation6], %s7805_s24, %s7805_s24, %s7806_s16  }
  0x41   : > { %s9381_s10 = sld [smem:[#allocation52_spill]] }
  0x47   : > { %s7233_s22 = scalar_lea.hbm %s9381_s10, 4096 }
  0x48   : > { %p7234_p9 = scmp.ne.s32.totalorder %s9381_s10, %s7233_s22  ;;  %p7240_p12 = scmp.lt.u32.totalorder %s7233_s22, %s9381_s10 }
  0x4a   : > { %p7236_p10 = pnand %p7234_p9, %p8008_p7 }
  0x4c   : > { %p7237_p11 = pneg %p7236_p10 }
  0x4e   : > { %p7242_p13 = pnand %p7240_p12, %p7237_p11 }
  0x50   : > { %7245 = shalt.err (!%p7242_p13)
}
  0x51   : > { %s7246_s3 = scalar_lea.vmem %s7996_s27, 4096  ;;  %p7254_p6 = scmp.lt.s32.totalorder %s7996_s27, %s7996_s27 }
  0x52   : > { %p7247_p0 = scmp.ne.s32.totalorder %s7996_s27, %s7246_s3  ;;  %p7255_p8 = scmp.lt.s32.totalorder %s7246_s3, %s7246_s3 }
  0x54   : > { %p7249_p2 = pnand %p7247_p0, %p8008_p7  ;;  %p7256_p9 = por %p7255_p8, %p7254_p6 }
  0x56   : > { %p7250_p4 = pneg %p7249_p2 }
  0x58   : > { %p7257_p10 = pnand %p7256_p9, %p7250_p4 }
  0x5a   : > { %7260 = shalt.err (!%p7257_p10)
}
  0x5b   : > { %6917 = dma.hbm_to_vmem [thread:$0]  (!%p7992_p5), %s9381_s10, 4096, %s7996_s27, [#allocation9], %s7805_s24, %s7805_s24, %s7806_s16  }
  0x5c   : > { %s9382_s25 = sld [smem:[#allocation54_spill]] }
  0x62   : > { %s7261_s5 = scalar_lea.hbm %s9382_s25, 4096 }
  0x63   : > { %p7262_p11 = scmp.ne.s32.totalorder %s9382_s25, %s7261_s5  ;;  %p7268_p0 = scmp.lt.u32.totalorder %s7261_s5, %s9382_s25 }
  0x65   : > { %p7264_p12 = pnand %p7262_p11, %p8008_p7 }
  0x67   : > { %p7265_p13 = pneg %p7264_p12 }
  0x69   : > { %p7270_p2 = pnand %p7268_p0, %p7265_p13 }
  0x6b   : > { %7273 = shalt.err (!%p7270_p2)
}
  0x6c   : > { %s7274_s27 = scalar_lea.vmem %s7998_s9, 4096  ;;  %p7282_p9 = scmp.lt.s32.totalorder %s7998_s9, %s7998_s9 }
  0x6d   : > { %p7275_p4 = scmp.ne.s32.totalorder %s7998_s9, %s7274_s27  ;;  %p7283_p10 = scmp.lt.s32.totalorder %s7274_s27, %s7274_s27 }
  0x6f   : > { %p7277_p6 = pnand %p7275_p4, %p8008_p7  ;;  %p7284_p11 = por %p7283_p10, %p7282_p9 }
  0x71   : > { %p7278_p8 = pneg %p7277_p6 }
  0x73   : > { %p7285_p12 = pnand %p7284_p11, %p7278_p8 }
  0x75   : > { %7288 = shalt.err (!%p7285_p12)
}
  0x76   : > { %6923 = dma.hbm_to_vmem [thread:$0]  (!%p7992_p5), %s9382_s25, 4096, %s7998_s9, [#allocation12], %s7805_s24, %s7805_s24, %s7806_s16  }
  0x77   : > { %s7807_s26 = smov [#allocation14]   ;;  %s7808_s5 = smov [#allocation17]  }
  0x78   : > { %s708_s1 = sshll.u32 %s7807_s26, 4  ;;  %s740_s0 = sshll.u32 %s7808_s5, 4  ;;  %s709_s1 = int_to_ptr.vmem [resolvable:$true] %s708_s1  ;;  %s741_s0 = int_to_ptr.vmem [resolvable:$true] %s740_s0 }
  0x79   : > { %s9383_s3 = sld [smem:[#allocation57_spill]] }
  0x7f   : > { %s7289_s27 = scalar_lea.hbm %s9383_s3, 6144 }
  0x80   : > { %p7290_p13 = scmp.ne.s32.totalorder %s9383_s3, %s7289_s27  ;;  %p7296_p4 = scmp.lt.u32.totalorder %s7289_s27, %s9383_s3 }
  0x82   : > { %p7292_p0 = pnand %p7290_p13, %p8008_p7 }
  0x84   : > { %p7293_p2 = pneg %p7292_p0 }
  0x86   : > { %p7298_p6 = pnand %p7296_p4, %p7293_p2 }
  0x88   : > { %7301 = shalt.err (!%p7298_p6)
}
  0x89   : > { %s7302_s9 = scalar_lea.vmem %s709_s1, 6144  ;;  %p7310_p11 = scmp.lt.s32.totalorder %s709_s1, %s709_s1 }
  0x8a   : > { %p7303_p8 = scmp.ne.s32.totalorder %s709_s1, %s7302_s9  ;;  %p7311_p12 = scmp.lt.s32.totalorder %s7302_s9, %s7302_s9 }
  0x8c   : > { %p7305_p9 = pnand %p7303_p8, %p8008_p7  ;;  %p7312_p1 = por %p7311_p12, %p7310_p11 }
  0x8e   : > { %p7306_p10 = pneg %p7305_p9 }
  0x90   : > { %p7313_p3 = pnand %p7312_p1, %p7306_p10 }
  0x92   : > { %7316 = shalt.err (!%p7313_p3)
}
  0x93   : > { %6929 = dma.hbm_to_vmem [thread:$0]  (!%p7992_p5), %s9383_s3, 6144, %s709_s1, [#allocation15], %s7805_s24, %s7805_s24, %s7806_s16  }
  0x94   : > { %s9384_s12 = sld [smem:[#allocation60_spill]] }
  0x9a   : > { %s7317_s26 = scalar_lea.hbm %s9384_s12, 1024 }
  0x9b   : > { %p7318_p1 = scmp.ne.s32.totalorder %s9384_s12, %s7317_s26  ;;  %p7324_p0 = scmp.lt.u32.totalorder %s7317_s26, %s9384_s12 }
  0x9d   : > { %p7320_p3 = pnand %p7318_p1, %p8008_p7 }
  0x9f   : > { %p7321_p13 = pneg %p7320_p3 }
  0xa1   : > { %p7326_p2 = pnand %p7324_p0, %p7321_p13 }
  0xa3   : > { %7329 = shalt.err (!%p7326_p2)
}
  0xa4   : > { %s7330_s29 = scalar_lea.vmem %s741_s0, 1024  ;;  %p7338_p9 = scmp.lt.s32.totalorder %s741_s0, %s741_s0 }
  0xa5   : > { %p7331_p4 = scmp.ne.s32.totalorder %s741_s0, %s7330_s29  ;;  %p7339_p10 = scmp.lt.s32.totalorder %s7330_s29, %s7330_s29 }
  0xa7   : > { %p7333_p6 = pnand %p7331_p4, %p8008_p7  ;;  %p7340_p11 = por %p7339_p10, %p7338_p9 }
  0xa9   : > { %p7334_p8 = pneg %p7333_p6 }
  0xab   : > { %p7341_p12 = pnand %p7340_p11, %p7334_p8 }
  0xad   : > { %7344 = shalt.err (!%p7341_p12)
}
  0xae   : > { %6935 = dma.hbm_to_vmem [thread:$0]  (!%p7992_p5), %s9384_s12, 1024, %s741_s0, [#allocation18], %s7805_s24, %s7805_s24, %s7806_s16  }
  0xaf   : > { %s7809_s10 = smov [#allocation20]   ;;  %s7810_s7 = smov [#allocation23]  }
  0xb0   : > { %s766_s6 = sshll.u32 %s7809_s10, 4  ;;  %s795_s2 = sshll.u32 %s7810_s7, 4  ;;  %s767_s6 = int_to_ptr.vmem [resolvable:$true] %s766_s6  ;;  %s796_s2 = int_to_ptr.vmem [resolvable:$true] %s795_s2 }
  0xb1   : > { %s7345_s28 = scalar_lea.hbm %s9315_s14, 1024 }
  0xb2   : > { %p7346_p1 = scmp.ne.s32.totalorder %s9315_s14, %s7345_s28  ;;  %p7352_p0 = scmp.lt.u32.totalorder %s7345_s28, %s9315_s14 }
  0xb4   : > { %p7348_p3 = pnand %p7346_p1, %p8008_p7 }
  0xb6   : > { %p7349_p13 = pneg %p7348_p3 }
  0xb8   : > { %p7354_p2 = pnand %p7352_p0, %p7349_p13 }
  0xba   : > { %7357 = shalt.err (!%p7354_p2)
}
  0xbb   : > { %s7358_s0 = scalar_lea.vmem %s767_s6, 1024  ;;  %p7366_p9 = scmp.lt.s32.totalorder %s767_s6, %s767_s6 }
  0xbc   : > { %p7359_p4 = scmp.ne.s32.totalorder %s767_s6, %s7358_s0  ;;  %p7367_p10 = scmp.lt.s32.totalorder %s7358_s0, %s7358_s0 }
  0xbe   : > { %p7361_p6 = pnand %p7359_p4, %p8008_p7  ;;  %p7368_p11 = por %p7367_p10, %p7366_p9 }
  0xc0   : > { %p7362_p8 = pneg %p7361_p6 }
  0xc2   : > { %p7369_p12 = pnand %p7368_p11, %p7362_p8 }
  0xc4   : > { %7372 = shalt.err (!%p7369_p12)
}
  0xc5   : > { %6941 = dma.hbm_to_vmem [thread:$0]  (!%p7992_p5), %s9315_s14, 1024, %s767_s6, [#allocation21], %s7805_s24, %s7805_s24, %s7806_s16  }
  0xc6   : > { %s7373_s5 = scalar_lea.hbm %s9318_s17, 512 }
  0xc7   : > { %p7374_p1 = scmp.ne.s32.totalorder %s9318_s17, %s7373_s5  ;;  %p7380_p0 = scmp.lt.u32.totalorder %s7373_s5, %s9318_s17 }
  0xc9   : > { %p7376_p3 = pnand %p7374_p1, %p8008_p7 }
  0xcb   : > { %p7377_p13 = pneg %p7376_p3 }
  0xcd   : > { %p7382_p2 = pnand %p7380_p0, %p7377_p13 }
  0xcf   : > { %7385 = shalt.err (!%p7382_p2)
}
  0xd0   : > { %s7386_s1 = scalar_lea.vmem %s796_s2, 512  ;;  %p7394_p9 = scmp.lt.s32.totalorder %s796_s2, %s796_s2 }
  0xd1   : > { %p7387_p4 = scmp.ne.s32.totalorder %s796_s2, %s7386_s1  ;;  %p7395_p10 = scmp.lt.s32.totalorder %s7386_s1, %s7386_s1 }
  0xd3   : > { %p7389_p6 = pnand %p7387_p4, %p8008_p7  ;;  %p7396_p11 = por %p7395_p10, %p7394_p9 }
  0xd5   : > { %p7390_p8 = pneg %p7389_p6 }
  0xd7   : > { %p7397_p12 = pnand %p7396_p11, %p7390_p8 }
  0xd9   : > { %7400 = shalt.err (!%p7397_p12)
}
  0xda   : > { %6947 = dma.hbm_to_vmem [thread:$0]  (!%p7992_p5), %s9318_s17, 512, %s796_s2, [#allocation24], %s7805_s24, %s7805_s24, %s7806_s16  }
  0xdb   : > { %s7811_s9 = smov [#allocation26]   ;;  %s7812_s7 = smov [#allocation7]  }
  0xdc   : > { %s821_s10 = sshll.u32 %s7811_s9, 4  ;;  %s640_s26 = sshll.u32 %s7812_s7, 4  ;;  %s822_s10 = int_to_ptr.vmem [resolvable:$true] %s821_s10  ;;  %s641_s26 = int_to_ptr.vmem [resolvable:$true] %s640_s26 }
  0xdd   : > { %s7401_s22 = scalar_lea.hbm %s9320_s19, 512 }
  0xde   : > { %p7402_p1 = scmp.ne.s32.totalorder %s9320_s19, %s7401_s22  ;;  %p7408_p0 = scmp.lt.u32.totalorder %s7401_s22, %s9320_s19 }
  0xe0   : > { %p7404_p3 = pnand %p7402_p1, %p8008_p7 }
  0xe2   : > { %p7405_p13 = pneg %p7404_p3 }
  0xe4   : > { %p7410_p2 = pnand %p7408_p0, %p7405_p13 }
  0xe6   : > { %7413 = shalt.err (!%p7410_p2)
}
  0xe7   : > { %s7414_s2 = scalar_lea.vmem %s822_s10, 512  ;;  %p7422_p9 = scmp.lt.s32.totalorder %s822_s10, %s822_s10 }
  0xe8   : > { %p7415_p4 = scmp.ne.s32.totalorder %s822_s10, %s7414_s2  ;;  %p7423_p10 = scmp.lt.s32.totalorder %s7414_s2, %s7414_s2 }
  0xea   : > { %p7417_p6 = pnand %p7415_p4, %p8008_p7  ;;  %p7424_p11 = por %p7423_p10, %p7422_p9 }
  0xec   : > { %p7418_p8 = pneg %p7417_p6 }
  0xee   : > { %p7425_p12 = pnand %p7424_p11, %p7418_p8 }
  0xf0   : > { %7428 = shalt.err (!%p7425_p12)
}
  0xf1   : > { %6953 = dma.hbm_to_vmem [thread:$0]  (!%p7992_p5), %s9320_s19, 512, %s822_s10, [#allocation27], %s7805_s24, %s7805_s24, %s7806_s16  }
  0xf2   : > { %s9385_s28 = sld [smem:[#allocation51_spill]] }
  0xf8   : > { %s7429_s22 = scalar_lea.hbm %s9385_s28, 512 }
  0xf9   : > { %p7430_p1 = scmp.ne.s32.totalorder %s9385_s28, %s7429_s22  ;;  %p7436_p0 = scmp.lt.u32.totalorder %s7429_s22, %s9385_s28 }
  0xfb   : > { %p7432_p3 = pnand %p7430_p1, %p8008_p7 }
  0xfd   : > { %p7433_p13 = pneg %p7432_p3 }
  0xff   : > { %p7438_p2 = pnand %p7436_p0, %p7433_p13 }
 0x101   : > { %7441 = shalt.err (!%p7438_p2)
}
 0x102   : > { %s7442_s2 = scalar_lea.vmem %s641_s26, 512  ;;  %p7450_p9 = scmp.lt.s32.totalorder %s641_s26, %s641_s26 }
 0x103   : > { %p7443_p4 = scmp.ne.s32.totalorder %s641_s26, %s7442_s2  ;;  %p7451_p10 = scmp.lt.s32.totalorder %s7442_s2, %s7442_s2 }
 0x105   : > { %p7445_p6 = pnand %p7443_p4, %p8008_p7  ;;  %p7452_p11 = por %p7451_p10, %p7450_p9 }
 0x107   : > { %p7446_p8 = pneg %p7445_p6 }
 0x109   : > { %p7453_p12 = pnand %p7452_p11, %p7446_p8 }
 0x10b   : > { %7456 = shalt.err (!%p7453_p12)
}
 0x10c   : > { %6914 = dma.hbm_to_vmem [thread:$0]  (!%p7992_p5), %s9385_s28, 512, %s641_s26, [#allocation6], %s7805_s24, %s7805_s24, %s7806_s16  }
 0x10d   : > { %s7813_s9 = smov [#allocation10]   ;;  %s7814_s5 = smov [#allocation13]  }
 0x10e   : > { %s666_s7 = sshll.u32 %s7813_s9, 4  ;;  %s695_s22 = sshll.u32 %s7814_s5, 4  ;;  %s667_s7 = int_to_ptr.vmem [resolvable:$true] %s666_s7  ;;  %s696_s22 = int_to_ptr.vmem [resolvable:$true] %s695_s22 }
 0x10f   : > { %s9386_s1 = sld [smem:[#allocation53_spill]] }
 0x115   : > { %s7457_s6 = scalar_lea.hbm %s9386_s1, 2048 }
 0x116   : > { %p7458_p1 = scmp.ne.s32.totalorder %s9386_s1, %s7457_s6  ;;  %p7464_p0 = scmp.lt.u32.totalorder %s7457_s6, %s9386_s1 }
 0x118   : > { %p7460_p3 = pnand %p7458_p1, %p8008_p7 }
 0x11a   : > { %p7461_p13 = pneg %p7460_p3 }
 0x11c   : > { %p7466_p2 = pnand %p7464_p0, %p7461_p13 }
 0x11e   : > { %7469 = shalt.err (!%p7466_p2)
}
 0x11f   : > { %s7470_s26 = scalar_lea.vmem %s667_s7, 2048  ;;  %p7478_p9 = scmp.lt.s32.totalorder %s667_s7, %s667_s7 }
 0x120   : > { %p7471_p4 = scmp.ne.s32.totalorder %s667_s7, %s7470_s26  ;;  %p7479_p10 = scmp.lt.s32.totalorder %s7470_s26, %s7470_s26 }
 0x122   : > { %p7473_p6 = pnand %p7471_p4, %p8008_p7  ;;  %p7480_p11 = por %p7479_p10, %p7478_p9 }
 0x124   : > { %p7474_p8 = pneg %p7473_p6 }
 0x126   : > { %p7481_p12 = pnand %p7480_p11, %p7474_p8 }
 0x128   : > { %7484 = shalt.err (!%p7481_p12)
}
 0x129   : > { %6920 = dma.hbm_to_vmem [thread:$0]  (!%p7992_p5), %s9386_s1, 2048, %s667_s7, [#allocation9], %s7805_s24, %s7805_s24, %s7806_s16  }
 0x12a   : > { %s9387_s5 = sld [smem:[#allocation56_spill]] }
 0x130   : > { %s7485_s27 = scalar_lea.hbm %s9387_s5, 6144 }
 0x131   : > { %p7486_p1 = scmp.ne.s32.totalorder %s9387_s5, %s7485_s27  ;;  %p7492_p0 = scmp.lt.u32.totalorder %s7485_s27, %s9387_s5 }
 0x133   : > { %p7488_p3 = pnand %p7486_p1, %p8008_p7 }
 0x135   : > { %p7489_p13 = pneg %p7488_p3 }
 0x137   : > { %p7494_p2 = pnand %p7492_p0, %p7489_p13 }
 0x139   : > { %7497 = shalt.err (!%p7494_p2)
}
 0x13a   : > { %s7498_s26 = scalar_lea.vmem %s696_s22, 6144  ;;  %p7506_p9 = scmp.lt.s32.totalorder %s696_s22, %s696_s22 }
 0x13b   : > { %p7499_p4 = scmp.ne.s32.totalorder %s696_s22, %s7498_s26  ;;  %p7507_p10 = scmp.lt.s32.totalorder %s7498_s26, %s7498_s26 }
 0x13d   : > { %p7501_p6 = pnand %p7499_p4, %p8008_p7  ;;  %p7508_p11 = por %p7507_p10, %p7506_p9 }
 0x13f   : > { %p7502_p8 = pneg %p7501_p6 }
 0x141   : > { %p7509_p12 = pnand %p7508_p11, %p7502_p8 }
 0x143   : > { %7512 = shalt.err (!%p7509_p12)
}
 0x144   : > { %6926 = dma.hbm_to_vmem [thread:$0]  (!%p7992_p5), %s9387_s5, 6144, %s696_s22, [#allocation12], %s7805_s24, %s7805_s24, %s7806_s16  }
 0x145   : > { %s7815_s3 = smov [#allocation16]   ;;  %s7816_s9 = smov [#allocation19]  }
 0x146   : > { %s727_s0 = sshll.u32 %s7815_s3, 4  ;;  %s753_s27 = sshll.u32 %s7816_s9, 4  ;;  %s728_s0 = int_to_ptr.vmem [resolvable:$true] %s727_s0  ;;  %s754_s27 = int_to_ptr.vmem [resolvable:$true] %s753_s27 }
 0x147   : > { %s7513_s2 = scalar_lea.hbm %s9312_s11, 1024 }
 0x148   : > { %p7514_p1 = scmp.ne.s32.totalorder %s9312_s11, %s7513_s2  ;;  %p7520_p0 = scmp.lt.u32.totalorder %s7513_s2, %s9312_s11 }
 0x14a   : > { %p7516_p3 = pnand %p7514_p1, %p8008_p7 }
 0x14c   : > { %p7517_p13 = pneg %p7516_p3 }
 0x14e   : > { %p7522_p2 = pnand %p7520_p0, %p7517_p13 }
 0x150   : > { %7525 = shalt.err (!%p7522_p2)
}
 0x151   : > { %s7526_s22 = scalar_lea.vmem %s728_s0, 1024  ;;  %p7534_p9 = scmp.lt.s32.totalorder %s728_s0, %s728_s0 }
 0x152   : > { %p7527_p4 = scmp.ne.s32.totalorder %s728_s0, %s7526_s22  ;;  %p7535_p10 = scmp.lt.s32.totalorder %s7526_s22, %s7526_s22 }
 0x154   : > { %p7529_p6 = pnand %p7527_p4, %p8008_p7  ;;  %p7536_p11 = por %p7535_p10, %p7534_p9 }
 0x156   : > { %p7530_p8 = pneg %p7529_p6 }
 0x158   : > { %p7537_p12 = pnand %p7536_p11, %p7530_p8 }
 0x15a   : > { %7540 = shalt.err (!%p7537_p12)
}
 0x15b   : > { %6932 = dma.hbm_to_vmem [thread:$0]  (!%p7992_p5), %s9312_s11, 1024, %s728_s0, [#allocation15], %s7805_s24, %s7805_s24, %s7806_s16  }
 0x15c   : > { %s7541_s29 = scalar_lea.hbm %s9314_s13, 1024 }
 0x15d   : > { %p7542_p1 = scmp.ne.s32.totalorder %s9314_s13, %s7541_s29  ;;  %p7548_p0 = scmp.lt.u32.totalorder %s7541_s29, %s9314_s13 }
 0x15f   : > { %p7544_p3 = pnand %p7542_p1, %p8008_p7 }
 0x161   : > { %p7545_p13 = pneg %p7544_p3 }
 0x163   : > { %p7550_p2 = pnand %p7548_p0, %p7545_p13 }
 0x165   : > { %7553 = shalt.err (!%p7550_p2)
}
 0x166   : > { %s7554_s7 = scalar_lea.vmem %s754_s27, 1024  ;;  %p7562_p9 = scmp.lt.s32.totalorder %s754_s27, %s754_s27 }
 0x167   : > { %p7555_p4 = scmp.ne.s32.totalorder %s754_s27, %s7554_s7  ;;  %p7563_p10 = scmp.lt.s32.totalorder %s7554_s7, %s7554_s7 }
 0x169   : > { %p7557_p6 = pnand %p7555_p4, %p8008_p7  ;;  %p7564_p11 = por %p7563_p10, %p7562_p9 }
 0x16b   : > { %p7558_p8 = pneg %p7557_p6 }
 0x16d   : > { %p7565_p12 = pnand %p7564_p11, %p7558_p8 }
 0x16f   : > { %7568 = shalt.err (!%p7565_p12)
}
 0x170   : > { %6938 = dma.hbm_to_vmem [thread:$0]  (!%p7992_p5), %s9314_s13, 1024, %s754_s27, [#allocation18], %s7805_s24, %s7805_s24, %s7806_s16  }
 0x171   : > { %s7817_s1 = smov [#allocation22]   ;;  %s7818_s3 = smov [#allocation25]  }
 0x172   : > { %s779_s12 = sshll.u32 %s7817_s1, 4  ;;  %s808_s9 = sshll.u32 %s7818_s3, 4  ;;  %s780_s12 = int_to_ptr.vmem [resolvable:$true] %s779_s12  ;;  %s809_s9 = int_to_ptr.vmem [resolvable:$true] %s808_s9 }
 0x173   : > { %s7569_s2 = scalar_lea.hbm %s9316_s15, 1024 }
 0x174   : > { %p7570_p1 = scmp.ne.s32.totalorder %s9316_s15, %s7569_s2  ;;  %p7576_p0 = scmp.lt.u32.totalorder %s7569_s2, %s9316_s15 }
 0x176   : > { %p7572_p3 = pnand %p7570_p1, %p8008_p7 }
 0x178   : > { %p7573_p13 = pneg %p7572_p3 }
 0x17a   : > { %p7578_p2 = pnand %p7576_p0, %p7573_p13 }
 0x17c   : > { %7581 = shalt.err (!%p7578_p2)
}
 0x17d   : > { %s7582_s27 = scalar_lea.vmem %s780_s12, 1024  ;;  %p7590_p9 = scmp.lt.s32.totalorder %s780_s12, %s780_s12 }
 0x17e   : > { %p7583_p4 = scmp.ne.s32.totalorder %s780_s12, %s7582_s27  ;;  %p7591_p10 = scmp.lt.s32.totalorder %s7582_s27, %s7582_s27 }
 0x180   : > { %p7585_p6 = pnand %p7583_p4, %p8008_p7  ;;  %p7592_p11 = por %p7591_p10, %p7590_p9 }
 0x182   : > { %p7586_p8 = pneg %p7585_p6 }
 0x184   : > { %p7593_p12 = pnand %p7592_p11, %p7586_p8 }
 0x186   : > { %7596 = shalt.err (!%p7593_p12)
}
 0x187   : > { %6944 = dma.hbm_to_vmem [thread:$0]  (!%p7992_p5), %s9316_s15, 1024, %s780_s12, [#allocation21], %s7805_s24, %s7805_s24, %s7806_s16  }
 0x188   : > { %s7597_s6 = scalar_lea.hbm %s9319_s18, 512 }
 0x189   : > { %p7598_p1 = scmp.ne.s32.totalorder %s9319_s18, %s7597_s6  ;;  %p7604_p0 = scmp.lt.u32.totalorder %s7597_s6, %s9319_s18 }
 0x18b   : > { %p7600_p3 = pnand %p7598_p1, %p8008_p7 }
 0x18d   : > { %p7601_p13 = pneg %p7600_p3 }
 0x18f   : > { %p7606_p2 = pnand %p7604_p0, %p7601_p13 }
 0x191   : > { %7609 = shalt.err (!%p7606_p2)
}
 0x192   : > { %s7610_s0 = scalar_lea.vmem %s809_s9, 512  ;;  %p7618_p9 = scmp.lt.s32.totalorder %s809_s9, %s809_s9 }
 0x193   : > { %p7611_p4 = scmp.ne.s32.totalorder %s809_s9, %s7610_s0  ;;  %p7619_p10 = scmp.lt.s32.totalorder %s7610_s0, %s7610_s0 }
 0x195   : > { %p7613_p6 = pnand %p7611_p4, %p8008_p7  ;;  %p7620_p11 = por %p7619_p10, %p7618_p9 }
 0x197   : > { %p7614_p8 = pneg %p7613_p6 }
 0x199   : > { %p7621_p12 = pnand %p7620_p11, %p7614_p8 }
 0x19b   : > { %7624 = shalt.err (!%p7621_p12)
}
 0x19c   : > { %6950 = dma.hbm_to_vmem [thread:$0]  (!%p7992_p5), %s9319_s18, 512, %s809_s9, [#allocation24], %s7805_s24, %s7805_s24, %s7806_s16  }
 0x19d   : > { %s7819_s22 = smov [#allocation28]   ;;  %s7820_s3 = smov [#allocation29]  }
 0x19e   : > { %s834_s1 = sshll.u32 %s7819_s22, 4  ;;  %s847_s29 = sshll.u32 %s7820_s3, 4  ;;  %s835_s1 = int_to_ptr.vmem [resolvable:$true] %s834_s1  ;;  %s848_s29 = int_to_ptr.vmem [resolvable:$true] %s847_s29 }
 0x19f   : > { %s7625_s10 = scalar_lea.hbm %s9321_s20, 256 }
 0x1a0   : > { %p7626_p1 = scmp.ne.s32.totalorder %s9321_s20, %s7625_s10  ;;  %p7632_p0 = scmp.lt.u32.totalorder %s7625_s10, %s9321_s20 }
 0x1a2   : > { %p7628_p3 = pnand %p7626_p1, %p8008_p7 }
 0x1a4   : > { %p7629_p13 = pneg %p7628_p3 }
 0x1a6   : > { %p7634_p2 = pnand %p7632_p0, %p7629_p13 }
 0x1a8   : > { %7637 = shalt.err (!%p7634_p2)
}
 0x1a9   : > { %s7638_s9 = scalar_lea.vmem %s835_s1, 256  ;;  %p7646_p9 = scmp.lt.s32.totalorder %s835_s1, %s835_s1 }
 0x1aa   : > { %p7639_p4 = scmp.ne.s32.totalorder %s835_s1, %s7638_s9  ;;  %p7647_p10 = scmp.lt.s32.totalorder %s7638_s9, %s7638_s9 }
 0x1ac   : > { %p7641_p6 = pnand %p7639_p4, %p8008_p7  ;;  %p7648_p11 = por %p7647_p10, %p7646_p9 }
 0x1ae   : > { %p7642_p8 = pneg %p7641_p6 }
 0x1b0   : > { %p7649_p12 = pnand %p7648_p11, %p7642_p8 }
 0x1b2   : > { %7652 = shalt.err (!%p7649_p12)
}
 0x1b3   : > { %6956 = dma.hbm_to_vmem [thread:$0]  (!%p7992_p5), %s9321_s20, 256, %s835_s1, [#allocation27], %s7805_s24, %s7805_s24, %s7806_s16  }
 0x1b4   : > { %s864_s2 = sshll.u32 %s9324_s23, 4  ;;  %s7653_s7 = scalar_lea.hbm %s9322_s21, 256  ;;  %s865_s2 = int_to_ptr.vmem [resolvable:$true] %s864_s2 }
 0x1b5   : > { %p7654_p1 = scmp.ne.s32.totalorder %s9322_s21, %s7653_s7  ;;  %p7660_p0 = scmp.lt.u32.totalorder %s7653_s7, %s9322_s21 }
 0x1b7   : > { %p7656_p3 = pnand %p7654_p1, %p8008_p7 }
 0x1b9   : > { %p7657_p13 = pneg %p7656_p3 }
 0x1bb   : > { %p7662_p2 = pnand %p7660_p0, %p7657_p13 }
 0x1bd   : > { %7665 = shalt.err (!%p7662_p2)
}
 0x1be   : > { %s7666_s1 = scalar_lea.vmem %s848_s29, 256  ;;  %p7674_p9 = scmp.lt.s32.totalorder %s848_s29, %s848_s29 }
 0x1bf   : > { %p7667_p4 = scmp.ne.s32.totalorder %s848_s29, %s7666_s1  ;;  %p7675_p10 = scmp.lt.s32.totalorder %s7666_s1, %s7666_s1 }
 0x1c1   : > { %p7669_p6 = pnand %p7667_p4, %p8008_p7  ;;  %p7676_p11 = por %p7675_p10, %p7674_p9 }
 0x1c3   : > { %p7670_p8 = pneg %p7669_p6 }
 0x1c5   : > { %p7677_p12 = pnand %p7676_p11, %p7670_p8 }
 0x1c7   : > { %7680 = shalt.err (!%p7677_p12)
}
 0x1c8   : > { %6959 = dma.hbm_to_vmem [thread:$0]  (!%p7992_p5), %s9322_s21, 256, %s848_s29, [#allocation30], %s7805_s24, %s7805_s24, %s7806_s16  }
 0x1c9   : > { %s7681_s6 = scalar_lea.vmem %s865_s2, 16  ;;  %p7689_p0 = scmp.lt.s32.totalorder %s865_s2, %s865_s2 }
 0x1ca   : > { %p7682_p1 = scmp.ne.s32.totalorder %s865_s2, %s7681_s6  ;;  %p7690_p2 = scmp.lt.s32.totalorder %s7681_s6, %s7681_s6 }
 0x1cc   : > { %p7684_p3 = pnand %p7682_p1, %p8008_p7  ;;  %p7691_p4 = por %p7690_p2, %p7689_p0 }
 0x1ce   : > { %p7685_p13 = pneg %p7684_p3 }
 0x1d0   : > { %p7692_p6 = pnand %p7691_p4, %p7685_p13 }
 0x1d2   : > { %7695 = shalt.err (!%p7692_p6)
}
 0x1d3   : > { %s7821_s10 = smov [#allocation31]   ;;  %s9388_s26 = sld [smem:[#allocation46_spill]] }
 0x1d4   : > { %s9389_s7 = sld [smem:[#allocation45_spill]]  ;;  %s9390_s24 = sld [smem:[#allocation44_spill]] }
 0x1d5   : > { %s9391_s16 = sld [smem:[#allocation47_spill]]  ;;  %s8386_s8 = sadd.s32 1, %s7800_s30  }
 0x1d6   : > { %6962 = dma.vmem_to_smem (!%p7992_p5), %s865_s2, 16, %s7821_s10, [#allocation4]  }
 0x1d7   : > { %s53_s4 = ssub.s32 %s7800_s30, %s8386_s8  ;;  %p64_p9 = scmp.eq.s32.totalorder %s7800_s30, 0 }
 0x1d8   : > { %p54_p8 = scmp.eq.s32.totalorder %s53_s4, 0  ;;  %p6985_p5 = scmp.lt.s32.totalorder %s7800_s30, 2 }
 0x1d9   : > { %s56_s29 = sadd.s32 1, %s9388_s26  ;;  %s875_s9 = sand.u32 1, %s9388_s26  }
 0x1da   : > { %p63_p7 = scmp.ne.s32.totalorder %s9388_s26, %s9389_s7  ;;  %p69_p10 = scmp.ne.s32.totalorder %s9389_s7, %s9390_s24 }
 0x1db   : > { %p602_p11 = scmp.eq.s32.totalorder %s9391_s16, 1  ;;  %p9392_p1 = scmp.eq.s32.totalorder %s9391_s16, 0 }
 0x1dc   : > { %s8398_s0 = scalar_select %p54_p8, %s9388_s26, %s56_s29  }
 0x1dd   : > { %p65_p12 = por %p64_p9, %p63_p7  ;;  %p8402_p3 = por %p9392_p1, %p69_p10 }
 0x1de   : > { %p8406_p13 = por %p602_p11, %p63_p7  ;;  %s5648_s27 = sshll.u32 %s7800_s30, 4 }
 0x1df   : > { %s9395_s3 = sld [smem:[#allocation49_spill]]  ;;  %s878_s10 = scalar_lea.vmem [#allocation2], %s875_s9 }
 0x1e0   : > { %s9394_s2 = scalar_select %p8406_p13, 1, 0 }
 0x1e1   : > { %s885_s7 = sshll.u32 %s878_s10, 4  ;;  %p8420_p0 = pnand %p6985_p5, %p65_p12  ;;  %s8418_s7 = int_to_ptr.vmem [resolvable:$true] %s885_s7 }
 0x1e2   : > { %s876_s30 = scalar_lea.sflag [#allocation3], %s875_s9 }
 0x1e3   : > { %p7698_p4 = pneg %p8420_p0 }
 0x1e5   : > { %s8416_s6 = scalar_lea.hbm %s9395_s3, %s5648_s27  ;;  %s7701_s4 = scalar_lea.hbm %s9395_s3, 32 }
 0x1e6   : > { %s7696_s26 = scalar_lea.hbm %s8416_s6, 16  ;;  %p7702_p8 = scmp.lt.u32.totalorder %s8416_s6, %s9395_s3 }
 0x1e7   : > { %p7697_p2 = scmp.ne.s32.totalorder %s8416_s6, %s7696_s26  ;;  %p7703_p9 = scmp.lt.u32.totalorder %s7701_s4, %s7696_s26 }
 0x1e8   : > { %p7705_p11 = scmp.lt.u32.totalorder %s7696_s26, %s8416_s6 }
 0x1e9   : > { %p7699_p6 = pnand %p7698_p4, %p7697_p2  ;;  %p7704_p10 = por %p7703_p9, %p7702_p8 }
 0x1eb   : > { %p7700_p7 = pneg %p7699_p6  ;;  %p7706_p12 = por %p7705_p11, %p7704_p10 }
 0x1ed   : > { %p7707_p1 = pnand %p7706_p12, %p7700_p7 }
 0x1ef   : > { %7710 = shalt.err (!%p7707_p1)
}
 0x1f0   : > { %s7711_s9 = scalar_lea.vmem %s8418_s7, 16  ;;  %s7822_s22 = smov [#allocation2]  }
 0x1f1   : > { %p7712_p5 = scmp.ne.s32.totalorder %s8418_s7, %s7711_s9  ;;  %s7716_s10 = sshll.u32 %s7822_s22, 4  ;;  %s7717_s10 = int_to_ptr.vmem [resolvable:$false] %s7716_s10 }
 0x1f2   : > { %s7718_s16 = scalar_lea.vmem %s7717_s10, 32  ;;  %p7719_p13 = scmp.lt.s32.totalorder %s8418_s7, %s7717_s10 }
 0x1f3   : > { %p7714_p2 = pnand %p7712_p5, %p7698_p4  ;;  %p7720_p8 = scmp.lt.s32.totalorder %s7718_s16, %s7711_s9 }
 0x1f5   : > { %p7715_p6 = pneg %p7714_p2  ;;  %p7721_p9 = por %p7720_p8, %p7719_p13 }
 0x1f7   : > { %p7722_p10 = pnand %p7721_p9, %p7715_p6 }
 0x1f9   : > { %7725 = shalt.err (!%p7722_p10)
}
 0x1fa   : > { %6966 = dma.hbm_to_vmem [thread:$0]  (!%p8420_p0), %s8416_s6, 16, %s8418_s7, %s876_s30  }
 0x1fb   : > { %s9397_s26 = sld [smem:[#allocation48_spill]] }
 0x201   : > { %p9398_p7 = scmp.ne.s32.totalorder %s9397_s26, 0 }
 0x202   : > { %s9399_s29 = sld [smem:[#allocation45_spill]] (!%p9398_p7) }
 0x203   : > { %894 = sbr.rel (%p9398_p7) target bundleno = 5377 (0x1501), region = 116 }
 0x208   : > { %s8452_s4 = sand.u32 (!%p9398_p7), 1, %s9399_s29  }
 0x209   : > { %s897_s27 = scalar_lea.sflag (!%p9398_p7), [#allocation3], %s8452_s4  ;;  %s899_s1 = scalar_lea.vmem (!%p9398_p7), [#allocation2], %s8452_s4 }
 0x20a   : > { %7743 = dma.done.wait (%p8402_p3), %s897_s27, 16  }
 0x20b   : > { %7745 = vsyncadd (%p8402_p3), %s897_s27, 4294967280  ;;  %s9400_s24 = sld [smem:[#allocation47_spill]] }
 0x211   : > { %p9401_p13 = scmp.eq.s32.totalorder %s9400_s24, 0 }
 0x213   : > { %7747 = dma.done.wait (%p9401_p13), [#allocation6], 1024   ;;  %p9402_p0 = pmov %p9401_p13 }
 0x215   : > { %7749 = vsyncadd (%p9402_p0), [#allocation6], 4294966272  ;;  %p9403_p4 = pmov %p9402_p0 }
 0x216   : > { %p9404_p11 = pmov %p9402_p0 }
 0x217   : > { %7751 = dma.done.wait (%p9403_p4), [#allocation9], 6144  }
 0x218   : > { %7753 = vsyncadd (%p9404_p11), [#allocation9], 4294961152  ;;  %p9405_p12 = pmov %p9402_p0 }
 0x219   : > { %p9406_p1 = pmov %p9402_p0 }
 0x21a   : > { %7755 = dma.done.wait (%p9405_p12), [#allocation12], 10240  }
 0x21b   : > { %7757 = vsyncadd (%p9406_p1), [#allocation12], 4294957056  ;;  %p9407_p3 = pmov %p9402_p0 }
 0x21c   : > { %p9408_p5 = pmov %p9402_p0 }
 0x21d   : > { %7759 = dma.done.wait (%p9407_p3), [#allocation15], 7168  }
 0x21e   : > { %7761 = vsyncadd (%p9408_p5), [#allocation15], 4294960128  ;;  %p9409_p2 = pmov %p9402_p0 }
 0x21f   : > { %p9410_p6 = pmov %p9402_p0 }
 0x220   : > { %7763 = dma.done.wait (%p9409_p2), [#allocation18], 2048  }
 0x221   : > { %7765 = vsyncadd (%p9410_p6), [#allocation18], 4294965248  ;;  %p9411_p8 = pmov %p9402_p0 }
 0x222   : > { %p9412_p9 = pmov %p9402_p0 }
 0x223   : > { %7767 = dma.done.wait (%p9411_p8), [#allocation21], 2048  }
 0x224   : > { %7769 = vsyncadd (%p9412_p9), [#allocation21], 4294965248  ;;  %p9413_p10 = pmov %p9402_p0 }
 0x225   : > { %p9414_p7 = pmov %p9402_p0 }
 0x226   : > { %7771 = dma.done.wait (%p9413_p10), [#allocation24], 1024  }
 0x227   : > { %7773 = vsyncadd (%p9414_p7), [#allocation24], 4294966272  ;;  %p9415_p13 = pmov %p9402_p0 }
 0x229   : > { %7775 = dma.done.wait (%p9415_p13), [#allocation27], 768  }
 0x22a   : > { %7777 = vsyncadd (%p9402_p0), [#allocation27], 4294966528  ;;  %p9416_p4 = pmov %p9402_p0 }
 0x22b   : > { %p9417_p11 = pmov %p9402_p0 }
 0x22c   : > { %7779 = dma.done.wait (%p9416_p4), [#allocation30], 256  }
 0x22d   : > { %7781 = vsyncadd (%p9417_p11), [#allocation30], 4294967040  ;;  %p9418_p12 = pmov %p9402_p0 }
 0x22e   : > { %p9419_p1 = pmov %p9402_p0 }
 0x22f   : > { %7783 = dma.done.wait (%p9418_p12), [#allocation4], 16  }
 0x230   : > { %7785 = vsyncadd (%p9419_p1), [#allocation4], 4294967280 }
 0x231   : > { %976 = sfence }
 0x232   : > { %v1080_v0 = vld [vmem:[#allocation7] sm:$0xff]  ;;  %v7823_v2 = vmov 0   ;;  %v1081_v3 = vld [vmem:[#allocation7 + $0x8] sm:$0xff]  ;;  %v1049_v5 = vld [vmem:[#allocation5 + $0x18] sm:$0xff]  ;;  %vm1132_vm0 = vcmask 261120   ;;  %s9352_s12 = smov 1   ;;  %v1108_v59 = vlaneseq }
 0x233   : > { %v1046_v1 = vld [vmem:[#allocation5] sm:$0xff]  ;;  %7060 = vset.pattern.permute.xlu1 %v7823_v2  ;;  %7059 = vset.pattern.permute.xlu0 %v7823_v2  ;;  %v1047_v4 = vld [vmem:[#allocation5 + $0x8] sm:$0xff]  ;;  %v1048_v6 = vld [vmem:[#allocation5 + $0x10] sm:$0xff]  ;;  %s9420_s30 = sld [smem:[#allocation55_spill]]  ;;  %s9422_s29 = sld [smem:[#allocation58_spill]]  ;;  %vm4292_vm5 = vcmask 523264  }
 0x234   : > { %1086 = vperm.xlu1 %7060, %v1080_v0   ;;  %1052 = vperm.xlu0 %7059, %v1046_v1   ;;  %v1083_v7 = vld [vmem:[#allocation7 + $0x18] sm:$0xff]  ;;  %v1082_v8 = vld [vmem:[#allocation7 + $0x10] sm:$0xff]  ;;  %v1128_v22 = vld [vmem:[#allocation8 + $0x20] sm:$0xff]  ;;  %s9424_s7 = sld [smem:[#allocation59_spill]]  ;;  %v8573_v60 = vand.u32 127, %v1108_v59  ;;  %s9429_s16 = smov 1  }
 0x235   : > { %v5670_v11 = vld [vmem:[%s899_s1] ss:$0 sm:$0xff]  ;;  %v1123_v23 = vld [vmem:[#allocation8] sm:$0xff]  ;;  %6181 = vmatprep.mubr.msk.f32.mxu1 %vm1132_vm0, %v1128_v22  ;;  %v1329_v33 = vld [vmem:[#allocation10 + $0x10] sm:$0xff]  ;;  %s5668_s10 = sshll.u32 %s8452_s4, 8  ;;  %s9432_s3 = sld [smem:[#allocation62_spill]] }
 0x236   : > { %v1327_v28 = vld [vmem:[#allocation10] sm:$0xff]  ;;  %6195 = vmatprep.mubr.msk.f32.mxu0 %vm1132_vm0, %v1123_v23  ;;  %v1328_v34 = vld [vmem:[#allocation10 + $0x8] sm:$0xff]  ;;  %v1130_v36 = vld [vmem:[#allocation8 + $0x30] sm:$0xff]  ;;  %vm5925_vm1 = vcmp.ge.s32.totalorder %v8573_v60, 1  ;;  %vm5926_vm3 = vcmp.ge.s32.totalorder %v8573_v60, 2  ;;  %vm5170_vm6 = vcmask 7168  }
 0x237   : > { %v1129_v35 = vld [vmem:[#allocation8 + $0x28] sm:$0xff]  ;;  %v1330_v38 = vld [vmem:[#allocation10 + $0x18] sm:$0xff]  ;;  %v1644_v54 = vld [vmem:[#allocation14 + $0x40] sm:$0xff]  ;;  %p1041_p3 = scmp.lt.s32.totalorder %s9400_s24, 1  ;;  %s4934_s5 = sld [smem:[#allocation31]] }
 0x238   : > { %1091 = vperm.xlu1 %7060, %v1081_v3   ;;  %1057 = vperm.xlu0 %7059, %v1047_v4   ;;  %v1131_v39 = vld [vmem:[#allocation8 + $0x38] sm:$0xff]  ;;  %v1646_v56 = vld [vmem:[#allocation14 + $0x50] sm:$0xff]  ;;  %v1645_v57 = vld [vmem:[#allocation14 + $0x48] sm:$0xff]  ;;  %s9433_s4 = sld [smem:[#allocation63_spill]]  ;;  %p9434_p5 = scmp.ne.s32.totalorder %s9394_s2, 0 }
 0x239   : > { %s9421_s9 = smov %s9420_s30  ;;  %v1367_v37 = vld [vmem:[%s9420_s30 + $0x20] sm:$0xff]  ;;  %s9423_s27 = smov %s9422_s29  ;;  %vm8576_vm2 = vmpackc.low %vm5925_vm1, %vm5925_vm1  ;;  %v1896_v60 = vld [vmem:[#allocation8 + $0x48] sm:$0xff] }
 0x23a   : > { %v1369_v40 = vld [vmem:[%s9421_s9 + $0x30] sm:$0xff]  ;;  %v1368_v41 = vld [vmem:[%s9421_s9 + $0x28] sm:$0xff]  ;;  %v1363_v42 = vld [vmem:[%s9421_s9] sm:$0xff]  ;;  %s7825_s30 = smov 2   ;;  %s9442_s24 = smov (!%p1041_p3, %s9400_s24), 1 }
 0x23b   : > { %v1370_v43 = vld [vmem:[%s9421_s9 + $0x38] sm:$0xff]  ;;  %v1365_v44 = vld [vmem:[%s9421_s9 + $0x10] sm:$0xff]  ;;  %v1364_v45 = vld [vmem:[%s9421_s9 + $0x8] sm:$0xff]  ;;  %s5669_s6 = sshll.u32 %s9442_s24, 1  ;;  %s9435_s24 = sld [smem:[#allocation47_spill]] (%p9434_p5) }
 0x23c   : > { %1067 = vperm.xlu1 %7060, %v1049_v5   ;;  %1062 = vperm.xlu0 %7059, %v1048_v6   ;;  %v1568_v46 = vld [vmem:[%s9422_s29] sm:$0xff]  ;;  %v1366_v47 = vld [vmem:[%s9421_s9 + $0x18] sm:$0xff]  ;;  %v1569_v49 = vld [vmem:[%s9423_s27 + $0x8] sm:$0xff]  ;;  %s9430_s29 = sld [smem:[#allocation61_spill]] }
 0x23d   : > { %v1596_v48 = vld [vmem:[%s9424_s7] sm:$0xff]  ;;  %v1570_v50 = vld [vmem:[%s9423_s27 + $0x10] sm:$0xff]  ;;  %v1597_v51 = vld [vmem:[%s9424_s7 + $0x8] sm:$0xff] }
 0x23e   : > { %v1598_v52 = vld [vmem:[%s9424_s7 + $0x10] sm:$0xff]  ;;  %v1571_v53 = vld [vmem:[%s9423_s27 + $0x18] sm:$0xff]  ;;  %vm8703_vm4 = vmpackc.low %vm5926_vm3, %vm5926_vm3  ;;  %s1044_s26 = scalar_lea.vmem %s9433_s4, %s5669_s6  ;;  %s9436_s6 = sld [smem:[#allocation64_spill]] (%p9434_p5) }
 0x23f   : > { %v1599_v55 = vld [vmem:[%s9424_s7 + $0x18] sm:$0xff]  ;;  %v1124_v6 = vld [vmem:[#allocation8 + $0x8] sm:$0xff] }
 0x240   : > { %1101 = vperm.xlu1 %7060, %v1083_v7   ;;  %1096 = vperm.xlu0 %7059, %v1082_v8   ;;  %v1647_v58 = vld [vmem:[#allocation14 + $0x58] sm:$0xff]  ;;  %v1125_v7 = vld [vmem:[#allocation8 + $0x10] sm:$0xff] }
 0x241   : > { %v1126_v8 = vld [vmem:[#allocation8 + $0x18] sm:$0xff] }
 0x242   : > { %s9431_s1 = smov %s9430_s29 }
 0x2b3   : > { %v1087_v9 = vpop.permute.xlu1 %1086  ;;  %v1053_v10 = vpop.permute.xlu0 %1052 }
 0x2b4   : > { %v1076_v12 = vmul.f32 %v5670_v11, %v1053_v10 }
 0x2b6   : > { %v8502_v16 = vadd.f32 %v1087_v9, %v1076_v12  ;;  %v1355_v12 = vld [vmem:[#allocation11] sm:$0xff] }
 0x2b7   : > { %v1092_v13 = vpop.permute.xlu1 %1091  ;;  %v1058_v14 = vpop.permute.xlu0 %1057 }
 0x2b8   : > { %v1077_v15 = vmul.f32 %v5670_v11, %v1058_v14 }
 0x2ba   : > { %v8504_v17 = vadd.f32 %v1092_v13, %v1077_v15 }
 0x2bb   : > { %v1068_v18 = vpop.permute.xlu1 %1067  ;;  %v1063_v19 = vpop.permute.xlu0 %1062 }
 0x2bc   : > { %v7061_v20 = vpack.i.bf16 %v8504_v17, %v8502_v16  ;;  %v6594_v21 = vpack.c.bf16 %v8504_v17, %v8502_v16  ;;  %v1079_v24 = vmul.f32 %v5670_v11, %v1068_v18  ;;  %v1078_v25 = vmul.f32 %v5670_v11, %v1063_v19 }
 0x2be   : > { %7062 = vrot.lane.b32.xlu0 %v7061_v20, %s9352_s12  ;;  %6595 = vmatprep.subr.bf16.mxu1 %v6594_v21 }
 0x2bf   : > { %v1102_v26 = vpop.permute.xlu1 %1101  ;;  %v1097_v27 = vpop.permute.xlu0 %1096  ;;  %6597 = vmatpush3.bf16.msra.mxu1 %v6594_v21 }
 0x2c0   : > { %v8512_v29 = vadd.f32 %v1102_v26, %v1079_v24  ;;  %v8514_v30 = vadd.f32 %v1097_v27, %v1078_v25 }
 0x2c2   : > { %1333 = vperm.xlu0 %7059, %v1327_v28   ;;  %v7066_v31 = vpack.i.bf16 %v8512_v29, %v8514_v30  ;;  %v6598_v32 = vpack.c.bf16 %v8512_v29, %v8514_v30 }
 0x2c4   : > { %7067 = vrot.lane.b32.xlu1 %v7066_v31, %s9352_s12  ;;  %6599 = vmatprep.subr.bf16.mxu1 %v6598_v32  ;;  %s5915_s12 = sld [smem:[#allocation31 + $0x1]] }
 0x2c5   : > { %6601 = vmatpush3.bf16.msra.mxu1 %v6598_v32 }
 0x2c6   : > { %1343 = vperm.xlu0 %7059, %v1329_v33  }
 0x2c8   : > { %1338 = vperm.xlu1 %7060, %v1328_v34   ;;  %6182 = vmatmul.mubr.msk.f32.vlgmr.msra.gmra.mrb[0].mxu1 %vm1132_vm0, %v1129_v35 }
 0x2c9   : > { %6184 = vmatprep.mubr.msk.f32.mxu1 %vm1132_vm0, %v1130_v36  ;;  %v1356_v36 = vld [vmem:[#allocation11 + $0x8] sm:$0xff] }
 0x2ca   : > { %1393 = vperm.xlu0 %7059, %v1367_v37   ;;  %v1357_v37 = vld [vmem:[#allocation11 + $0x10] sm:$0xff] }
 0x2cc   : > { %1348 = vperm.xlu1 %7060, %v1330_v38   ;;  %6185 = vmatmul.mubr.msk.f32.gmra.mrb[2].mxu1 %vm1132_vm0, %v1131_v39  ;;  %v1358_v38 = vld [vmem:[#allocation11 + $0x18] sm:$0xff]  ;;  %v1359_v39 = vld [vmem:[#allocation11 + $0x20] sm:$0xff] }
 0x2cd   : > { %6209 = vmatprep.mubr.msk.f32.mxu1 %vm1132_vm0, %v1355_v12 }
 0x2ce   : > { %1403 = vperm.xlu0 %7059, %v1369_v40   ;;  %v1360_v40 = vld [vmem:[#allocation11 + $0x28] sm:$0xff] }
 0x2d0   : > { %1398 = vperm.xlu1 %7060, %v1368_v41   ;;  %v1361_v41 = vld [vmem:[#allocation11 + $0x30] sm:$0xff] }
 0x2d2   : > { %1373 = vperm.xlu0 %7059, %v1363_v42   ;;  %v1362_v42 = vld [vmem:[#allocation11 + $0x38] sm:$0xff] }
 0x2d4   : > { %1408 = vperm.xlu1 %7060, %v1370_v43   ;;  %v1624_v43 = vld [vmem:[#allocation13] sm:$0xff] }
 0x2d6   : > { %1383 = vperm.xlu0 %7059, %v1365_v44  }
 0x2d8   : > { %1378 = vperm.xlu1 %7060, %v1364_v45  }
 0x2da   : > { %1574 = vperm.xlu0 %7059, %v1568_v46  }
 0x2dc   : > { %1388 = vperm.xlu1 %7060, %v1366_v47  }
 0x2de   : > { %1602 = vperm.xlu0 %7059, %v1596_v48  }
 0x2e0   : > { %1579 = vperm.xlu1 %7060, %v1569_v49  }
 0x2e2   : > { %1584 = vperm.xlu0 %7059, %v1570_v50  }
 0x2e4   : > { %1607 = vperm.xlu1 %7060, %v1597_v51  }
 0x2e6   : > { %1612 = vperm.xlu0 %7059, %v1598_v52  }
 0x2e8   : > { %1589 = vperm.xlu1 %7060, %v1571_v53  }
 0x2ea   : > { %1690 = vperm.xlu0 %7059, %v1644_v54  }
 0x2ec   : > { %1617 = vperm.xlu1 %7060, %v1599_v55  }
 0x2ee   : > { %1700 = vperm.xlu0 %7059, %v1646_v56  }
 0x2f0   : > { %1695 = vperm.xlu1 %7060, %v1645_v57  }
 0x2f4   : > { %1705 = vperm.xlu1 %7060, %v1647_v58  }
 0x330   : > { %v7063_v61 = vpop.permute.xlu0 %7062 }
 0x331   : > { %v7065_v62 = vunpack.i.h.bf16 %v7063_v61  ;;  %v7064_v63 = vunpack.i.l.bf16 %v7063_v61 }
 0x333   : > { %v6602_v1 = vpack.c.bf16 %v7065_v62, %v7064_v63 }
 0x335   : > { %6604 = vmatprep.subr.msk.bf16.mxu0 %vm8576_vm2, %v6602_v1 }
 0x336   : > { %v7068_v2 = vpop.permute.xlu1 %7067  ;;  %6607 = vmatpush3.bf16.msk.msra.mxu0 %vm8576_vm2, %v6602_v1 }
 0x337   : > { %v7070_v3 = vunpack.i.h.bf16 %v7068_v2  ;;  %v7069_v4 = vunpack.i.l.bf16 %v7068_v2 }
 0x339   : > { %v6608_v5 = vpack.c.bf16 %v7070_v3, %v7069_v4 }
 0x33b   : > { %6610 = vmatprep.subr.msk.bf16.mxu0 %vm8576_vm2, %v6608_v5 }
 0x33c   : > { %6613 = vmatpush3.bf16.msk.msra.mxu0 %vm8576_vm2, %v6608_v5 }
 0x33f   : > { %6196 = vmatmul.mubr.msk.f32.vlgmr.msra.gmra.mrb[0].mxu0 %vm1132_vm0, %v1124_v6 }
 0x340   : > { %6198 = vmatprep.mubr.msk.f32.mxu0 %vm1132_vm0, %v1125_v7 }
 0x341   : > { %v1334_v18 = vpop.permute.xlu0 %1333 }
 0x343   : > { %6199 = vmatmul.mubr.msk.f32.gmra.mrb[2].mxu0 %vm1132_vm0, %v1126_v8 }
 0x344   : > { %6229 = vmatprep.mubr.msk.f32.mxu0 %vm1132_vm0, %v1624_v43 }
 0x345   : > { %v1344_v32 = vpop.permute.xlu0 %1343 }
 0x347   : > { %v1339_v14 = vpop.permute.xlu1 %1338 }
 0x349   : > { %v1394_v48 = vpop.permute.xlu0 %1393 }
 0x34b   : > { %v1349_v27 = vpop.permute.xlu1 %1348 }
 0x34d   : > { %v1404_v55 = vpop.permute.xlu0 %1403 }
 0x34f   : > { %v1399_v46 = vpop.permute.xlu1 %1398 }
 0x351   : > { %v1374_v5 = vpop.permute.xlu0 %1373 }
 0x353   : > { %v1409_v53 = vpop.permute.xlu1 %1408 }
 0x357   : > { %v1379_v3 = vpop.permute.xlu1 %1378 }
 0x35b   : > { %v1389_v8 = vpop.permute.xlu1 %1388 }
 0x39b   : > { %v6183_v9 = vpop.f32.mrb[0].mxu1 }
 0x39c   : > { %v1211_v10 = vpop.f32.mrb[1].mxu1 }
 0x39f   : > { %v6186_v11 = vpop.f32.mrb[2].mxu1 }
 0x3a0   : > { %v1221_v13 = vpop.f32.mrb[3].mxu1 }
 0x412   : > { %v6197_v15 = vpop.f32.mrb[0].mxu0 }
 0x413   : > { %v1314_v19 = vadd.f32 %v6197_v15, %v6183_v9  ;;  %v1308_v20 = vpop.f32.mrb[1].mxu0 }
 0x414   : > { %v1309_v21 = vadd.f32 %v1308_v20, %v1211_v10  ;;  %v1384_v10 = vpop.permute.xlu0 %1383  ;;  %v1580_v20 = vpop.permute.xlu1 %1579 }
 0x415   : > { %v1352_v22 = vadd.f32 %v1339_v14, %v1314_v19 }
 0x416   : > { %v1351_v23 = vadd.f32 %v1334_v18, %v1309_v21  ;;  %v6200_v24 = vpop.f32.mrb[2].mxu0 }
 0x417   : > { %v1324_v25 = vadd.f32 %v6200_v24, %v6186_v11  ;;  %v1318_v26 = vpop.f32.mrb[3].mxu0 }
 0x418   : > { %v1319_v28 = vadd.f32 %v1318_v26, %v1221_v13  ;;  %v6614_v31 = vpack.c.bf16 %v1352_v22, %v1351_v23  ;;  %v1575_v22 = vpop.permute.xlu0 %1574  ;;  %v1608_v26 = vpop.permute.xlu1 %1607 }
 0x419   : > { %v1354_v33 = vadd.f32 %v1349_v27, %v1324_v25 }
 0x41a   : > { %v1353_v34 = vadd.f32 %v1344_v32, %v1319_v28  ;;  %6615 = vmatprep.subr.bf16.mxu1 %v6614_v31 }
 0x41b   : > { %6617 = vmatpush3.bf16.msra.mxu1 %v6614_v31 }
 0x41c   : > { %v6618_v35 = vpack.c.bf16 %v1354_v33, %v1353_v34  ;;  %v1603_v27 = vpop.permute.xlu0 %1602 }
 0x41e   : > { %6619 = vmatprep.subr.bf16.mxu1 %v6618_v35 }
 0x41f   : > { %6621 = vmatpush3.bf16.msra.mxu1 %v6618_v35 }
 0x422   : > { %6210 = vmatmul.mubr.msk.f32.vlgmr.msra.gmra.mrb[4].mxu1 %vm1132_vm0, %v1356_v36  ;;  %v1590_v36 = vpop.permute.xlu1 %1589 }
 0x423   : > { %6212 = vmatprep.mubr.msk.f32.mxu1 %vm1132_vm0, %v1357_v37 }
 0x426   : > { %6213 = vmatmul.mubr.msk.f32.gmra.mrb[6].mxu1 %vm1132_vm0, %v1358_v38 }
 0x427   : > { %6215 = vmatprep.mubr.msk.f32.mxu1 %vm1132_vm0, %v1359_v39  ;;  %v1585_v39 = vpop.permute.xlu0 %1584 }
 0x42a   : > { %6216 = vmatmul.mubr.msk.f32.gmra.mrb[8].mxu1 %vm1132_vm0, %v1360_v40 }
 0x42b   : > { %6218 = vmatprep.mubr.msk.f32.mxu1 %vm1132_vm0, %v1361_v41 }
 0x42e   : > { %6219 = vmatmul.mubr.msk.f32.gmra.mrb[10].mxu1 %vm1132_vm0, %v1362_v42 }
 0x4f5   : > { %v6211_v44 = vpop.f32.mrb[4].mxu1 }
 0x4f6   : > { %v1501_v45 = vpop.f32.mrb[5].mxu1  ;;  %v1507_v9 = vadd.f32 %v6211_v44, %v1379_v3  ;;  %v1634_v3 = vld [vmem:[#allocation13 + $0x50] sm:$0xff] }
 0x4f7   : > { %v1502_v11 = vadd.f32 %v1501_v45, %v1374_v5 }
 0x4f9   : > { %v6214_v47 = vpop.f32.mrb[6].mxu1 }
 0x4fa   : > { %v1511_v49 = vpop.f32.mrb[7].mxu1  ;;  %v1517_v14 = vadd.f32 %v6214_v47, %v1389_v8 }
 0x4fb   : > { %v1512_v18 = vadd.f32 %v1511_v49, %v1384_v10  ;;  %v1618_v49 = vpop.permute.xlu1 %1617 }
 0x4fd   : > { %v6217_v50 = vpop.f32.mrb[8].mxu1 }
 0x4fe   : > { %v1527_v51 = vadd.f32 %v6217_v50, %v1399_v46  ;;  %v1521_v52 = vpop.f32.mrb[9].mxu1 }
 0x4ff   : > { %v1522_v54 = vadd.f32 %v1521_v52, %v1394_v48  ;;  %v1613_v52 = vpop.permute.xlu0 %1612 }
 0x500   : > { %v1545_v56 = vsub.f32 0.0, %v1527_v51 }
 0x501   : > { %v1544_v57 = vsub.f32 0.0, %v1522_v54  ;;  %v6220_v58 = vpop.f32.mrb[10].mxu1 }
 0x502   : > { %v1550_v59 = vmul.f32 1.442695, %v1545_v56  ;;  %v1537_v61 = vadd.f32 %v6220_v58, %v1409_v53  ;;  %v1531_v62 = vpop.f32.mrb[11].mxu1  ;;  %v1625_v56 = vld [vmem:[#allocation13 + $0x8] sm:$0xff]  ;;  %v1627_v58 = vld [vmem:[#allocation13 + $0x18] sm:$0xff] }
 0x503   : > { %v1548_v63 = vmul.f32 1.442695, %v1544_v57  ;;  %v1532_v1 = vadd.f32 %v1531_v62, %v1404_v55  ;;  %v1626_v57 = vld [vmem:[#allocation13 + $0x10] sm:$0xff] }
 0x504   : > { %7101 = vpow2.f32 %v1550_v59  ;;  %v1547_v2 = vsub.f32 0.0, %v1537_v61  ;;  %v1628_v59 = vld [vmem:[#allocation13 + $0x20] sm:$0xff]  ;;  %v1629_v61 = vld [vmem:[#allocation13 + $0x28] sm:$0xff]  ;;  %v1630_v62 = vld [vmem:[#allocation13 + $0x30] sm:$0xff] }
 0x505   : > { %7103 = vpow2.f32 %v1548_v63  ;;  %v1546_v4 = vsub.f32 0.0, %v1532_v1  ;;  %v1631_v63 = vld [vmem:[#allocation13 + $0x38] sm:$0xff]  ;;  %v1632_v1 = vld [vmem:[#allocation13 + $0x40] sm:$0xff] }
 0x506   : > { %v1554_v6 = vmul.f32 1.442695, %v1547_v2  ;;  %v1633_v2 = vld [vmem:[#allocation13 + $0x48] sm:$0xff] }
 0x507   : > { %v1552_v7 = vmul.f32 1.442695, %v1546_v4  ;;  %v1635_v4 = vld [vmem:[#allocation13 + $0x58] sm:$0xff] }
 0x508   : > { %7105 = vpow2.f32 %v1554_v6 }
 0x509   : > { %7107 = vpow2.f32 %v1552_v7 }
 0x50a   : > { %7109 = vtanh.f32 %v1507_v9 }
 0x50b   : > { %7111 = vtanh.f32 %v1502_v11 }
 0x50e   : > { %v7102_v12 = vpop.eup %7101 }
 0x50f   : > { %v7104_v13 = vpop.eup %7103  ;;  %v1557_v15 = vadd.f32 1.0, %v7102_v12 }
 0x510   : > { %v1556_v19 = vadd.f32 1.0, %v7104_v13  ;;  %v1900_v13 = vld [vmem:[#allocation8 + $0x60] sm:$0xff] }
 0x511   : > { %7113 = vrcp.f32 %v1557_v15  ;;  %6255 = vmatprep.mubr.msk.f32.mxu1 %vm1132_vm0, %v1900_v13  ;;  %v1691_v15 = vpop.permute.xlu0 %1690 }
 0x512   : > { %v7106_v21 = vpop.eup %7105  ;;  %7115 = vrcp.f32 %v1556_v19 }
 0x513   : > { %v7108_v23 = vpop.eup %7107  ;;  %7117 = vtanh.f32 %v1517_v14  ;;  %v1559_v24 = vadd.f32 1.0, %v7106_v21  ;;  %v1696_v14 = vpop.permute.xlu1 %1695 }
 0x514   : > { %7119 = vtanh.f32 %v1512_v18  ;;  %v1558_v25 = vadd.f32 1.0, %v7108_v23  ;;  %v7110_v28 = vpop.eup %7109 }
 0x515   : > { %7121 = vrcp.f32 %v1559_v24  ;;  %v7112_v31 = vpop.eup %7111 }
 0x516   : > { %7123 = vrcp.f32 %v1558_v25 }
 0x517   : > { %v1706_v23 = vpop.permute.xlu1 %1705 }
 0x51b   : > { %v7114_v32 = vpop.eup %7113 }
 0x51c   : > { %v7116_v33 = vpop.eup %7115  ;;  %v1565_v34 = vmul.f32 %v7114_v32, %v7110_v28 }
 0x51d   : > { %v7118_v35 = vpop.eup %7117  ;;  %v1564_v37 = vmul.f32 %v7116_v33, %v7112_v31 }
 0x51e   : > { %v7120_v38 = vpop.eup %7119  ;;  %v1593_v40 = vmul.f32 %v1580_v20, %v1565_v34 }
 0x51f   : > { %v7122_v41 = vpop.eup %7121  ;;  %v1592_v42 = vmul.f32 %v1575_v22, %v1564_v37  ;;  %v2101_v37 = vld [vmem:[#allocation10 + $0x30] sm:$0xff] }
 0x520   : > { %v7124_v43 = vpop.eup %7123  ;;  %v1621_v44 = vadd.f32 %v1608_v26, %v1593_v40  ;;  %v1567_v45 = vmul.f32 %v7122_v41, %v7118_v35  ;;  %v1701_v26 = vpop.permute.xlu0 %1700  ;;  %v5727_v40 = vld [vmem:[%s9421_s9 + $0x60] sm:$0xff] }
 0x521   : > { %v1620_v46 = vadd.f32 %v1603_v27, %v1592_v42  ;;  %v1566_v47 = vmul.f32 %v7124_v43, %v7120_v38  ;;  %v1902_v38 = vld [vmem:[#allocation8 + $0x70] sm:$0xff]  ;;  %v1903_v41 = vld [vmem:[#allocation8 + $0x78] sm:$0xff]  ;;  %v1895_v42 = vld [vmem:[#allocation8 + $0x40] sm:$0xff] }
 0x522   : > { %v1595_v48 = vmul.f32 %v1590_v36, %v1567_v45  ;;  %v5728_v43 = vld [vmem:[%s9421_s9 + $0x68] sm:$0xff]  ;;  %v5730_v45 = vld [vmem:[%s9421_s9 + $0x78] sm:$0xff] }
 0x523   : > { %v6622_v50 = vpack.c.bf16 %v1621_v44, %v1620_v46  ;;  %v1594_v51 = vmul.f32 %v1585_v39, %v1566_v47  ;;  %v2102_v39 = vld [vmem:[#allocation10 + $0x38] sm:$0xff]  ;;  %v5729_v44 = vld [vmem:[%s9421_s9 + $0x70] sm:$0xff]  ;;  %v5724_v47 = vld [vmem:[%s9421_s9 + $0x48] sm:$0xff] }
 0x524   : > { %v1623_v53 = vadd.f32 %v1618_v49, %v1595_v48  ;;  %v5723_v46 = vld [vmem:[%s9421_s9 + $0x40] sm:$0xff]  ;;  %v5725_v48 = vld [vmem:[%s9421_s9 + $0x50] sm:$0xff]  ;;  %v5726_v49 = vld [vmem:[%s9421_s9 + $0x58] sm:$0xff] }
 0x525   : > { %6623 = vmatprep.subr.bf16.mxu0 %v6622_v50  ;;  %v1622_v54 = vadd.f32 %v1613_v52, %v1594_v51  ;;  %v5740_v51 = vld [vmem:[%s9423_s27 + $0x28] sm:$0xff]  ;;  %v5743_v52 = vld [vmem:[%s9424_s7 + $0x20] sm:$0xff] }
 0x526   : > { %6625 = vmatpush3.bf16.msra.mxu0 %v6622_v50  ;;  %v5739_v50 = vld [vmem:[%s9423_s27 + $0x20] sm:$0xff] }
 0x527   : > { %v6626_v55 = vpack.c.bf16 %v1623_v53, %v1622_v54  ;;  %v5744_v53 = vld [vmem:[%s9424_s7 + $0x28] sm:$0xff]  ;;  %v5741_v54 = vld [vmem:[%s9423_s27 + $0x30] sm:$0xff] }
 0x529   : > { %6627 = vmatprep.subr.bf16.mxu0 %v6626_v55 }
 0x52a   : > { %6629 = vmatpush3.bf16.msra.mxu0 %v6626_v55  ;;  %v5742_v55 = vld [vmem:[%s9423_s27 + $0x38] sm:$0xff] }
 0x52d   : > { %6230 = vmatmul.mubr.msk.f32.vlgmr.msra.gmra.mrb[4].mxu0 %vm1132_vm0, %v1625_v56  ;;  %v5745_v56 = vld [vmem:[%s9424_s7 + $0x30] sm:$0xff] }
 0x52e   : > { %6232 = vmatprep.mubr.msk.f32.mxu0 %vm1132_vm0, %v1626_v57  ;;  %v5746_v57 = vld [vmem:[%s9424_s7 + $0x38] sm:$0xff] }
 0x531   : > { %6233 = vmatmul.mubr.msk.f32.gmra.mrb[6].mxu0 %vm1132_vm0, %v1627_v58  ;;  %v2422_v58 = vld [vmem:[#allocation14 + $0xa0] sm:$0xff] }
 0x532   : > { %6235 = vmatprep.mubr.msk.f32.mxu0 %vm1132_vm0, %v1628_v59  ;;  %v2423_v59 = vld [vmem:[#allocation14 + $0xa8] sm:$0xff] }
 0x535   : > { %6236 = vmatmul.mubr.msk.f32.gmra.mrb[8].mxu0 %vm1132_vm0, %v1629_v61  ;;  %v2424_v61 = vld [vmem:[#allocation14 + $0xb0] sm:$0xff] }
 0x536   : > { %6238 = vmatprep.mubr.msk.f32.mxu0 %vm1132_vm0, %v1630_v62  ;;  %v2425_v62 = vld [vmem:[#allocation14 + $0xb8] sm:$0xff] }
 0x539   : > { %6239 = vmatmul.mubr.msk.f32.gmra.mrb[10].mxu0 %vm1132_vm0, %v1631_v63 }
 0x53a   : > { %6241 = vmatprep.mubr.msk.f32.mxu0 %vm1132_vm0, %v1632_v1 }
 0x53d   : > { %6242 = vmatmul.mubr.msk.f32.gmra.mrb[12].mxu0 %vm1132_vm0, %v1633_v2 }
 0x53e   : > { %6244 = vmatprep.mubr.msk.f32.mxu0 %vm1132_vm0, %v1634_v3  ;;  %v4443_v3 = vld [vmem:[#allocation20 + $0x28] sm:$0xff] }
 0x541   : > { %6245 = vmatmul.mubr.msk.f32.gmra.mrb[14].mxu0 %vm1132_vm0, %v1635_v4 }
 0x600   : > { %v8611_v5 = vpop.f32.mrb[4].mxu0 }
 0x601   : > { %v8613_v6 = vpop.f32.mrb[5].mxu0 }
 0x604   : > { %v8615_v7 = vpop.f32.mrb[6].mxu0 }
 0x605   : > { %v8617_v8 = vpop.f32.mrb[7].mxu0 }
 0x608   : > { %v8619_v9 = vpop.f32.mrb[8].mxu0 }
 0x609   : > { %v8621_v10 = vpop.f32.mrb[9].mxu0 }
 0x60c   : > { %v8623_v11 = vpop.f32.mrb[10].mxu0 }
 0x60d   : > { %v8625_v12 = vpop.f32.mrb[11].mxu0 }
 0x610   : > { %v6243_v18 = vpop.f32.mrb[12].mxu0 }
 0x611   : > { %v1856_v19 = vadd.f32 %v6243_v18, %v1696_v14  ;;  %v1850_v20 = vpop.f32.mrb[13].mxu0 }
 0x612   : > { %v1851_v21 = vadd.f32 %v1850_v20, %v1691_v15  ;;  %v1898_v20 = vld [vmem:[#allocation8 + $0x58] sm:$0xff] }
 0x613   : > { %v8629_v22 = vadd.f32 %v1856_v19, %v8504_v17  ;;  %v1897_v19 = vld [vmem:[#allocation8 + $0x50] sm:$0xff] }
 0x614   : > { %v8632_v24 = vadd.f32 %v1851_v21, %v8502_v16  ;;  %v6246_v25 = vpop.f32.mrb[14].mxu0  ;;  %v2099_v16 = vld [vmem:[#allocation10 + $0x20] sm:$0xff] }
 0x615   : > { %v1866_v27 = vadd.f32 %v6246_v25, %v1706_v23  ;;  %v1860_v28 = vpop.f32.mrb[15].mxu0  ;;  %v2128_v21 = vld [vmem:[#allocation11 + $0x40] sm:$0xff] }
 0x616   : > { %v1861_v31 = vadd.f32 %v1860_v28, %v1701_v26  ;;  %v7071_v32 = vpack.i.bf16 %v8629_v22, %v8632_v24  ;;  %v6630_v33 = vpack.c.bf16 %v8629_v22, %v8632_v24 }
 0x617   : > { %v8639_v34 = vadd.f32 %v1866_v27, %v8512_v29  ;;  %v2100_v29 = vld [vmem:[#allocation10 + $0x28] sm:$0xff] }
 0x618   : > { %v8642_v17 = vadd.f32 %v1861_v31, %v8514_v30  ;;  %7072 = vrot.lane.b32.xlu0 %v7071_v32, %s7825_s30  ;;  %6631 = vmatprep.subr.bf16.mxu1 %v6630_v33  ;;  %v1901_v30 = vld [vmem:[#allocation8 + $0x68] sm:$0xff] }
 0x619   : > { %6633 = vmatpush3.bf16.msra.mxu1 %v6630_v33 }
 0x61a   : > { %v7076_v35 = vpack.i.bf16 %v8639_v34, %v8642_v17  ;;  %v6634_v36 = vpack.c.bf16 %v8639_v34, %v8642_v17 }
 0x61c   : > { %7077 = vrot.lane.b32.xlu1 %v7076_v35, %s7825_s30  ;;  %2105 = vperm.xlu0 %7059, %v2099_v16  }
 0x61d   : > { %6635 = vmatprep.subr.bf16.mxu1 %v6634_v36 }
 0x61e   : > { %6637 = vmatpush3.bf16.msra.mxu1 %v6634_v36 }
 0x620   : > { %2110 = vperm.xlu1 %7060, %v2100_v29   ;;  %2115 = vperm.xlu0 %7059, %v2101_v37  }
 0x621   : > { %6256 = vmatmul.mubr.msk.f32.vlgmr.msra.gmra.mrb[12].mxu1 %vm1132_vm0, %v1901_v30 }
 0x622   : > { %6258 = vmatprep.mubr.msk.f32.mxu1 %vm1132_vm0, %v1902_v38  ;;  %v2129_v38 = vld [vmem:[#allocation11 + $0x48] sm:$0xff] }
 0x624   : > { %2120 = vperm.xlu1 %7060, %v2102_v39   ;;  %2167 = vperm.xlu0 %7059, %v5727_v40   ;;  %v2130_v39 = vld [vmem:[#allocation11 + $0x50] sm:$0xff]  ;;  %v2131_v40 = vld [vmem:[#allocation11 + $0x58] sm:$0xff] }
 0x625   : > { %6259 = vmatmul.mubr.msk.f32.gmra.mrb[14].mxu1 %vm1132_vm0, %v1903_v41  ;;  %v2132_v41 = vld [vmem:[#allocation11 + $0x60] sm:$0xff] }
 0x626   : > { %6269 = vmatprep.mubr.msk.f32.mxu1 %vm1132_vm0, %v1895_v42  ;;  %v2133_v42 = vld [vmem:[#allocation11 + $0x68] sm:$0xff] }
 0x628   : > { %2172 = vperm.xlu1 %7060, %v5728_v43   ;;  %2177 = vperm.xlu0 %7059, %v5729_v44   ;;  %v2134_v43 = vld [vmem:[#allocation11 + $0x70] sm:$0xff]  ;;  %v2135_v44 = vld [vmem:[#allocation11 + $0x78] sm:$0xff] }
 0x62c   : > { %2182 = vperm.xlu1 %7060, %v5730_v45   ;;  %2147 = vperm.xlu0 %7059, %v5723_v46   ;;  %v2401_v45 = vld [vmem:[#allocation13 + $0x60] sm:$0xff] }
 0x62d   : > { %6303 = vmatprep.mubr.msk.f32.mxu0 %vm1132_vm0, %v2401_v45 }
 0x630   : > { %2152 = vperm.xlu1 %7060, %v5724_v47   ;;  %2157 = vperm.xlu0 %7059, %v5725_v48  }
 0x634   : > { %2162 = vperm.xlu1 %7060, %v5726_v49   ;;  %2349 = vperm.xlu0 %7059, %v5739_v50  }
 0x638   : > { %2354 = vperm.xlu1 %7060, %v5740_v51   ;;  %2378 = vperm.xlu0 %7059, %v5743_v52  }
 0x63c   : > { %2383 = vperm.xlu1 %7060, %v5744_v53   ;;  %2359 = vperm.xlu0 %7059, %v5741_v54  }
 0x640   : > { %2364 = vperm.xlu1 %7060, %v5742_v55   ;;  %2388 = vperm.xlu0 %7059, %v5745_v56  }
 0x644   : > { %2393 = vperm.xlu1 %7060, %v5746_v57   ;;  %2468 = vperm.xlu0 %7059, %v2422_v58  }
 0x648   : > { %2473 = vperm.xlu1 %7060, %v2423_v59   ;;  %2478 = vperm.xlu0 %7059, %v2424_v61  }
 0x64c   : > { %2483 = vperm.xlu1 %7060, %v2425_v62  }
 0x68a   : > { %v7073_v63 = vpop.permute.xlu0 %7072 }
 0x68b   : > { %v7075_v1 = vunpack.i.h.bf16 %v7073_v63  ;;  %v7074_v2 = vunpack.i.l.bf16 %v7073_v63 }
 0x68d   : > { %v6638_v4 = vpack.c.bf16 %v7075_v1, %v7074_v2 }
 0x68e   : > { %v7078_v13 = vpop.permute.xlu1 %7077 }
 0x68f   : > { %v7080_v14 = vunpack.i.h.bf16 %v7078_v13  ;;  %v7079_v15 = vunpack.i.l.bf16 %v7078_v13  ;;  %6640 = vmatprep.subr.msk.bf16.mxu1 %vm8703_vm4, %v6638_v4 }
 0x690   : > { %6643 = vmatpush3.bf16.msk.msra.mxu1 %vm8703_vm4, %v6638_v4 }
 0x691   : > { %v6644_v18 = vpack.c.bf16 %v7080_v14, %v7079_v15 }
 0x693   : > { %6646 = vmatprep.subr.msk.bf16.mxu1 %vm8703_vm4, %v6644_v18 }
 0x694   : > { %6649 = vmatpush3.bf16.msk.msra.mxu1 %vm8703_vm4, %v6644_v18 }
 0x697   : > { %6270 = vmatmul.mubr.msk.f32.vlgmr.msra.gmra.mrb[12].mxu1 %vm1132_vm0, %v1896_v60 }
 0x698   : > { %6272 = vmatprep.mubr.msk.f32.mxu1 %vm1132_vm0, %v1897_v19 }
 0x69b   : > { %6273 = vmatmul.mubr.msk.f32.gmra.mrb[14].mxu1 %vm1132_vm0, %v1898_v20  ;;  %v2106_v25 = vpop.permute.xlu0 %2105 }
 0x69c   : > { %6283 = vmatprep.mubr.msk.f32.mxu1 %vm1132_vm0, %v2128_v21 }
 0x69f   : > { %v2111_v23 = vpop.permute.xlu1 %2110  ;;  %v2116_v35 = vpop.permute.xlu0 %2115 }
 0x6a3   : > { %v2121_v32 = vpop.permute.xlu1 %2120  ;;  %v2168_v50 = vpop.permute.xlu0 %2167 }
 0x6a7   : > { %v2173_v48 = vpop.permute.xlu1 %2172  ;;  %v2178_v57 = vpop.permute.xlu0 %2177 }
 0x6ab   : > { %v2183_v55 = vpop.permute.xlu1 %2182  ;;  %v2148_v18 = vpop.permute.xlu0 %2147 }
 0x6af   : > { %v2153_v14 = vpop.permute.xlu1 %2152 }
 0x6b3   : > { %v2163_v20 = vpop.permute.xlu1 %2162 }
 0x76a   : > { %v6271_v26 = vpop.f32.mrb[12].mxu1 }
 0x76b   : > { %v2124_v27 = vadd.f32 %v6271_v26, %v2111_v23  ;;  %v2079_v28 = vpop.f32.mrb[13].mxu1  ;;  %v2158_v23 = vpop.permute.xlu0 %2157 }
 0x76c   : > { %v2123_v31 = vadd.f32 %v2106_v25, %v2079_v28 }
 0x76e   : > { %v6650_v33 = vpack.c.bf16 %v2124_v27, %v2123_v31  ;;  %v6274_v16 = vpop.f32.mrb[14].mxu1 }
 0x76f   : > { %v2126_v36 = vadd.f32 %v6274_v16, %v2121_v32  ;;  %v2089_v29 = vpop.f32.mrb[15].mxu1  ;;  %v2355_v16 = vpop.permute.xlu1 %2354 }
 0x770   : > { %v2125_v37 = vadd.f32 %v2116_v35, %v2089_v29  ;;  %6651 = vmatprep.subr.bf16.mxu1 %v6650_v33 }
 0x771   : > { %6653 = vmatpush3.bf16.msra.mxu1 %v6650_v33 }
 0x772   : > { %v6654_v30 = vpack.c.bf16 %v2126_v36, %v2125_v37  ;;  %v2350_v36 = vpop.permute.xlu0 %2349 }
 0x774   : > { %6655 = vmatprep.subr.bf16.mxu1 %v6654_v30 }
 0x775   : > { %6657 = vmatpush3.bf16.msra.mxu1 %v6654_v30 }
 0x778   : > { %6284 = vmatmul.mubr.msk.f32.vlgmr.msra.gmra.mrb[16].mxu1 %vm1132_vm0, %v2129_v38  ;;  %v2384_v38 = vpop.permute.xlu1 %2383 }
 0x779   : > { %6286 = vmatprep.mubr.msk.f32.mxu1 %vm1132_vm0, %v2130_v39  ;;  %v2379_v39 = vpop.permute.xlu0 %2378 }
 0x77c   : > { %6287 = vmatmul.mubr.msk.f32.gmra.mrb[18].mxu1 %vm1132_vm0, %v2131_v40 }
 0x77d   : > { %6289 = vmatprep.mubr.msk.f32.mxu1 %vm1132_vm0, %v2132_v41 }
 0x780   : > { %6290 = vmatmul.mubr.msk.f32.gmra.mrb[20].mxu1 %vm1132_vm0, %v2133_v42 }
 0x781   : > { %6292 = vmatprep.mubr.msk.f32.mxu1 %vm1132_vm0, %v2134_v43 }
 0x784   : > { %6293 = vmatmul.mubr.msk.f32.gmra.mrb[22].mxu1 %vm1132_vm0, %v2135_v44 }
 0x84b   : > { %v6285_v46 = vpop.f32.mrb[16].mxu1 }
 0x84c   : > { %v2275_v47 = vpop.f32.mrb[17].mxu1  ;;  %v2281_v21 = vadd.f32 %v6285_v46, %v2153_v14  ;;  %v2365_v46 = vpop.permute.xlu1 %2364  ;;  %v2403_v14 = vld [vmem:[#allocation13 + $0x70] sm:$0xff] }
 0x84d   : > { %v2276_v25 = vadd.f32 %v2275_v47, %v2148_v18  ;;  %v2405_v18 = vld [vmem:[#allocation13 + $0x80] sm:$0xff] }
 0x84f   : > { %v6288_v49 = vpop.f32.mrb[18].mxu1 }
 0x850   : > { %v2285_v51 = vpop.f32.mrb[19].mxu1  ;;  %v2291_v28 = vadd.f32 %v6288_v49, %v2163_v20  ;;  %v2360_v49 = vpop.permute.xlu0 %2359  ;;  %v2408_v20 = vld [vmem:[#allocation13 + $0x98] sm:$0xff] }
 0x851   : > { %v2286_v32 = vadd.f32 %v2285_v51, %v2158_v23  ;;  %v2410_v23 = vld [vmem:[#allocation13 + $0xa8] sm:$0xff] }
 0x853   : > { %v6291_v52 = vpop.f32.mrb[20].mxu1 }
 0x854   : > { %v2301_v53 = vadd.f32 %v6291_v52, %v2173_v48  ;;  %v2295_v54 = vpop.f32.mrb[21].mxu1 }
 0x855   : > { %v2296_v56 = vadd.f32 %v2295_v54, %v2168_v50 }
 0x856   : > { %v2319_v58 = vsub.f32 0.0, %v2301_v53 }
 0x857   : > { %v2318_v59 = vsub.f32 0.0, %v2296_v56  ;;  %v6294_v61 = vpop.f32.mrb[22].mxu1 }
 0x858   : > { %v2324_v62 = vmul.f32 1.442695, %v2319_v58  ;;  %v2311_v63 = vadd.f32 %v6294_v61, %v2183_v55  ;;  %v2305_v1 = vpop.f32.mrb[23].mxu1 }
 0x859   : > { %v2322_v2 = vmul.f32 1.442695, %v2318_v59  ;;  %v2306_v4 = vadd.f32 %v2305_v1, %v2178_v57  ;;  %v2394_v59 = vpop.permute.xlu1 %2393 }
 0x85a   : > { %7125 = vpow2.f32 %v2324_v62  ;;  %v2321_v13 = vsub.f32 0.0, %v2311_v63  ;;  %v2389_v63 = vpop.permute.xlu0 %2388 }
 0x85b   : > { %7127 = vpow2.f32 %v2322_v2  ;;  %v2320_v15 = vsub.f32 0.0, %v2306_v4 }
 0x85c   : > { %v2328_v60 = vmul.f32 1.442695, %v2321_v13  ;;  %v2402_v13 = vld [vmem:[#allocation13 + $0x68] sm:$0xff] }
 0x85d   : > { %v2326_v19 = vmul.f32 1.442695, %v2320_v15  ;;  %v2404_v15 = vld [vmem:[#allocation13 + $0x78] sm:$0xff] }
 0x85e   : > { %7129 = vpow2.f32 %v2328_v60  ;;  %v2406_v60 = vld [vmem:[#allocation13 + $0x88] sm:$0xff] }
 0x85f   : > { %7131 = vpow2.f32 %v2326_v19  ;;  %v2407_v19 = vld [vmem:[#allocation13 + $0x90] sm:$0xff] }
 0x860   : > { %7133 = vtanh.f32 %v2281_v21  ;;  %v2409_v21 = vld [vmem:[#allocation13 + $0xa0] sm:$0xff] }
 0x861   : > { %7135 = vtanh.f32 %v2276_v25  ;;  %v2411_v25 = vld [vmem:[#allocation13 + $0xb0] sm:$0xff] }
 0x864   : > { %v7126_v26 = vpop.eup %7125 }
 0x865   : > { %v7128_v27 = vpop.eup %7127  ;;  %v2331_v31 = vadd.f32 1.0, %v7126_v26  ;;  %v2412_v26 = vld [vmem:[#allocation13 + $0xb8] sm:$0xff] }
 0x866   : > { %v2330_v33 = vadd.f32 1.0, %v7128_v27 }
 0x867   : > { %7137 = vrcp.f32 %v2331_v31 }
 0x868   : > { %v7130_v35 = vpop.eup %7129  ;;  %7139 = vrcp.f32 %v2330_v33 }
 0x869   : > { %v7132_v29 = vpop.eup %7131  ;;  %7141 = vtanh.f32 %v2291_v28  ;;  %v2333_v37 = vadd.f32 1.0, %v7130_v35 }
 0x86a   : > { %7143 = vtanh.f32 %v2286_v32  ;;  %v2332_v30 = vadd.f32 1.0, %v7132_v29  ;;  %v7134_v40 = vpop.eup %7133  ;;  %v2686_v29 = vld [vmem:[#allocation8 + $0xa0] sm:$0xff] }
 0x86b   : > { %7145 = vrcp.f32 %v2333_v37  ;;  %v7136_v41 = vpop.eup %7135  ;;  %v2474_v37 = vpop.permute.xlu1 %2473  ;;  %6329 = vmatprep.mubr.msk.f32.mxu1 %vm1132_vm0, %v2686_v29  ;;  %v3209_v29 = vld [vmem:[#allocation14 + $0x108] sm:$0xff] }
 0x86c   : > { %7147 = vrcp.f32 %v2332_v30  ;;  %v2469_v30 = vpop.permute.xlu0 %2468 }
 0x871   : > { %v7138_v42 = vpop.eup %7137 }
 0x872   : > { %v7140_v43 = vpop.eup %7139  ;;  %v2339_v44 = vmul.f32 %v7138_v42, %v7134_v40 }
 0x873   : > { %v7142_v45 = vpop.eup %7141  ;;  %v2338_v47 = vmul.f32 %v7140_v43, %v7136_v41  ;;  %v2484_v43 = vpop.permute.xlu1 %2483 }
 0x874   : > { %v7144_v48 = vpop.eup %7143  ;;  %v2368_v50 = vmul.f32 %v2355_v16, %v2339_v44 }
 0x875   : > { %v7146_v51 = vpop.eup %7145  ;;  %v2367_v52 = vmul.f32 %v2350_v36, %v2338_v47 }
 0x876   : > { %v7148_v53 = vpop.eup %7147  ;;  %v2397_v54 = vadd.f32 %v2384_v38, %v2368_v50  ;;  %v2341_v55 = vmul.f32 %v7146_v51, %v7142_v45 }
 0x877   : > { %v2396_v56 = vadd.f32 %v2379_v39, %v2367_v52  ;;  %v2340_v57 = vmul.f32 %v7148_v53, %v7144_v48 }
 0x878   : > { %v2370_v58 = vmul.f32 %v2365_v46, %v2341_v55  ;;  %v2479_v46 = vpop.permute.xlu0 %2478  ;;  %v2887_v55 = vld [vmem:[#allocation10 + $0x50] sm:$0xff] }
 0x879   : > { %v6658_v61 = vpack.c.bf16 %v2397_v54, %v2396_v56  ;;  %v2369_v62 = vmul.f32 %v2360_v49, %v2340_v57  ;;  %v2688_v56 = vld [vmem:[#allocation8 + $0xb0] sm:$0xff]  ;;  %v2888_v57 = vld [vmem:[#allocation10 + $0x58] sm:$0xff] }
 0x87a   : > { %v2399_v1 = vadd.f32 %v2394_v59, %v2370_v58  ;;  %v5787_v58 = vld [vmem:[%s9421_s9 + $0xa0] sm:$0xff] }
 0x87b   : > { %6659 = vmatprep.subr.bf16.mxu0 %v6658_v61  ;;  %v2398_v2 = vadd.f32 %v2389_v63, %v2369_v62  ;;  %v2689_v59 = vld [vmem:[#allocation8 + $0xb8] sm:$0xff]  ;;  %v5788_v62 = vld [vmem:[%s9421_s9 + $0xa8] sm:$0xff]  ;;  %v5789_v63 = vld [vmem:[%s9421_s9 + $0xb0] sm:$0xff] }
 0x87c   : > { %6661 = vmatpush3.bf16.msra.mxu0 %v6658_v61  ;;  %v2681_v61 = vld [vmem:[#allocation8 + $0x80] sm:$0xff] }
 0x87d   : > { %v6662_v4 = vpack.c.bf16 %v2399_v1, %v2398_v2  ;;  %v5790_v1 = vld [vmem:[%s9421_s9 + $0xb8] sm:$0xff]  ;;  %v5783_v2 = vld [vmem:[%s9421_s9 + $0x80] sm:$0xff] }
 0x87f   : > { %6663 = vmatprep.subr.bf16.mxu0 %v6662_v4 }
 0x880   : > { %6665 = vmatpush3.bf16.msra.mxu0 %v6662_v4  ;;  %v5784_v4 = vld [vmem:[%s9421_s9 + $0x88] sm:$0xff] }
 0x883   : > { %6304 = vmatmul.mubr.msk.f32.vlgmr.msra.gmra.mrb[16].mxu0 %vm1132_vm0, %v2402_v13  ;;  %v5785_v13 = vld [vmem:[%s9421_s9 + $0x90] sm:$0xff] }
 0x884   : > { %6306 = vmatprep.mubr.msk.f32.mxu0 %vm1132_vm0, %v2403_v14  ;;  %v5786_v14 = vld [vmem:[%s9421_s9 + $0x98] sm:$0xff] }
 0x887   : > { %6307 = vmatmul.mubr.msk.f32.gmra.mrb[18].mxu0 %vm1132_vm0, %v2404_v15  ;;  %v5799_v15 = vld [vmem:[%s9423_s27 + $0x40] sm:$0xff] }
 0x888   : > { %6309 = vmatprep.mubr.msk.f32.mxu0 %vm1132_vm0, %v2405_v18  ;;  %v5800_v18 = vld [vmem:[%s9423_s27 + $0x48] sm:$0xff] }
 0x88b   : > { %6310 = vmatmul.mubr.msk.f32.gmra.mrb[20].mxu0 %vm1132_vm0, %v2406_v60  ;;  %v5803_v60 = vld [vmem:[%s9424_s7 + $0x40] sm:$0xff] }
 0x88c   : > { %6312 = vmatprep.mubr.msk.f32.mxu0 %vm1132_vm0, %v2407_v19  ;;  %v5804_v19 = vld [vmem:[%s9424_s7 + $0x48] sm:$0xff] }
 0x88f   : > { %6313 = vmatmul.mubr.msk.f32.gmra.mrb[22].mxu0 %vm1132_vm0, %v2408_v20  ;;  %v5801_v20 = vld [vmem:[%s9423_s27 + $0x50] sm:$0xff] }
 0x890   : > { %6315 = vmatprep.mubr.msk.f32.mxu0 %vm1132_vm0, %v2409_v21  ;;  %v5802_v21 = vld [vmem:[%s9423_s27 + $0x58] sm:$0xff] }
 0x893   : > { %6316 = vmatmul.mubr.msk.f32.gmra.mrb[24].mxu0 %vm1132_vm0, %v2410_v23  ;;  %v5805_v23 = vld [vmem:[%s9424_s7 + $0x50] sm:$0xff] }
 0x894   : > { %6318 = vmatprep.mubr.msk.f32.mxu0 %vm1132_vm0, %v2411_v25  ;;  %v5806_v25 = vld [vmem:[%s9424_s7 + $0x58] sm:$0xff] }
 0x897   : > { %6319 = vmatmul.mubr.msk.f32.gmra.mrb[26].mxu0 %vm1132_vm0, %v2412_v26  ;;  %v3208_v26 = vld [vmem:[#allocation14 + $0x100] sm:$0xff] }
 0x956   : > { %v8738_v27 = vpop.f32.mrb[16].mxu0 }
 0x957   : > { %v8740_v28 = vpop.f32.mrb[17].mxu0 }
 0x95a   : > { %v8742_v31 = vpop.f32.mrb[18].mxu0 }
 0x95b   : > { %v8744_v32 = vpop.f32.mrb[19].mxu0 }
 0x95e   : > { %v8746_v33 = vpop.f32.mrb[20].mxu0 }
 0x95f   : > { %v8748_v16 = vpop.f32.mrb[21].mxu0 }
 0x962   : > { %v8750_v35 = vpop.f32.mrb[22].mxu0 }
 0x963   : > { %v8752_v36 = vpop.f32.mrb[23].mxu0 }
 0x966   : > { %v6317_v38 = vpop.f32.mrb[24].mxu0 }
 0x967   : > { %v2634_v39 = vadd.f32 %v6317_v38, %v2474_v37  ;;  %v2628_v40 = vpop.f32.mrb[25].mxu0  ;;  %v3210_v37 = vld [vmem:[#allocation14 + $0x110] sm:$0xff] }
 0x968   : > { %v2629_v41 = vadd.f32 %v2628_v40, %v2469_v30  ;;  %v3211_v30 = vld [vmem:[#allocation14 + $0x118] sm:$0xff] }
 0x969   : > { %v8756_v42 = vadd.f32 %v2634_v39, %v8629_v22 }
 0x96a   : > { %v8759_v44 = vadd.f32 %v2629_v41, %v8632_v24  ;;  %v6320_v45 = vpop.f32.mrb[26].mxu0  ;;  %v2885_v24 = vld [vmem:[#allocation10 + $0x40] sm:$0xff] }
 0x96b   : > { %v2644_v47 = vadd.f32 %v6320_v45, %v2484_v43  ;;  %v2638_v48 = vpop.f32.mrb[27].mxu0 }
 0x96c   : > { %v2639_v49 = vadd.f32 %v2638_v48, %v2479_v46  ;;  %v7081_v50 = vpack.i.bf16 %v8756_v42, %v8759_v44  ;;  %v6666_v51 = vpack.c.bf16 %v8756_v42, %v8759_v44  ;;  %v2682_v48 = vld [vmem:[#allocation8 + $0x88] sm:$0xff] }
 0x96d   : > { %v8766_v52 = vadd.f32 %v2644_v47, %v8639_v34  ;;  %v2886_v34 = vld [vmem:[#allocation10 + $0x48] sm:$0xff] }
 0x96e   : > { %v8769_v22 = vadd.f32 %v2639_v49, %v8642_v17  ;;  %7082 = vrot.lane.b32.xlu0 %v7081_v50, %s9429_s16  ;;  %6667 = vmatprep.subr.bf16.mxu1 %v6666_v51  ;;  %v2687_v17 = vld [vmem:[#allocation8 + $0xa8] sm:$0xff]  ;;  %v2683_v49 = vld [vmem:[#allocation8 + $0x90] sm:$0xff]  ;;  %v2684_v50 = vld [vmem:[#allocation8 + $0x98] sm:$0xff] }
 0x96f   : > { %6669 = vmatpush3.bf16.msra.mxu1 %v6666_v51  ;;  %v2914_v51 = vld [vmem:[#allocation11 + $0x80] sm:$0xff] }
 0x970   : > { %v7086_v53 = vpack.i.bf16 %v8766_v52, %v8769_v22  ;;  %v6670_v54 = vpack.c.bf16 %v8766_v52, %v8769_v22  ;;  %6357 = vmatprep.mubr.msk.f32.mxu0 %vm1132_vm0, %v2914_v51 }
 0x972   : > { %7087 = vrot.lane.b32.xlu1 %v7086_v53, %s9429_s16  ;;  %2891 = vperm.xlu0 %7059, %v2885_v24   ;;  %s9012_s16 = scalar_lea.vmem [#allocation32], %s5668_s10 }
 0x973   : > { %6671 = vmatprep.subr.bf16.mxu1 %v6670_v54 }
 0x974   : > { %6673 = vmatpush3.bf16.msra.mxu1 %v6670_v54 }
 0x976   : > { %2896 = vperm.xlu1 %7060, %v2886_v34   ;;  %2901 = vperm.xlu0 %7059, %v2887_v55  }
 0x977   : > { %6330 = vmatmul.mubr.msk.f32.vlgmr.msra.gmra.mrb[24].mxu1 %vm1132_vm0, %v2687_v17 }
 0x978   : > { %6332 = vmatprep.mubr.msk.f32.mxu1 %vm1132_vm0, %v2688_v56 }
 0x97a   : > { %2906 = vperm.xlu1 %7060, %v2888_v57   ;;  %2953 = vperm.xlu0 %7059, %v5787_v58  }
 0x97b   : > { %6333 = vmatmul.mubr.msk.f32.gmra.mrb[26].mxu1 %vm1132_vm0, %v2689_v59 }
 0x97c   : > { %6343 = vmatprep.mubr.msk.f32.mxu1 %vm1132_vm0, %v2681_v61 }
 0x97e   : > { %2958 = vperm.xlu1 %7060, %v5788_v62   ;;  %2963 = vperm.xlu0 %7059, %v5789_v63  }
 0x982   : > { %2968 = vperm.xlu1 %7060, %v5790_v1   ;;  %2933 = vperm.xlu0 %7059, %v5783_v2   ;;  %v2915_v1 = vld [vmem:[#allocation11 + $0x88] sm:$0xff]  ;;  %v2916_v2 = vld [vmem:[#allocation11 + $0x90] sm:$0xff] }
 0x986   : > { %2938 = vperm.xlu1 %7060, %v5784_v4   ;;  %2943 = vperm.xlu0 %7059, %v5785_v13   ;;  %v2917_v4 = vld [vmem:[#allocation11 + $0x98] sm:$0xff]  ;;  %v2918_v13 = vld [vmem:[#allocation11 + $0xa0] sm:$0xff] }
 0x98a   : > { %2948 = vperm.xlu1 %7060, %v5786_v14   ;;  %3135 = vperm.xlu0 %7059, %v5799_v15   ;;  %v2919_v14 = vld [vmem:[#allocation11 + $0xa8] sm:$0xff]  ;;  %v2920_v15 = vld [vmem:[#allocation11 + $0xb0] sm:$0xff] }
 0x98e   : > { %3140 = vperm.xlu1 %7060, %v5800_v18   ;;  %3164 = vperm.xlu0 %7059, %v5803_v60   ;;  %v2921_v18 = vld [vmem:[#allocation11 + $0xb8] sm:$0xff]  ;;  %v3187_v60 = vld [vmem:[#allocation13 + $0xc0] sm:$0xff] }
 0x992   : > { %3169 = vperm.xlu1 %7060, %v5804_v19   ;;  %3145 = vperm.xlu0 %7059, %v5801_v20  }
 0x996   : > { %3150 = vperm.xlu1 %7060, %v5802_v21   ;;  %3174 = vperm.xlu0 %7059, %v5805_v23  }
 0x99a   : > { %3179 = vperm.xlu1 %7060, %v5806_v25   ;;  %3254 = vperm.xlu0 %7059, %v3208_v26  }
 0x99e   : > { %3259 = vperm.xlu1 %7060, %v3209_v29   ;;  %3264 = vperm.xlu0 %7059, %v3210_v37  }
 0x9a2   : > { %3269 = vperm.xlu1 %7060, %v3211_v30  }
 0x9e0   : > { %v7083_v38 = vpop.permute.xlu0 %7082 }
 0x9e1   : > { %v7085_v39 = vunpack.i.h.bf16 %v7083_v38  ;;  %v7084_v40 = vunpack.i.l.bf16 %v7083_v38 }
 0x9e3   : > { %v6674_v41 = vpack.c.bf16 %v7085_v39, %v7084_v40 }
 0x9e4   : > { %v7088_v43 = vpop.permute.xlu1 %7087 }
 0x9e5   : > { %v7090_v45 = vunpack.i.h.bf16 %v7088_v43  ;;  %v7089_v46 = vunpack.i.l.bf16 %v7088_v43  ;;  %6676 = vmatprep.subr.msk.bf16.mxu1 %vm8576_vm2, %v6674_v41 }
 0x9e6   : > { %6679 = vmatpush3.bf16.msk.msra.mxu1 %vm8576_vm2, %v6674_v41 }
 0x9e7   : > { %v6680_v47 = vpack.c.bf16 %v7090_v45, %v7089_v46 }
 0x9e9   : > { %6682 = vmatprep.subr.msk.bf16.mxu1 %vm8576_vm2, %v6680_v47 }
 0x9ea   : > { %6685 = vmatpush3.bf16.msk.msra.mxu1 %vm8576_vm2, %v6680_v47 }
 0x9ed   : > { %6344 = vmatmul.mubr.msk.f32.vlgmr.msra.gmra.mrb[24].mxu1 %vm1132_vm0, %v2682_v48 }
 0x9ee   : > { %6346 = vmatprep.mubr.msk.f32.mxu1 %vm1132_vm0, %v2683_v49 }
 0x9f1   : > { %6347 = vmatmul.mubr.msk.f32.gmra.mrb[26].mxu1 %vm1132_vm0, %v2684_v50  ;;  %v2892_v53 = vpop.permute.xlu0 %2891 }
 0x9f2   : > { %6377 = vmatprep.mubr.msk.f32.mxu1 %vm1132_vm0, %v3187_v60 }
 0x9f5   : > { %v2897_v24 = vpop.permute.xlu1 %2896  ;;  %v2902_v58 = vpop.permute.xlu0 %2901 }
 0x9f9   : > { %v2907_v0 = vpop.permute.xlu1 %2906  ;;  %v2954_v25 = vpop.permute.xlu0 %2953 }
 0x9fd   : > { %v2959_v21 = vpop.permute.xlu1 %2958  ;;  %v2964_v40 = vpop.permute.xlu0 %2963 }
 0xa01   : > { %v2969_v38 = vpop.permute.xlu1 %2968 }
 0xac0   : > { %v6345_v54 = vpop.f32.mrb[24].mxu1 }
 0xac1   : > { %v2910_v34 = vadd.f32 %v6345_v54, %v2897_v24  ;;  %v2865_v55 = vpop.f32.mrb[25].mxu1  ;;  %v2939_v24 = vpop.permute.xlu1 %2938 }
 0xac2   : > { %v2909_v17 = vadd.f32 %v2892_v53, %v2865_v55  ;;  %v2934_v54 = vpop.permute.xlu0 %2933 }
 0xac4   : > { %v6686_v56 = vpack.c.bf16 %v2910_v34, %v2909_v17  ;;  %v6348_v57 = vpop.f32.mrb[26].mxu1 }
 0xac5   : > { %v2912_v59 = vadd.f32 %v6348_v57, %v2907_v0  ;;  %v2875_v61 = vpop.f32.mrb[27].mxu1  ;;  %v2949_v17 = vpop.permute.xlu1 %2948 }
 0xac6   : > { %v2911_v62 = vadd.f32 %v2902_v58, %v2875_v61  ;;  %6687 = vmatprep.subr.bf16.mxu0 %v6686_v56 }
 0xac7   : > { %6689 = vmatpush3.bf16.msra.mxu0 %v6686_v56  ;;  %v2944_v56 = vpop.permute.xlu0 %2943 }
 0xac8   : > { %v6690_v63 = vpack.c.bf16 %v2912_v59, %v2911_v62 }
 0xaca   : > { %6691 = vmatprep.subr.bf16.mxu0 %v6690_v63 }
 0xacb   : > { %6693 = vmatpush3.bf16.msra.mxu0 %v6690_v63 }
 0xace   : > { %6358 = vmatmul.mubr.msk.f32.vlgmr.msra.gmra.mrb[28].mxu0 %vm1132_vm0, %v2915_v1 }
 0xacf   : > { %6360 = vmatprep.mubr.msk.f32.mxu0 %vm1132_vm0, %v2916_v2  ;;  %v3141_v2 = vpop.permute.xlu1 %3140 }
 0xad2   : > { %6361 = vmatmul.mubr.msk.f32.gmra.mrb[30].mxu0 %vm1132_vm0, %v2917_v4 }
 0xad3   : > { %6363 = vmatprep.mubr.msk.f32.mxu0 %vm1132_vm0, %v2918_v13  ;;  %v3136_v13 = vpop.permute.xlu0 %3135  ;;  %v3170_v60 = vpop.permute.xlu1 %3169 }
 0xad6   : > { %6364 = vmatmul.mubr.msk.f32.gmra.mrb[32].mxu0 %vm1132_vm0, %v2919_v14 }
 0xad7   : > { %6366 = vmatprep.mubr.msk.f32.mxu0 %vm1132_vm0, %v2920_v15 }
 0xada   : > { %6367 = vmatmul.mubr.msk.f32.gmra.mrb[34].mxu0 %vm1132_vm0, %v2921_v18 }
 0xba1   : > { %v6359_v19 = vpop.f32.mrb[28].mxu0 }
 0xba2   : > { %v3061_v20 = vpop.f32.mrb[29].mxu0  ;;  %v3067_v0 = vadd.f32 %v6359_v19, %v2939_v24  ;;  %v3165_v19 = vpop.permute.xlu0 %3164 }
 0xba3   : > { %v3062_v57 = vadd.f32 %v3061_v20, %v2934_v54 }
 0xba5   : > { %v6362_v23 = vpop.f32.mrb[30].mxu0 }
 0xba6   : > { %v3071_v26 = vpop.f32.mrb[31].mxu0  ;;  %v3077_v61 = vadd.f32 %v6362_v23, %v2949_v17 }
 0xba7   : > { %v3072_v63 = vadd.f32 %v3071_v26, %v2944_v56  ;;  %v3189_v56 = vld [vmem:[#allocation13 + $0xd0] sm:$0xff] }
 0xba9   : > { %v6365_v29 = vpop.f32.mrb[32].mxu0 }
 0xbaa   : > { %v3087_v37 = vadd.f32 %v6365_v29, %v2959_v21  ;;  %v3081_v30 = vpop.f32.mrb[33].mxu0 }
 0xbab   : > { %v3082_v39 = vadd.f32 %v3081_v30, %v2954_v25 }
 0xbac   : > { %v3105_v41 = vsub.f32 0.0, %v3087_v37  ;;  %v3151_v37 = vpop.permute.xlu1 %3150 }
 0xbad   : > { %v3104_v43 = vsub.f32 0.0, %v3082_v39  ;;  %v6368_v45 = vpop.f32.mrb[34].mxu0  ;;  %v3146_v39 = vpop.permute.xlu0 %3145 }
 0xbae   : > { %v3110_v46 = vmul.f32 1.442695, %v3105_v41  ;;  %v3097_v47 = vadd.f32 %v6368_v45, %v2969_v38  ;;  %v3091_v48 = vpop.f32.mrb[35].mxu0 }
 0xbaf   : > { %v3108_v49 = vmul.f32 1.442695, %v3104_v43  ;;  %v3092_v50 = vadd.f32 %v3091_v48, %v2964_v40 }
 0xbb0   : > { %7149 = vpow2.f32 %v3110_v46  ;;  %v3107_v51 = vsub.f32 0.0, %v3097_v47 }
 0xbb1   : > { %7151 = vpow2.f32 %v3108_v49  ;;  %v3106_v53 = vsub.f32 0.0, %v3092_v50  ;;  %v3175_v54 = vpop.permute.xlu0 %3174 }
 0xbb2   : > { %v3114_v34 = vmul.f32 1.442695, %v3107_v51  ;;  %v3180_v51 = vpop.permute.xlu1 %3179 }
 0xbb3   : > { %v3112_v55 = vmul.f32 1.442695, %v3106_v53 }
 0xbb4   : > { %7153 = vpow2.f32 %v3114_v34 }
 0xbb5   : > { %7155 = vpow2.f32 %v3112_v55 }
 0xbb6   : > { %7157 = vtanh.f32 %v3067_v0  ;;  %v3188_v0 = vld [vmem:[#allocation13 + $0xc8] sm:$0xff] }
 0xbb7   : > { %7159 = vtanh.f32 %v3062_v57  ;;  %v3190_v57 = vld [vmem:[#allocation13 + $0xd8] sm:$0xff] }
 0xbba   : > { %v7150_v58 = vpop.eup %7149 }
 0xbbb   : > { %v7152_v59 = vpop.eup %7151  ;;  %v3117_v62 = vadd.f32 1.0, %v7150_v58  ;;  %v3191_v58 = vld [vmem:[#allocation13 + $0xe0] sm:$0xff] }
 0xbbc   : > { %v3116_v1 = vadd.f32 1.0, %v7152_v59  ;;  %v3192_v59 = vld [vmem:[#allocation13 + $0xe8] sm:$0xff] }
 0xbbd   : > { %7161 = vrcp.f32 %v3117_v62  ;;  %v3194_v62 = vld [vmem:[#allocation13 + $0xf8] sm:$0xff] }
 0xbbe   : > { %v7154_v4 = vpop.eup %7153  ;;  %7163 = vrcp.f32 %v3116_v1  ;;  %v3196_v1 = vld [vmem:[#allocation13 + $0x108] sm:$0xff] }
 0xbbf   : > { %v7156_v14 = vpop.eup %7155  ;;  %7165 = vtanh.f32 %v3077_v61  ;;  %v3119_v15 = vadd.f32 1.0, %v7154_v4  ;;  %v3193_v61 = vld [vmem:[#allocation13 + $0xf0] sm:$0xff]  ;;  %v3198_v4 = vld [vmem:[#allocation13 + $0x118] sm:$0xff] }
 0xbc0   : > { %7167 = vtanh.f32 %v3072_v63  ;;  %v3118_v18 = vadd.f32 1.0, %v7156_v14  ;;  %v7158_v20 = vpop.eup %7157  ;;  %v3195_v63 = vld [vmem:[#allocation13 + $0x100] sm:$0xff] }
 0xbc1   : > { %7169 = vrcp.f32 %v3119_v15  ;;  %v7160_v21 = vpop.eup %7159 }
 0xbc2   : > { %7171 = vrcp.f32 %v3118_v18 }
 0xbc7   : > { %v7162_v23 = vpop.eup %7161 }
 0xbc8   : > { %v7164_v25 = vpop.eup %7163  ;;  %v3125_v26 = vmul.f32 %v7162_v23, %v7158_v20  ;;  %v3472_v23 = vld [vmem:[#allocation8 + $0xe0] sm:$0xff] }
 0xbc9   : > { %v7166_v29 = vpop.eup %7165  ;;  %v3124_v30 = vmul.f32 %v7164_v25, %v7160_v21  ;;  %v3260_v25 = vpop.permute.xlu1 %3259  ;;  %6403 = vmatprep.mubr.msk.f32.mxu0 %vm1132_vm0, %v3472_v23  ;;  %v5863_v23 = vld [vmem:[%s9424_s7 + $0x60] sm:$0xff] }
 0xbca   : > { %v7168_v38 = vpop.eup %7167  ;;  %v3154_v40 = vmul.f32 %v3141_v2, %v3125_v26  ;;  %v3197_v2 = vld [vmem:[#allocation13 + $0x110] sm:$0xff]  ;;  %v3255_v26 = vpop.permute.xlu0 %3254 }
 0xbcb   : > { %v7170_v41 = vpop.eup %7169  ;;  %v3153_v43 = vmul.f32 %v3136_v13, %v3124_v30 }
 0xbcc   : > { %v7172_v45 = vpop.eup %7171  ;;  %v3183_v46 = vadd.f32 %v3170_v60, %v3154_v40  ;;  %v3127_v47 = vmul.f32 %v7170_v41, %v7166_v29 }
 0xbcd   : > { %v3182_v48 = vadd.f32 %v3165_v19, %v3153_v43  ;;  %v3126_v49 = vmul.f32 %v7172_v45, %v7168_v38  ;;  %v3270_v40 = vpop.permute.xlu1 %3269 }
 0xbce   : > { %v3156_v50 = vmul.f32 %v3151_v37, %v3127_v47  ;;  %v3265_v45 = vpop.permute.xlu0 %3264 }
 0xbcf   : > { %v6694_v24 = vpack.c.bf16 %v3183_v46, %v3182_v48  ;;  %v3155_v53 = vmul.f32 %v3146_v39, %v3126_v49 }
 0xbd0   : > { %v3185_v34 = vadd.f32 %v3180_v51, %v3156_v50 }
 0xbd1   : > { %6695 = vmatprep.subr.bf16.mxu1 %v6694_v24  ;;  %v3184_v55 = vadd.f32 %v3175_v54, %v3155_v53  ;;  %v3671_v53 = vld [vmem:[#allocation10 + $0x60] sm:$0xff] }
 0xbd2   : > { %6697 = vmatpush3.bf16.msra.mxu1 %v6694_v24 }
 0xbd3   : > { %v6698_v17 = vpack.c.bf16 %v3185_v34, %v3184_v55  ;;  %v3673_v34 = vld [vmem:[#allocation10 + $0x70] sm:$0xff]  ;;  %v3473_v55 = vld [vmem:[#allocation8 + $0xe8] sm:$0xff] }
 0xbd5   : > { %6699 = vmatprep.subr.bf16.mxu1 %v6698_v17 }
 0xbd6   : > { %6701 = vmatpush3.bf16.msra.mxu1 %v6698_v17  ;;  %v3474_v17 = vld [vmem:[#allocation8 + $0xf0] sm:$0xff] }
 0xbd9   : > { %6378 = vmatmul.mubr.msk.f32.vlgmr.msra.gmra.mrb[28].mxu1 %vm1132_vm0, %v3188_v0  ;;  %v3475_v0 = vld [vmem:[#allocation8 + $0xf8] sm:$0xff] }
 0xbda   : > { %6380 = vmatprep.mubr.msk.f32.mxu1 %vm1132_vm0, %v3189_v56  ;;  %v3467_v56 = vld [vmem:[#allocation8 + $0xc0] sm:$0xff] }
 0xbdd   : > { %6381 = vmatmul.mubr.msk.f32.gmra.mrb[30].mxu1 %vm1132_vm0, %v3190_v57  ;;  %v5848_v57 = vld [vmem:[%s9421_s9 + $0xe8] sm:$0xff] }
 0xbde   : > { %6383 = vmatprep.mubr.msk.f32.mxu1 %vm1132_vm0, %v3191_v58  ;;  %v5849_v58 = vld [vmem:[%s9421_s9 + $0xf0] sm:$0xff] }
 0xbe1   : > { %6384 = vmatmul.mubr.msk.f32.gmra.mrb[32].mxu1 %vm1132_vm0, %v3192_v59  ;;  %v5850_v59 = vld [vmem:[%s9421_s9 + $0xf8] sm:$0xff] }
 0xbe2   : > { %6386 = vmatprep.mubr.msk.f32.mxu1 %vm1132_vm0, %v3193_v61  ;;  %v5843_v61 = vld [vmem:[%s9421_s9 + $0xc0] sm:$0xff] }
 0xbe5   : > { %6387 = vmatmul.mubr.msk.f32.gmra.mrb[34].mxu1 %vm1132_vm0, %v3194_v62  ;;  %v5844_v62 = vld [vmem:[%s9421_s9 + $0xc8] sm:$0xff] }
 0xbe6   : > { %6389 = vmatprep.mubr.msk.f32.mxu1 %vm1132_vm0, %v3195_v63  ;;  %v5845_v63 = vld [vmem:[%s9421_s9 + $0xd0] sm:$0xff] }
 0xbe9   : > { %6390 = vmatmul.mubr.msk.f32.gmra.mrb[36].mxu1 %vm1132_vm0, %v3196_v1  ;;  %v5846_v1 = vld [vmem:[%s9421_s9 + $0xd8] sm:$0xff] }
 0xbea   : > { %6392 = vmatprep.mubr.msk.f32.mxu1 %vm1132_vm0, %v3197_v2  ;;  %v5859_v2 = vld [vmem:[%s9423_s27 + $0x60] sm:$0xff] }
 0xbed   : > { %6393 = vmatmul.mubr.msk.f32.gmra.mrb[38].mxu1 %vm1132_vm0, %v3198_v4  ;;  %v5860_v4 = vld [vmem:[%s9423_s27 + $0x68] sm:$0xff] }
 0xcac   : > { %v8860_v13 = vpop.f32.mrb[28].mxu1 }
 0xcad   : > { %v8862_v14 = vpop.f32.mrb[29].mxu1 }
 0xcb0   : > { %v8864_v15 = vpop.f32.mrb[30].mxu1 }
 0xcb1   : > { %v8866_v18 = vpop.f32.mrb[31].mxu1 }
 0xcb4   : > { %v8868_v60 = vpop.f32.mrb[32].mxu1 }
 0xcb5   : > { %v8870_v19 = vpop.f32.mrb[33].mxu1 }
 0xcb8   : > { %v8872_v20 = vpop.f32.mrb[34].mxu1 }
 0xcb9   : > { %v8874_v21 = vpop.f32.mrb[35].mxu1 }
 0xcbc   : > { %v6391_v29 = vpop.f32.mrb[36].mxu1 }
 0xcbd   : > { %v3420_v37 = vadd.f32 %v6391_v29, %v3260_v25  ;;  %v3414_v30 = vpop.f32.mrb[37].mxu1  ;;  %v5864_v25 = vld [vmem:[%s9424_s7 + $0x68] sm:$0xff]  ;;  %v5862_v29 = vld [vmem:[%s9423_s27 + $0x78] sm:$0xff] }
 0xcbe   : > { %v3415_v38 = vadd.f32 %v3414_v30, %v3255_v26  ;;  %v5861_v26 = vld [vmem:[%s9423_s27 + $0x70] sm:$0xff]  ;;  %v5866_v30 = vld [vmem:[%s9424_s7 + $0x78] sm:$0xff] }
 0xcbf   : > { %v3434_v39 = vadd.f32 %v3420_v37, %v8756_v42  ;;  %v5865_v37 = vld [vmem:[%s9424_s7 + $0x70] sm:$0xff] }
 0xcc0   : > { %v3433_v41 = vadd.f32 %v3415_v38, %v8759_v44  ;;  %v6394_v43 = vpop.f32.mrb[38].mxu1  ;;  %v3672_v44 = vld [vmem:[#allocation10 + $0x68] sm:$0xff]  ;;  %v1636_v38 = vld [vmem:[#allocation14] sm:$0xff] }
 0xcc1   : > { %v3430_v46 = vadd.f32 %v6394_v43, %v3270_v40  ;;  %v3424_v47 = vpop.f32.mrb[39].mxu1  ;;  %v2414_v40 = vld [vmem:[#allocation14 + $0x60] sm:$0xff] }
 0xcc2   : > { %v3425_v48 = vadd.f32 %v3424_v47, %v3265_v45  ;;  %v7091_v49 = vpack.i.bf16 %v3434_v39, %v3433_v41  ;;  %v6702_v50 = vpack.c.bf16 %v3434_v39, %v3433_v41  ;;  %v1637_v39 = vld [vmem:[#allocation14 + $0x8] sm:$0xff]  ;;  %v3200_v43 = vld [vmem:[#allocation14 + $0xc0] sm:$0xff]  ;;  %v1639_v47 = vld [vmem:[#allocation14 + $0x18] sm:$0xff] }
 0xcc3   : > { %v3436_v51 = vadd.f32 %v3430_v46, %v8766_v52  ;;  %v3674_v52 = vld [vmem:[#allocation10 + $0x78] sm:$0xff]  ;;  %v2415_v41 = vld [vmem:[#allocation14 + $0x68] sm:$0xff]  ;;  %v1638_v46 = vld [vmem:[#allocation14 + $0x10] sm:$0xff] }
 0xcc4   : > { %v3435_v24 = vadd.f32 %v3425_v48, %v8769_v22  ;;  %7092 = vrot.lane.b32.xlu0 %v7091_v49, %s7825_s30  ;;  %6703 = vmatprep.subr.bf16.mxu0 %v6702_v50  ;;  %v5847_v22 = vld [vmem:[%s9421_s9 + $0xe0] sm:$0xff]  ;;  %v3201_v45 = vld [vmem:[#allocation14 + $0xc8] sm:$0xff]  ;;  %v2416_v48 = vld [vmem:[#allocation14 + $0x70] sm:$0xff] }
 0xcc5   : > { %6705 = vmatpush3.bf16.msra.mxu0 %v6702_v50  ;;  %v2417_v49 = vld [vmem:[#allocation14 + $0x78] sm:$0xff]  ;;  %v3986_v50 = vld [vmem:[#allocation14 + $0x120] sm:$0xff] }
 0xcc6   : > { %v7096_v42 = vpack.i.bf16 %v3436_v51, %v3435_v24  ;;  %v6706_v54 = vpack.c.bf16 %v3436_v51, %v3435_v24  ;;  %v3987_v51 = vld [vmem:[#allocation14 + $0x128] sm:$0xff]  ;;  %v3202_v24 = vld [vmem:[#allocation14 + $0xd0] sm:$0xff] }
 0xcc8   : > { %7097 = vrot.lane.b32.xlu1 %v7096_v42, %s7825_s30  ;;  %3677 = vperm.xlu0 %7059, %v3671_v53   ;;  %v3203_v53 = vld [vmem:[#allocation14 + $0xd8] sm:$0xff]  ;;  %v1640_v42 = vld [vmem:[#allocation14 + $0x20] sm:$0xff]  ;;  %s5918_s30 = sld [smem:[#allocation31 + $0x2]] }
 0xcc9   : > { %6707 = vmatprep.subr.bf16.mxu0 %v6706_v54 }
 0xcca   : > { %6709 = vmatpush3.bf16.msra.mxu0 %v6706_v54  ;;  %v1641_v54 = vld [vmem:[#allocation14 + $0x28] sm:$0xff] }
 0xccc   : > { %3682 = vperm.xlu1 %7060, %v3672_v44   ;;  %3687 = vperm.xlu0 %7059, %v3673_v34   ;;  %v2418_v44 = vld [vmem:[#allocation14 + $0x80] sm:$0xff]  ;;  %v2419_v34 = vld [vmem:[#allocation14 + $0x88] sm:$0xff] }
 0xccd   : > { %6404 = vmatmul.mubr.msk.f32.vlgmr.msra.gmra.mrb[36].mxu0 %vm1132_vm0, %v3473_v55  ;;  %v3988_v55 = vld [vmem:[#allocation14 + $0x130] sm:$0xff] }
 0xcce   : > { %6406 = vmatprep.mubr.msk.f32.mxu0 %vm1132_vm0, %v3474_v17  ;;  %v3989_v17 = vld [vmem:[#allocation14 + $0x138] sm:$0xff] }
 0xcd0   : > { %3692 = vperm.xlu1 %7060, %v3674_v52   ;;  %3739 = vperm.xlu0 %7059, %v5847_v22   ;;  %v3204_v52 = vld [vmem:[#allocation14 + $0xe0] sm:$0xff]  ;;  %v3205_v22 = vld [vmem:[#allocation14 + $0xe8] sm:$0xff] }
 0xcd1   : > { %6407 = vmatmul.mubr.msk.f32.gmra.mrb[38].mxu0 %vm1132_vm0, %v3475_v0  ;;  %v1642_v0 = vld [vmem:[#allocation14 + $0x30] sm:$0xff] }
 0xcd2   : > { %6417 = vmatprep.mubr.msk.f32.mxu0 %vm1132_vm0, %v3467_v56  ;;  %v1643_v56 = vld [vmem:[#allocation14 + $0x38] sm:$0xff] }
 0xcd4   : > { %3744 = vperm.xlu1 %7060, %v5848_v57   ;;  %3749 = vperm.xlu0 %7059, %v5849_v58   ;;  %v2420_v57 = vld [vmem:[#allocation14 + $0x90] sm:$0xff]  ;;  %v2421_v58 = vld [vmem:[#allocation14 + $0x98] sm:$0xff] }
 0xcd8   : > { %3754 = vperm.xlu1 %7060, %v5850_v59   ;;  %3719 = vperm.xlu0 %7059, %v5843_v61   ;;  %v3990_v59 = vld [vmem:[#allocation14 + $0x140] sm:$0xff]  ;;  %v3991_v61 = vld [vmem:[#allocation14 + $0x148] sm:$0xff] }
 0xcdc   : > { %3724 = vperm.xlu1 %7060, %v5844_v62   ;;  %3729 = vperm.xlu0 %7059, %v5845_v63   ;;  %v3206_v62 = vld [vmem:[#allocation14 + $0xf0] sm:$0xff]  ;;  %v3207_v63 = vld [vmem:[#allocation14 + $0xf8] sm:$0xff] }
 0xce0   : > { %3734 = vperm.xlu1 %7060, %v5846_v1   ;;  %3921 = vperm.xlu0 %7059, %v5859_v2   ;;  %v3992_v1 = vld [vmem:[#allocation14 + $0x150] sm:$0xff]  ;;  %v3993_v2 = vld [vmem:[#allocation14 + $0x158] sm:$0xff] }
 0xce4   : > { %3926 = vperm.xlu1 %7060, %v5860_v4   ;;  %3950 = vperm.xlu0 %7059, %v5863_v23   ;;  %v4244_v4 = vld [vmem:[#allocation17] sm:$0xff]  ;;  %v4245_v23 = vld [vmem:[#allocation17 + $0x8] sm:$0xff] }
 0xce8   : > { %3955 = vperm.xlu1 %7060, %v5864_v25   ;;  %3931 = vperm.xlu0 %7059, %v5861_v26   ;;  %v4246_v25 = vld [vmem:[#allocation17 + $0x10] sm:$0xff]  ;;  %v4247_v26 = vld [vmem:[#allocation17 + $0x18] sm:$0xff] }
 0xcec   : > { %3936 = vperm.xlu1 %7060, %v5862_v29   ;;  %3960 = vperm.xlu0 %7059, %v5865_v37   ;;  %v4248_v29 = vld [vmem:[#allocation17 + $0x20] sm:$0xff] }
 0xcf0   : > { %3965 = vperm.xlu1 %7060, %v5866_v30   ;;  %1650 = vperm.xlu0 %7059, %v1636_v38  }
 0xcf4   : > { %1655 = vperm.xlu1 %7060, %v1637_v39   ;;  %2428 = vperm.xlu0 %7059, %v2414_v40   ;;  %v4249_v40 = vld [vmem:[#allocation17 + $0x28] sm:$0xff] }
 0xcf8   : > { %2433 = vperm.xlu1 %7060, %v2415_v41   ;;  %3214 = vperm.xlu0 %7059, %v3200_v43   ;;  %v4250_v41 = vld [vmem:[#allocation17 + $0x30] sm:$0xff] }
 0xcfc   : > { %3219 = vperm.xlu1 %7060, %v3201_v45   ;;  %1660 = vperm.xlu0 %7059, %v1638_v46  }
 0xd00   : > { %1665 = vperm.xlu1 %7060, %v1639_v47   ;;  %2438 = vperm.xlu0 %7059, %v2416_v48   ;;  %v4251_v48 = vld [vmem:[#allocation17 + $0x38] sm:$0xff] }
 0xd04   : > { %2443 = vperm.xlu1 %7060, %v2417_v49   ;;  %4000 = vperm.xlu0 %7059, %v3986_v50   ;;  %v4438_v49 = vld [vmem:[#allocation20] sm:$0xff]  ;;  %v3468_v50 = vld [vmem:[#allocation8 + $0xc8] sm:$0xff] }
 0xd08   : > { %4005 = vperm.xlu1 %7060, %v3987_v51   ;;  %3224 = vperm.xlu0 %7059, %v3202_v24   ;;  %v4439_v51 = vld [vmem:[#allocation20 + $0x8] sm:$0xff]  ;;  %v4440_v24 = vld [vmem:[#allocation20 + $0x10] sm:$0xff] }
 0xd0c   : > { %3229 = vperm.xlu1 %7060, %v3203_v53   ;;  %1670 = vperm.xlu0 %7059, %v1640_v42   ;;  %v3469_v53 = vld [vmem:[#allocation8 + $0xd0] sm:$0xff]  ;;  %v3470_v42 = vld [vmem:[#allocation8 + $0xd8] sm:$0xff] }
 0xd10   : > { %1675 = vperm.xlu1 %7060, %v1641_v54   ;;  %2448 = vperm.xlu0 %7059, %v2418_v44   ;;  %v4441_v54 = vld [vmem:[#allocation20 + $0x18] sm:$0xff]  ;;  %v4442_v44 = vld [vmem:[#allocation20 + $0x20] sm:$0xff] }
 0xd14   : > { %2453 = vperm.xlu1 %7060, %v2419_v34   ;;  %4010 = vperm.xlu0 %7059, %v3988_v55   ;;  %v4444_v55 = vld [vmem:[#allocation20 + $0x30] sm:$0xff] }
 0xd18   : > { %4015 = vperm.xlu1 %7060, %v3989_v17   ;;  %3234 = vperm.xlu0 %7059, %v3204_v52  }
 0xd1c   : > { %3239 = vperm.xlu1 %7060, %v3205_v22   ;;  %1680 = vperm.xlu0 %7059, %v1642_v0   ;;  %v4445_v22 = vld [vmem:[#allocation20 + $0x38] sm:$0xff] }
 0xd1d   : > { %v4631_v0 = vld [vmem:[%s9430_s29] sm:$0xff]  ;;  %s5924_s29 = sshll.u32 (%p9434_p5), %s9435_s24, 6 }
 0xd1e   : > { %s9225_s22 = scalar_lea.vmem (%p9434_p5), %s9436_s6, %s5924_s29 }
 0xd20   : > { %1685 = vperm.xlu1 %7060, %v1643_v56   ;;  %2458 = vperm.xlu0 %7059, %v2420_v57  }
 0xd24   : > { %2463 = vperm.xlu1 %7060, %v2421_v58   ;;  %4020 = vperm.xlu0 %7059, %v3990_v59   ;;  %v4632_v58 = vld [vmem:[%s9431_s1 + $0x8] sm:$0xff]  ;;  %v4633_v59 = vld [vmem:[%s9431_s1 + $0x10] sm:$0xff] }
 0xd28   : > { %4025 = vperm.xlu1 %7060, %v3991_v61   ;;  %3244 = vperm.xlu0 %7059, %v3206_v62  }
 0xd2c   : > { %3249 = vperm.xlu1 %7060, %v3207_v63   ;;  %4030 = vperm.xlu0 %7059, %v3992_v1   ;;  %v4634_v63 = vld [vmem:[%s9431_s1 + $0x18] sm:$0xff]  ;;  %v4635_v1 = vld [vmem:[%s9431_s1 + $0x20] sm:$0xff] }
 0xd30   : > { %4035 = vperm.xlu1 %7060, %v3993_v2   ;;  %4254 = vperm.xlu0 %7059, %v4244_v4  }
 0xd34   : > { %4259 = vperm.xlu1 %7060, %v4245_v23   ;;  %4264 = vperm.xlu0 %7059, %v4246_v25   ;;  %v4636_v23 = vld [vmem:[%s9431_s1 + $0x28] sm:$0xff]  ;;  %v4637_v25 = vld [vmem:[%s9431_s1 + $0x30] sm:$0xff] }
 0xd36   : > { %v7093_v37 = vpop.permute.xlu0 %7092 }
 0xd37   : > { %v7095_v30 = vunpack.i.h.bf16 %v7093_v37  ;;  %v7094_v38 = vunpack.i.l.bf16 %v7093_v37  ;;  %v4638_v37 = vld [vmem:[%s9431_s1 + $0x38] sm:$0xff] }
 0xd38   : > { %4269 = vperm.xlu1 %7060, %v4247_v26   ;;  %4274 = vperm.xlu0 %7059, %v4248_v29  }
 0xd39   : > { %v6710_v39 = vpack.c.bf16 %v7095_v30, %v7094_v38 }
 0xd3a   : > { %v7098_v43 = vpop.permute.xlu1 %7097 }
 0xd3b   : > { %v7100_v45 = vunpack.i.h.bf16 %v7098_v43  ;;  %v7099_v46 = vunpack.i.l.bf16 %v7098_v43  ;;  %6712 = vmatprep.subr.msk.bf16.mxu0 %vm8703_vm4, %v6710_v39 }
 0xd3c   : > { %4279 = vperm.xlu1 %7060, %v4249_v40   ;;  %4284 = vperm.xlu0 %7059, %v4250_v41  }
 0xd3d   : > { %v6716_v47 = vpack.c.bf16 %v7100_v45, %v7099_v46  ;;  %6715 = vmatpush3.bf16.msk.msra.mxu0 %vm8703_vm4, %v6710_v39 }
 0xd3f   : > { %6718 = vmatprep.subr.msk.bf16.mxu0 %vm8703_vm4, %v6716_v47 }
 0xd40   : > { %4289 = vperm.xlu1 %7060, %v4251_v48   ;;  %4448 = vperm.xlu0 %7059, %v4438_v49  }
 0xd41   : > { %6721 = vmatpush3.bf16.msk.msra.mxu0 %vm8703_vm4, %v6716_v47 }
 0xd44   : > { %6418 = vmatmul.mubr.msk.f32.vlgmr.msra.gmra.mrb[36].mxu0 %vm1132_vm0, %v3468_v50  ;;  %4453 = vperm.xlu1 %7060, %v4439_v51  }
 0xd45   : > { %4458 = vperm.xlu0 %7059, %v4440_v24   ;;  %6420 = vmatprep.mubr.msk.f32.mxu0 %vm1132_vm0, %v3469_v53 }
 0xd47   : > { %v8945_v34 = vpop.permute.xlu0 %3677 }
 0xd48   : > { %6421 = vmatmul.mubr.msk.f32.gmra.mrb[38].mxu0 %vm1132_vm0, %v3470_v42  ;;  %4463 = vperm.xlu1 %7060, %v4441_v54  }
 0xd49   : > { %4468 = vperm.xlu0 %7059, %v4442_v44  }
 0xd4b   : > { %v8948_v17 = vpop.permute.xlu1 %3682  ;;  %v8950_v52 = vpop.permute.xlu0 %3687 }
 0xd4c   : > { %4473 = vperm.xlu1 %7060, %v4443_v3  }
 0xd4d   : > { %4478 = vperm.xlu0 %7059, %v4444_v55  }
 0xd4f   : > { %v8955_v56 = vpop.permute.xlu1 %3692  ;;  %v8957_v57 = vpop.permute.xlu0 %3739 }
 0xd50   : > { %4483 = vperm.xlu1 %7060, %v4445_v22  }
 0xd51   : > { %4641 = vperm.xlu0 %7059, %v4631_v0  }
 0xd53   : > { %v8965_v61 = vpop.permute.xlu1 %3744  ;;  %v8967_v62 = vpop.permute.xlu0 %3749 }
 0xd54   : > { %4646 = vperm.xlu1 %7060, %v4632_v58  }
 0xd55   : > { %4651 = vperm.xlu0 %7059, %v4633_v59  }
 0xd57   : > { %v8975_v2 = vpop.permute.xlu1 %3754  ;;  %v8977_v4 = vpop.permute.xlu0 %3719 }
 0xd58   : > { %4656 = vperm.xlu1 %7060, %v4634_v63  }
 0xd59   : > { %4661 = vperm.xlu0 %7059, %v4635_v1  }
 0xd5b   : > { %v8985_v26 = vpop.permute.xlu1 %3724  ;;  %v8987_v29 = vpop.permute.xlu0 %3729 }
 0xd5c   : > { %4666 = vperm.xlu1 %7060, %v4636_v23  }
 0xd5d   : > { %4671 = vperm.xlu0 %7059, %v4637_v25  }
 0xd5f   : > { %v8992_v30 = vpop.permute.xlu1 %3734  ;;  %v8994_v38 = vpop.permute.xlu0 %3921 }
 0xd60   : > { %4676 = vperm.xlu1 %7060, %v4638_v37  }
 0xd63   : > { %v8996_v39 = vpop.permute.xlu1 %3926  ;;  %v8998_v40 = vpop.permute.xlu0 %3950 }
 0xd67   : > { %v9000_v41 = vpop.permute.xlu1 %3955  ;;  %v9002_v43 = vpop.permute.xlu0 %3931 }
 0xd6b   : > { %v9004_v45 = vpop.permute.xlu1 %3936  ;;  %v9006_v46 = vpop.permute.xlu0 %3960 }
 0xd6f   : > { %v9009_v47 = vpop.permute.xlu1 %3965  ;;  %v1651_v48 = vpop.permute.xlu0 %1650 }
 0xd70   : > { %v1811_v49 = vadd.f32 %v8613_v6, %v1651_v48 }
 0xd72   : > { %1873 = vst [vmem:[%s9012_s16] sm:$0xff] %v1811_v49 }
 0xd73   : > { %v1656_v50 = vpop.permute.xlu1 %1655  ;;  %v2429_v51 = vpop.permute.xlu0 %2428 }
 0xd74   : > { %v1816_v24 = vadd.f32 %v8611_v5, %v1656_v50  ;;  %v2589_v53 = vadd.f32 %v8740_v28, %v2429_v51 }
 0xd76   : > { %1874 = vst [vmem:[%s9012_s16 + $0x8] sm:$0xff] %v1816_v24  ;;  %5759 = vst [vmem:[%s9012_s16 + $0x40] sm:$0xff] %v2589_v53  ;;  %v2660_v42 = vadd.f32 %v2589_v53, %v1811_v49 }
 0xd77   : > { %v2434_v6 = vpop.permute.xlu1 %2433  ;;  %v3215_v54 = vpop.permute.xlu0 %3214 }
 0xd78   : > { %v2594_v44 = vadd.f32 %v8738_v27, %v2434_v6  ;;  %v3375_v3 = vadd.f32 %v8862_v14, %v3215_v54 }
 0xd7a   : > { %5760 = vst [vmem:[%s9012_s16 + $0x48] sm:$0xff] %v2594_v44  ;;  %v2661_v55 = vadd.f32 %v2594_v44, %v1816_v24  ;;  %5819 = vst [vmem:[%s9012_s16 + $0x80] sm:$0xff] %v3375_v3  ;;  %v9023_v22 = vadd.f32 %v3375_v3, %v2660_v42 }
 0xd7b   : > { %v3220_v5 = vpop.permute.xlu1 %3219  ;;  %v1661_v28 = vpop.permute.xlu0 %1660 }
 0xd7c   : > { %v3380_v0 = vadd.f32 %v8860_v13, %v3220_v5  ;;  %v1821_v58 = vadd.f32 %v8617_v8, %v1661_v28 }
 0xd7e   : > { %5820 = vst [vmem:[%s9012_s16 + $0x88] sm:$0xff] %v3380_v0  ;;  %v9028_v59 = vadd.f32 %v3380_v0, %v2661_v55  ;;  %1875 = vst [vmem:[%s9012_s16 + $0x10] sm:$0xff] %v1821_v58 }
 0xd7f   : > { %v1666_v27 = vpop.permute.xlu1 %1665  ;;  %v2439_v14 = vpop.permute.xlu0 %2438 }
 0xd80   : > { %v1826_v63 = vadd.f32 %v8615_v7, %v1666_v27  ;;  %v2599_v1 = vadd.f32 %v8744_v32, %v2439_v14 }
 0xd82   : > { %1876 = vst [vmem:[%s9012_s16 + $0x18] sm:$0xff] %v1826_v63  ;;  %5761 = vst [vmem:[%s9012_s16 + $0x50] sm:$0xff] %v2599_v1  ;;  %v2662_v23 = vadd.f32 %v2599_v1, %v1821_v58 }
 0xd83   : > { %v2444_v25 = vpop.permute.xlu1 %2443  ;;  %v9035_v13 = vpop.permute.xlu0 %4000 }
 0xd84   : > { %v2604_v8 = vadd.f32 %v8742_v31, %v2444_v25 }
 0xd86   : > { %5762 = vst [vmem:[%s9012_s16 + $0x58] sm:$0xff] %v2604_v8  ;;  %v2663_v37 = vadd.f32 %v2604_v8, %v1826_v63  ;;  %v3700_v8 = vld [vmem:[#allocation11 + $0xc0] sm:$0xff] }
 0xd87   : > { %v9039_v48 = vpop.permute.xlu1 %4005  ;;  %v3225_v49 = vpop.permute.xlu0 %3224  ;;  %6431 = vmatprep.mubr.msk.f32.mxu1 %vm1132_vm0, %v3700_v8 }
 0xd88   : > { %v3385_v7 = vadd.f32 %v8866_v18, %v3225_v49 }
 0xd8a   : > { %5821 = vst [vmem:[%s9012_s16 + $0x90] sm:$0xff] %v3385_v7  ;;  %v9043_v32 = vadd.f32 %v3385_v7, %v2662_v23 }
 0xd8b   : > { %v3230_v50 = vpop.permute.xlu1 %3229  ;;  %v1671_v51 = vpop.permute.xlu0 %1670 }
 0xd8c   : > { %v3390_v24 = vadd.f32 %v8864_v15, %v3230_v50  ;;  %v1831_v53 = vadd.f32 %v8621_v10, %v1671_v51 }
 0xd8e   : > { %5822 = vst [vmem:[%s9012_s16 + $0x98] sm:$0xff] %v3390_v24  ;;  %v9048_v31 = vadd.f32 %v3390_v24, %v2663_v37  ;;  %1877 = vst [vmem:[%s9012_s16 + $0x20] sm:$0xff] %v1831_v53 }
 0xd8f   : > { %v1676_v42 = vpop.permute.xlu1 %1675  ;;  %v2449_v6 = vpop.permute.xlu0 %2448 }
 0xd90   : > { %v1836_v54 = vadd.f32 %v8619_v9, %v1676_v42  ;;  %v2609_v18 = vadd.f32 %v8748_v16, %v2449_v6 }
 0xd92   : > { %1878 = vst [vmem:[%s9012_s16 + $0x28] sm:$0xff] %v1836_v54  ;;  %5763 = vst [vmem:[%s9012_s16 + $0x60] sm:$0xff] %v2609_v18  ;;  %v2664_v44 = vadd.f32 %v2609_v18, %v1831_v53 }
 0xd93   : > { %v2454_v3 = vpop.permute.xlu1 %2453  ;;  %v9055_v15 = vpop.permute.xlu0 %4010 }
 0xd94   : > { %v2614_v10 = vadd.f32 %v8746_v33, %v2454_v3 }
 0xd96   : > { %5764 = vst [vmem:[%s9012_s16 + $0x68] sm:$0xff] %v2614_v10  ;;  %v2665_v55 = vadd.f32 %v2614_v10, %v1836_v54 }
 0xd97   : > { %v9059_v5 = vpop.permute.xlu1 %4015  ;;  %v3235_v28 = vpop.permute.xlu0 %3234 }
 0xd98   : > { %v3395_v9 = vadd.f32 %v8870_v19, %v3235_v28  ;;  %v3702_v28 = vld [vmem:[#allocation11 + $0xd0] sm:$0xff] }
 0xd9a   : > { %5823 = vst [vmem:[%s9012_s16 + $0xa0] sm:$0xff] %v3395_v9  ;;  %v9063_v16 = vadd.f32 %v3395_v9, %v2664_v44  ;;  %v3706_v9 = vld [vmem:[#allocation11 + $0xf0] sm:$0xff] }
 0xd9b   : > { %v3240_v0 = vpop.permute.xlu1 %3239  ;;  %v1681_v58 = vpop.permute.xlu0 %1680 }
 0xd9c   : > { %v3400_v27 = vadd.f32 %v8868_v60, %v3240_v0  ;;  %v1841_v14 = vadd.f32 %v8625_v12, %v1681_v58  ;;  %v3973_v0 = vld [vmem:[#allocation13 + $0x120] sm:$0xff] }
 0xd9d   : > { %6451 = vmatprep.mubr.msk.f32.mxu0 %vm1132_vm0, %v3973_v0 }
 0xd9e   : > { %5824 = vst [vmem:[%s9012_s16 + $0xa8] sm:$0xff] %v3400_v27  ;;  %v9068_v33 = vadd.f32 %v3400_v27, %v2665_v55  ;;  %1879 = vst [vmem:[%s9012_s16 + $0x30] sm:$0xff] %v1841_v14 }
 0xd9f   : > { %v1686_v63 = vpop.permute.xlu1 %1685  ;;  %v2459_v1 = vpop.permute.xlu0 %2458 }
 0xda0   : > { %v1846_v23 = vadd.f32 %v8623_v11, %v1686_v63  ;;  %v2619_v19 = vadd.f32 %v8752_v36, %v2459_v1 }
 0xda2   : > { %1880 = vst [vmem:[%s9012_s16 + $0x38] sm:$0xff] %v1846_v23  ;;  %5765 = vst [vmem:[%s9012_s16 + $0x70] sm:$0xff] %v2619_v19  ;;  %v2666_v25 = vadd.f32 %v2619_v19, %v1841_v14 }
 0xda3   : > { %v2464_v60 = vpop.permute.xlu1 %2463  ;;  %v9075_v37 = vpop.permute.xlu0 %4020 }
 0xda4   : > { %v2624_v12 = vadd.f32 %v8750_v35, %v2464_v60 }
 0xda6   : > { %5766 = vst [vmem:[%s9012_s16 + $0x78] sm:$0xff] %v2624_v12  ;;  %v2667_v49 = vadd.f32 %v2624_v12, %v1846_v23 }
 0xda7   : > { %v9080_v7 = vpop.permute.xlu1 %4025  ;;  %v3245_v50 = vpop.permute.xlu0 %3244 }
 0xda8   : > { %v3405_v11 = vadd.f32 %v8874_v21, %v3245_v50 }
 0xdaa   : > { %5825 = vst [vmem:[%s9012_s16 + $0xb0] sm:$0xff] %v3405_v11  ;;  %v9084_v36 = vadd.f32 %v3405_v11, %v2666_v25 }
 0xdab   : > { %v3250_v51 = vpop.permute.xlu1 %3249 }
 0xdac   : > { %v3410_v24 = vadd.f32 %v8872_v20, %v3250_v51  ;;  %v3701_v20 = vld [vmem:[#allocation11 + $0xc8] sm:$0xff] }
 0xdae   : > { %5826 = vst [vmem:[%s9012_s16 + $0xb8] sm:$0xff] %v3410_v24  ;;  %v9088_v53 = vadd.f32 %v3410_v24, %v2667_v49 }
 0xe17   : > { %v6419_v42 = vpop.f32.mrb[36].mxu0 }
 0xe18   : > { %v3696_v6 = vadd.f32 %v6419_v42, %v8948_v17  ;;  %v3651_v35 = vpop.f32.mrb[37].mxu0  ;;  %v3703_v17 = vld [vmem:[#allocation11 + $0xd8] sm:$0xff] }
 0xe19   : > { %v3695_v54 = vadd.f32 %v8945_v34, %v3651_v35  ;;  %v3704_v34 = vld [vmem:[#allocation11 + $0xe0] sm:$0xff] }
 0xe1b   : > { %v6722_v18 = vpack.c.bf16 %v3696_v6, %v3695_v54  ;;  %v6422_v44 = vpop.f32.mrb[38].mxu0 }
 0xe1c   : > { %v3698_v3 = vadd.f32 %v6422_v44, %v8955_v56  ;;  %v3661_v21 = vpop.f32.mrb[39].mxu0  ;;  %v3705_v56 = vld [vmem:[#allocation11 + $0xe8] sm:$0xff] }
 0xe1d   : > { %v3697_v10 = vadd.f32 %v8950_v52, %v3661_v21  ;;  %6723 = vmatprep.subr.bf16.mxu1 %v6722_v18  ;;  %v3707_v52 = vld [vmem:[#allocation11 + $0xf8] sm:$0xff] }
 0xe1e   : > { %6725 = vmatpush3.bf16.msra.mxu1 %v6722_v18 }
 0xe1f   : > { %v6726_v55 = vpack.c.bf16 %v3698_v3, %v3697_v10 }
 0xe21   : > { %6727 = vmatprep.subr.bf16.mxu1 %v6726_v55 }
 0xe22   : > { %6729 = vmatpush3.bf16.msra.mxu1 %v6726_v55 }
 0xe25   : > { %6432 = vmatmul.mubr.msk.f32.vlgmr.msra.gmra.mrb[40].mxu1 %vm1132_vm0, %v3701_v20 }
 0xe26   : > { %6434 = vmatprep.mubr.msk.f32.mxu1 %vm1132_vm0, %v3702_v28 }
 0xe29   : > { %6435 = vmatmul.mubr.msk.f32.gmra.mrb[42].mxu1 %vm1132_vm0, %v3703_v17 }
 0xe2a   : > { %6437 = vmatprep.mubr.msk.f32.mxu1 %vm1132_vm0, %v3704_v34 }
 0xe2d   : > { %6438 = vmatmul.mubr.msk.f32.gmra.mrb[44].mxu1 %vm1132_vm0, %v3705_v56 }
 0xe2e   : > { %6440 = vmatprep.mubr.msk.f32.mxu1 %vm1132_vm0, %v3706_v9 }
 0xe31   : > { %6441 = vmatmul.mubr.msk.f32.gmra.mrb[46].mxu1 %vm1132_vm0, %v3707_v52 }
 0xef8   : > { %v6433_v58 = vpop.f32.mrb[40].mxu1 }
 0xef9   : > { %v3847_v27 = vpop.f32.mrb[41].mxu1 }
 0xefc   : > { %v6436_v14 = vpop.f32.mrb[42].mxu1 }
 0xefd   : > { %v3857_v63 = vpop.f32.mrb[43].mxu1 }
 0xf00   : > { %v6439_v1 = vpop.f32.mrb[44].mxu1 }
 0xf01   : > { %v3873_v23 = vadd.f32 %v6439_v1, %v8965_v61  ;;  %v3867_v19 = vpop.f32.mrb[45].mxu1  ;;  %v3848_v61 = vadd.f32 %v3847_v27, %v8977_v4 }
 0xf02   : > { %v3868_v25 = vadd.f32 %v3867_v19, %v8957_v57  ;;  %v3853_v57 = vadd.f32 %v6433_v58, %v8985_v26 }
 0xf03   : > { %v3891_v8 = vsub.f32 0.0, %v3873_v23 }
 0xf04   : > { %v3890_v60 = vsub.f32 0.0, %v3868_v25  ;;  %v6442_v12 = vpop.f32.mrb[46].mxu1 }
 0xf05   : > { %v3896_v49 = vmul.f32 1.442695, %v3891_v8  ;;  %v3883_v50 = vadd.f32 %v6442_v12, %v8975_v2  ;;  %v3877_v11 = vpop.f32.mrb[47].mxu1  ;;  %v3863_v2 = vadd.f32 %v6436_v14, %v8992_v30 }
 0xf06   : > { %v3894_v51 = vmul.f32 1.442695, %v3890_v60  ;;  %v3878_v24 = vadd.f32 %v3877_v11, %v8967_v62  ;;  %v3858_v62 = vadd.f32 %v3857_v63, %v8987_v29 }
 0xf07   : > { %7173 = vpow2.f32 %v3896_v49  ;;  %v3893_v42 = vsub.f32 0.0, %v3883_v50  ;;  %v4236_v49 = vld [vmem:[#allocation16] sm:$0xff] }
 0xf08   : > { %7175 = vpow2.f32 %v3894_v51  ;;  %v3892_v6 = vsub.f32 0.0, %v3878_v24  ;;  %6485 = vmatprep.mubr.msk.f32.mxu1 %vm4292_vm5, %v4236_v49 }
 0xf09   : > { %v3900_v35 = vmul.f32 1.442695, %v3893_v42 }
 0xf0a   : > { %v3898_v54 = vmul.f32 1.442695, %v3892_v6 }
 0xf0b   : > { %7177 = vpow2.f32 %v3900_v35 }
 0xf0c   : > { %7179 = vpow2.f32 %v3898_v54 }
 0xf0d   : > { %7181 = vtanh.f32 %v3853_v57 }
 0xf0e   : > { %7183 = vtanh.f32 %v3848_v61 }
 0xf11   : > { %v7174_v18 = vpop.eup %7173 }
 0xf12   : > { %v7176_v44 = vpop.eup %7175  ;;  %v3903_v3 = vadd.f32 1.0, %v7174_v18 }
 0xf13   : > { %v3902_v21 = vadd.f32 1.0, %v7176_v44 }
 0xf14   : > { %7185 = vrcp.f32 %v3903_v3 }
 0xf15   : > { %v7178_v10 = vpop.eup %7177  ;;  %7187 = vrcp.f32 %v3902_v21 }
 0xf16   : > { %v7180_v55 = vpop.eup %7179  ;;  %7189 = vtanh.f32 %v3863_v2  ;;  %v3905_v20 = vadd.f32 1.0, %v7178_v10 }
 0xf17   : > { %7191 = vtanh.f32 %v3858_v62  ;;  %v3904_v26 = vadd.f32 1.0, %v7180_v55  ;;  %v7182_v4 = vpop.eup %7181 }
 0xf18   : > { %7193 = vrcp.f32 %v3905_v20  ;;  %v7184_v28 = vpop.eup %7183  ;;  %v4031_v20 = vpop.permute.xlu0 %4030 }
 0xf19   : > { %7195 = vrcp.f32 %v3904_v26 }
 0xf1e   : > { %v7186_v17 = vpop.eup %7185 }
 0xf1f   : > { %v7188_v34 = vpop.eup %7187  ;;  %v3911_v30 = vmul.f32 %v7186_v17, %v7182_v4 }
 0xf20   : > { %v7190_v56 = vpop.eup %7189  ;;  %v3910_v9 = vmul.f32 %v7188_v34, %v7184_v28 }
 0xf21   : > { %v7192_v52 = vpop.eup %7191  ;;  %v3940_v29 = vmul.f32 %v8996_v39, %v3911_v30 }
 0xf22   : > { %v7194_v0 = vpop.eup %7193  ;;  %v3939_v58 = vmul.f32 %v8994_v38, %v3910_v9  ;;  %v3974_v38 = vld [vmem:[#allocation13 + $0x128] sm:$0xff] }
 0xf23   : > { %v7196_v27 = vpop.eup %7195  ;;  %v3969_v14 = vadd.f32 %v9000_v41, %v3940_v29  ;;  %v3913_v63 = vmul.f32 %v7194_v0, %v7190_v56  ;;  %v3975_v41 = vld [vmem:[#allocation13 + $0x130] sm:$0xff]  ;;  %v4237_v9 = vld [vmem:[#allocation16 + $0x8] sm:$0xff]  ;;  %v4239_v29 = vld [vmem:[#allocation16 + $0x18] sm:$0xff] }
 0xf24   : > { %v3968_v1 = vadd.f32 %v8998_v40, %v3939_v58  ;;  %v3912_v23 = vmul.f32 %v7196_v27, %v7192_v52  ;;  %v3976_v40 = vld [vmem:[#allocation13 + $0x138] sm:$0xff]  ;;  %v4238_v52 = vld [vmem:[#allocation16 + $0x10] sm:$0xff]  ;;  %v3981_v27 = vld [vmem:[#allocation13 + $0x160] sm:$0xff] }
 0xf25   : > { %v3942_v19 = vmul.f32 %v9004_v45, %v3913_v63  ;;  %v3977_v45 = vld [vmem:[#allocation13 + $0x140] sm:$0xff]  ;;  %v4242_v0 = vld [vmem:[#allocation16 + $0x30] sm:$0xff]  ;;  %v4243_v58 = vld [vmem:[#allocation16 + $0x38] sm:$0xff] }
 0xf26   : > { %v6730_v25 = vpack.c.bf16 %v3969_v14, %v3968_v1  ;;  %v3941_v8 = vmul.f32 %v9002_v43, %v3912_v23  ;;  %v3978_v43 = vld [vmem:[#allocation13 + $0x148] sm:$0xff]  ;;  %v3983_v63 = vld [vmem:[#allocation13 + $0x170] sm:$0xff]  ;;  %v3984_v1 = vld [vmem:[#allocation13 + $0x178] sm:$0xff] }
 0xf27   : > { %v3971_v60 = vadd.f32 %v9009_v47, %v3942_v19  ;;  %v3980_v47 = vld [vmem:[#allocation13 + $0x158] sm:$0xff]  ;;  %v3982_v14 = vld [vmem:[#allocation13 + $0x168] sm:$0xff]  ;;  %v4430_v23 = vld [vmem:[#allocation19] sm:$0xff] }
 0xf28   : > { %6731 = vmatprep.subr.bf16.mxu0 %v6730_v25  ;;  %v3970_v39 = vadd.f32 %v9006_v46, %v3941_v8  ;;  %v3979_v46 = vld [vmem:[#allocation13 + $0x150] sm:$0xff] }
 0xf29   : > { %6733 = vmatpush3.bf16.msra.mxu0 %v6730_v25  ;;  %v4255_v25 = vpop.permute.xlu0 %4254 }
 0xf2a   : > { %v6734_v12 = vpack.c.bf16 %v3971_v60, %v3970_v39 }
 0xf2c   : > { %6735 = vmatprep.subr.bf16.mxu0 %v6734_v12 }
 0xf2d   : > { %6737 = vmatpush3.bf16.msra.mxu0 %v6734_v12  ;;  %v4265_v39 = vpop.permute.xlu0 %4264 }
 0xf30   : > { %6452 = vmatmul.mubr.msk.f32.vlgmr.msra.gmra.mrb[40].mxu0 %vm1132_vm0, %v3974_v38 }
 0xf31   : > { %6454 = vmatprep.mubr.msk.f32.mxu0 %vm1132_vm0, %v3975_v41 }
 0xf34   : > { %6455 = vmatmul.mubr.msk.f32.gmra.mrb[42].mxu0 %vm1132_vm0, %v3976_v40 }
 0xf35   : > { %6457 = vmatprep.mubr.msk.f32.mxu0 %vm1132_vm0, %v3977_v45 }
 0xf38   : > { %6458 = vmatmul.mubr.msk.f32.gmra.mrb[44].mxu0 %vm1132_vm0, %v3978_v43 }
 0xf39   : > { %6460 = vmatprep.mubr.msk.f32.mxu0 %vm1132_vm0, %v3979_v46 }
 0xf3c   : > { %6461 = vmatmul.mubr.msk.f32.gmra.mrb[46].mxu0 %vm1132_vm0, %v3980_v47 }
 0xf3d   : > { %6463 = vmatprep.mubr.msk.f32.mxu0 %vm1132_vm0, %v3981_v27 }
 0xf40   : > { %6464 = vmatmul.mubr.msk.f32.gmra.mrb[48].mxu0 %vm1132_vm0, %v3982_v14 }
 0xf41   : > { %6466 = vmatprep.mubr.msk.f32.mxu0 %vm1132_vm0, %v3983_v63 }
 0xf44   : > { %6467 = vmatmul.mubr.msk.f32.gmra.mrb[50].mxu0 %vm1132_vm0, %v3984_v1 }
 0xf45   : > { %6513 = vmatprep.mubr.msk.f32.mxu0 %vm4292_vm5, %v4430_v23 }
0x1003   : > { %v6453_v50 = vpop.f32.mrb[40].mxu0 }
0x1004   : > { %v4162_v11 = vadd.f32 %v6453_v50, %v9039_v48  ;;  %v4156_v51 = vpop.f32.mrb[41].mxu0 }
0x1005   : > { %v4157_v24 = vadd.f32 %v4156_v51, %v9035_v13  ;;  %v4275_v51 = vpop.permute.xlu0 %4274 }
0x1006   : > { %5880 = vst [vmem:[%s9012_s16 + $0xc8] sm:$0xff] %v4162_v11  ;;  %v4221_v42 = vadd.f32 %v4162_v11, %v9028_v59 }
0x1007   : > { %5879 = vst [vmem:[%s9012_s16 + $0xc0] sm:$0xff] %v4157_v24  ;;  %v4220_v6 = vadd.f32 %v4157_v24, %v9023_v22  ;;  %v6456_v35 = vpop.f32.mrb[42].mxu0 }
0x1008   : > { %v4229_v54 = vmax.f32 %v4221_v42, 0.0  ;;  %v4172_v57 = vadd.f32 %v6456_v35, %v9059_v5  ;;  %v4166_v61 = vpop.f32.mrb[43].mxu0 }
0x1009   : > { %v4228_v18 = vmax.f32 %v4220_v6, 0.0  ;;  %v4167_v44 = vadd.f32 %v4166_v61, %v9055_v15 }
0x100a   : > { %5882 = vst [vmem:[%s9012_s16 + $0xd8] sm:$0xff] %v4172_v57  ;;  %v4223_v48 = vadd.f32 %v4172_v57, %v9048_v31  ;;  %v4036_v31 = vpop.permute.xlu1 %4035 }
0x100b   : > { %5881 = vst [vmem:[%s9012_s16 + $0xd0] sm:$0xff] %v4167_v44  ;;  %v4222_v13 = vadd.f32 %v4167_v44, %v9043_v32  ;;  %v6459_v59 = vpop.f32.mrb[44].mxu0  ;;  %v6738_v2 = vpack.c.bf16 %v4229_v54, %v4228_v18 }
0x100c   : > { %v4231_v3 = vmax.f32 %v4223_v48, 0.0  ;;  %v4182_v22 = vadd.f32 %v6459_v59, %v9080_v7  ;;  %v4176_v62 = vpop.f32.mrb[45].mxu0  ;;  %v4285_v59 = vpop.permute.xlu0 %4284 }
0x100d   : > { %v4230_v21 = vmax.f32 %v4222_v13, 0.0  ;;  %v4177_v5 = vadd.f32 %v4176_v62, %v9075_v37  ;;  %6739 = vmatprep.subr.bf16.mxu1 %v6738_v2 }
0x100e   : > { %5884 = vst [vmem:[%s9012_s16 + $0xe8] sm:$0xff] %v4182_v22  ;;  %v4225_v15 = vadd.f32 %v4182_v22, %v9068_v33  ;;  %6741 = vmatpush3.bf16.msra.mxu1 %v6738_v2  ;;  %v4260_v19 = vpop.permute.xlu1 %4259 }
0x100f   : > { %5883 = vst [vmem:[%s9012_s16 + $0xe0] sm:$0xff] %v4177_v5  ;;  %v4224_v32 = vadd.f32 %v4177_v5, %v9063_v16  ;;  %v6462_v10 = vpop.f32.mrb[46].mxu0  ;;  %v6742_v55 = vpack.c.bf16 %v4231_v3, %v4230_v21 }
0x1010   : > { %v4233_v26 = vmax.f32 %v4225_v15, 0.0  ;;  %v4192_v7 = vadd.f32 %v6462_v10, %v4036_v31  ;;  %v4186_v4 = vpop.f32.mrb[47].mxu0  ;;  %v4431_v31 = vld [vmem:[#allocation19 + $0x8] sm:$0xff]  ;;  %v4433_v10 = vld [vmem:[#allocation19 + $0x18] sm:$0xff] }
0x1011   : > { %v4232_v28 = vmax.f32 %v4224_v32, 0.0  ;;  %v4187_v17 = vadd.f32 %v4186_v4, %v4031_v20  ;;  %6743 = vmatprep.subr.bf16.mxu1 %v6742_v55  ;;  %v4432_v32 = vld [vmem:[#allocation19 + $0x10] sm:$0xff]  ;;  %v4435_v20 = vld [vmem:[#allocation19 + $0x28] sm:$0xff] }
0x1012   : > { %5886 = vst [vmem:[%s9012_s16 + $0xf8] sm:$0xff] %v4192_v7  ;;  %v4227_v37 = vadd.f32 %v4192_v7, %v9088_v53  ;;  %6745 = vmatpush3.bf16.msra.mxu1 %v6742_v55  ;;  %v4240_v53 = vld [vmem:[#allocation16 + $0x20] sm:$0xff]  ;;  %v4270_v8 = vpop.permute.xlu1 %4269  ;;  %v4437_v7 = vld [vmem:[#allocation19 + $0x38] sm:$0xff] }
0x1013   : > { %5885 = vst [vmem:[%s9012_s16 + $0xf0] sm:$0xff] %v4187_v17  ;;  %v4226_v33 = vadd.f32 %v4187_v17, %v9084_v36  ;;  %v6746_v34 = vpack.c.bf16 %v4233_v26, %v4232_v28  ;;  %v4241_v36 = vld [vmem:[#allocation16 + $0x28] sm:$0xff]  ;;  %v4434_v55 = vld [vmem:[#allocation19 + $0x20] sm:$0xff]  ;;  %v4436_v26 = vld [vmem:[#allocation19 + $0x30] sm:$0xff]  ;;  %v6465_v4 = vpop.f32.mrb[48].mxu0 }
0x1014   : > { %v4235_v30 = vmax.f32 %v4227_v37, 0.0  ;;  %v4196_v28 = vpop.f32.mrb[49].mxu0 }
0x1015   : > { %v4234_v56 = vmax.f32 %v4226_v33, 0.0  ;;  %6747 = vmatprep.subr.bf16.mxu1 %v6746_v34  ;;  %v4623_v33 = vld [vmem:[#allocation22] sm:$0xff] }
0x1016   : > { %6749 = vmatpush3.bf16.msra.mxu1 %v6746_v34  ;;  %v4280_v49 = vpop.permute.xlu1 %4279 }
0x1017   : > { %v6750_v16 = vpack.c.bf16 %v4235_v30, %v4234_v56  ;;  %v6468_v17 = vpop.f32.mrb[50].mxu0  ;;  %v4449_v30 = vpop.permute.xlu0 %4448 }
0x1018   : > { %v4204_v37 = vpop.f32.mrb[51].mxu0 }
0x1019   : > { %6751 = vmatprep.subr.bf16.mxu1 %v6750_v16 }
0x101a   : > { %6753 = vmatpush3.bf16.msra.mxu1 %v6750_v16  ;;  %v4290_v44 = vpop.permute.xlu1 %4289 }
0x101d   : > { %6486 = vmatmul.mubr.msk.f32.vlgmr.msra.gmra.mrb[48].mxu1 %vm4292_vm5, %v4237_v9  ;;  %v4459_v9 = vpop.permute.xlu0 %4458 }
0x101e   : > { %6488 = vmatprep.mubr.msk.f32.mxu1 %vm4292_vm5, %v4238_v52  ;;  %v4454_v34 = vpop.permute.xlu1 %4453 }
0x1021   : > { %6489 = vmatmul.mubr.msk.f32.gmra.mrb[50].mxu1 %vm4292_vm5, %v4239_v29 }
0x1022   : > { %6491 = vmatprep.mubr.msk.f32.mxu1 %vm4292_vm5, %v4240_v53  ;;  %v4464_v56 = vpop.permute.xlu1 %4463 }
0x1025   : > { %6492 = vmatmul.mubr.msk.f32.gmra.mrb[52].mxu1 %vm4292_vm5, %v4241_v36 }
0x1026   : > { %6494 = vmatprep.mubr.msk.f32.mxu1 %vm4292_vm5, %v4242_v0  ;;  %v4474_v63 = vpop.permute.xlu1 %4473 }
0x1029   : > { %6495 = vmatmul.mubr.msk.f32.gmra.mrb[54].mxu1 %vm4292_vm5, %v4243_v58 }
0x102a   : > { %6541 = vmatprep.mubr.msk.f32.mxu1 %vm4292_vm5, %v4623_v33 }
0x10f0   : > { %v6487_v60 = vpop.f32.mrb[48].mxu1 }
0x10f1   : > { %v4389_v12 = vadd.f32 %v6487_v60, %v4260_v19  ;;  %v4383_v38 = vpop.f32.mrb[49].mxu1  ;;  %v4469_v19 = vpop.permute.xlu0 %4468 }
0x10f2   : > { %v4384_v41 = vadd.f32 %v4383_v38, %v4255_v25 }
0x10f3   : > { %v4423_v40 = vmax.f32 %v4389_v12, 0.0 }
0x10f4   : > { %v4422_v45 = vmax.f32 %v4384_v41, 0.0  ;;  %v6490_v43 = vpop.f32.mrb[50].mxu1 }
0x10f5   : > { %v4399_v46 = vadd.f32 %v6490_v43, %v4270_v8  ;;  %v4393_v47 = vpop.f32.mrb[51].mxu1 }
0x10f6   : > { %v6754_v50 = vpack.c.bf16 %v4423_v40, %v4422_v45  ;;  %v4394_v11 = vadd.f32 %v4393_v47, %v4265_v39  ;;  %v4484_v45 = vpop.permute.xlu1 %4483  ;;  %v4479_v47 = vpop.permute.xlu0 %4478 }
0x10f7   : > { %v4425_v24 = vmax.f32 %v4399_v46, 0.0 }
0x10f8   : > { %v4424_v42 = vmax.f32 %v4394_v11, 0.0  ;;  %v6493_v6 = vpop.f32.mrb[52].mxu1  ;;  %6755 = vmatprep.subr.bf16.mxu0 %v6754_v50 }
0x10f9   : > { %v4409_v35 = vadd.f32 %v6493_v6, %v4280_v49  ;;  %v4403_v54 = vpop.f32.mrb[53].mxu1  ;;  %6757 = vmatpush3.bf16.msra.mxu0 %v6754_v50 }
0x10fa   : > { %v6758_v57 = vpack.c.bf16 %v4425_v24, %v4424_v42  ;;  %v4404_v61 = vadd.f32 %v4403_v54, %v4275_v51  ;;  %v4625_v54 = vld [vmem:[#allocation22 + $0x10] sm:$0xff] }
0x10fb   : > { %v4427_v18 = vmax.f32 %v4409_v35, 0.0  ;;  %v4624_v35 = vld [vmem:[#allocation22 + $0x8] sm:$0xff] }
0x10fc   : > { %v4426_v48 = vmax.f32 %v4404_v61, 0.0  ;;  %v6496_v13 = vpop.f32.mrb[54].mxu1  ;;  %6759 = vmatprep.subr.bf16.mxu0 %v6758_v57  ;;  %v4627_v61 = vld [vmem:[#allocation22 + $0x20] sm:$0xff] }
0x10fd   : > { %v4419_v2 = vadd.f32 %v6496_v13, %v4290_v44  ;;  %v4413_v3 = vpop.f32.mrb[55].mxu1  ;;  %6761 = vmatpush3.bf16.msra.mxu0 %v6758_v57  ;;  %v4626_v57 = vld [vmem:[#allocation22 + $0x18] sm:$0xff]  ;;  %v4629_v44 = vld [vmem:[#allocation22 + $0x30] sm:$0xff]  ;;  %v4816_v13 = vld [vmem:[#allocation23] sm:$0xff] }
0x10fe   : > { %v6762_v22 = vpack.c.bf16 %v4427_v18, %v4426_v48  ;;  %v4414_v62 = vadd.f32 %v4413_v3, %v4285_v59  ;;  %v4628_v18 = vld [vmem:[#allocation22 + $0x28] sm:$0xff]  ;;  %v4630_v48 = vld [vmem:[#allocation22 + $0x38] sm:$0xff]  ;;  %v4938_v59 = vld [vmem:[#allocation23 + $0x10] sm:$0xff]  ;;  %v4642_v3 = vpop.permute.xlu0 %4641 }
0x10ff   : > { %v4429_v21 = vmax.f32 %v4419_v2, 0.0  ;;  %v4647_v2 = vpop.permute.xlu1 %4646 }
0x1100   : > { %v4428_v5 = vmax.f32 %v4414_v62, 0.0  ;;  %6763 = vmatprep.subr.bf16.mxu0 %v6762_v22 }
0x1101   : > { %6765 = vmatpush3.bf16.msra.mxu0 %v6762_v22 }
0x1102   : > { %v6766_v15 = vpack.c.bf16 %v4429_v21, %v4428_v5  ;;  %v4652_v21 = vpop.permute.xlu0 %4651 }
0x1103   : > { %v4657_v22 = vpop.permute.xlu1 %4656 }
0x1104   : > { %6767 = vmatprep.subr.bf16.mxu0 %v6766_v15 }
0x1105   : > { %6769 = vmatpush3.bf16.msra.mxu0 %v6766_v15 }
0x1106   : > { %v4662_v17 = vpop.permute.xlu0 %4661 }
0x1108   : > { %6514 = vmatmul.mubr.msk.f32.vlgmr.msra.gmra.mrb[52].mxu0 %vm4292_vm5, %v4431_v31 }
0x1109   : > { %6516 = vmatprep.mubr.msk.f32.mxu0 %vm4292_vm5, %v4432_v32 }
0x110c   : > { %6517 = vmatmul.mubr.msk.f32.gmra.mrb[54].mxu0 %vm4292_vm5, %v4433_v10 }
0x110d   : > { %6519 = vmatprep.mubr.msk.f32.mxu0 %vm4292_vm5, %v4434_v55 }
0x1110   : > { %6520 = vmatmul.mubr.msk.f32.gmra.mrb[56].mxu0 %vm4292_vm5, %v4435_v20 }
0x1111   : > { %6522 = vmatprep.mubr.msk.f32.mxu0 %vm4292_vm5, %v4436_v26 }
0x1114   : > { %6523 = vmatmul.mubr.msk.f32.gmra.mrb[58].mxu0 %vm4292_vm5, %v4437_v7  ;;  %v4667_v7 = vpop.permute.xlu1 %4666 }
0x1115   : > { %6561 = vmatprep.mubr.msk.f32.mxu0 %vm1132_vm0, %v4816_v13 }
0x11db   : > { %v6515_v16 = vpop.f32.mrb[52].mxu0 }
0x11dc   : > { %v4582_v52 = vadd.f32 %v6515_v16, %v4454_v34  ;;  %v4576_v29 = vpop.f32.mrb[53].mxu0 }
0x11dd   : > { %v4577_v53 = vadd.f32 %v4576_v29, %v4449_v30  ;;  %v4677_v29 = vpop.permute.xlu1 %4676 }
0x11de   : > { %v4616_v36 = vmax.f32 %v4582_v52, 0.0 }
0x11df   : > { %v4615_v0 = vmax.f32 %v4577_v53, 0.0  ;;  %v6518_v58 = vpop.f32.mrb[54].mxu0 }
0x11e0   : > { %v4592_v27 = vadd.f32 %v6518_v58, %v4464_v56  ;;  %v4586_v14 = vpop.f32.mrb[55].mxu0 }
0x11e1   : > { %v9168_v1 = vpack.c.bf16 %v4616_v36, %v4615_v0  ;;  %v4587_v23 = vadd.f32 %v4586_v14, %v4459_v9  ;;  %v4672_v0 = vpop.permute.xlu0 %4671  ;;  %v4817_v14 = vld [vmem:[#allocation23 + $0x8] sm:$0xff] }
0x11e2   : > { %v4618_v25 = vmax.f32 %v4592_v27, 0.0 }
0x11e3   : > { %v4617_v8 = vmax.f32 %v4587_v23, 0.0  ;;  %v6521_v60 = vpop.f32.mrb[56].mxu0  ;;  %6771 = vmatprep.subr.bf16.mxu1 %v9168_v1 }
0x11e4   : > { %v4602_v39 = vadd.f32 %v6521_v60, %v4474_v63  ;;  %v4596_v12 = vpop.f32.mrb[57].mxu0  ;;  %6773 = vmatpush3.bf16.msra.mxu1 %v9168_v1 }
0x11e5   : > { %v9172_v38 = vpack.c.bf16 %v4618_v25, %v4617_v8  ;;  %v4597_v41 = vadd.f32 %v4596_v12, %v4469_v19  ;;  %v5070_v25 = vld [vmem:[#allocation28] sm:$0xff] }
0x11e6   : > { %v4620_v40 = vmax.f32 %v4602_v39, 0.0  ;;  %v4939_v39 = vld [vmem:[#allocation23 + $0x18] sm:$0xff] }
0x11e7   : > { %v4619_v43 = vmax.f32 %v4597_v41, 0.0  ;;  %v6524_v46 = vpop.f32.mrb[58].mxu0  ;;  %6775 = vmatprep.subr.bf16.mxu1 %v9172_v38 }
0x11e8   : > { %v4612_v49 = vadd.f32 %v6524_v46, %v4484_v45  ;;  %v4606_v50 = vpop.f32.mrb[59].mxu0  ;;  %6777 = vmatpush3.bf16.msra.mxu1 %v9172_v38  ;;  %v5038_v46 = vld [vmem:[#allocation26 + $0x18] sm:$0xff] }
0x11e9   : > { %v9176_v11 = vpack.c.bf16 %v4620_v40, %v4619_v43  ;;  %v4607_v51 = vadd.f32 %v4606_v50, %v4479_v47  ;;  %v4941_v47 = vld [vmem:[#allocation25 + $0x10] sm:$0xff] }
0x11ea   : > { %v4622_v24 = vmax.f32 %v4612_v49, 0.0  ;;  %v4819_v49 = vld [vmem:[#allocation25 + $0x8] sm:$0xff] }
0x11eb   : > { %v4621_v42 = vmax.f32 %v4607_v51, 0.0  ;;  %6779 = vmatprep.subr.bf16.mxu1 %v9176_v11  ;;  %v4914_v51 = vld [vmem:[#allocation26 + $0x8] sm:$0xff] }
0x11ec   : > { %6781 = vmatpush3.bf16.msra.mxu1 %v9176_v11 }
0x11ed   : > { %v9180_v6 = vpack.c.bf16 %v4622_v24, %v4621_v42  ;;  %v4818_v24 = vld [vmem:[#allocation25] sm:$0xff] }
0x11ee   : > { %v4913_v42 = vld [vmem:[#allocation26] sm:$0xff] }
0x11ef   : > { %6783 = vmatprep.subr.bf16.mxu1 %v9180_v6 }
0x11f0   : > { %6785 = vmatpush3.bf16.msra.mxu1 %v9180_v6 }
0x11f3   : > { %6542 = vmatmul.mubr.msk.f32.vlgmr.msra.gmra.mrb[56].mxu1 %vm4292_vm5, %v4624_v35 }
0x11f4   : > { %6544 = vmatprep.mubr.msk.f32.mxu1 %vm4292_vm5, %v4625_v54 }
0x11f7   : > { %6545 = vmatmul.mubr.msk.f32.gmra.mrb[58].mxu1 %vm4292_vm5, %v4626_v57  ;;  %v5160_v57 = vld [vmem:[#allocation29] sm:$0xff] }
0x11f8   : > { %6547 = vmatprep.mubr.msk.f32.mxu1 %vm4292_vm5, %v4627_v61 }
0x11fb   : > { %6548 = vmatmul.mubr.msk.f32.gmra.mrb[60].mxu1 %vm4292_vm5, %v4628_v18 }
0x11fc   : > { %6550 = vmatprep.mubr.msk.f32.mxu1 %vm4292_vm5, %v4629_v44 }
0x11ff   : > { %6551 = vmatmul.mubr.msk.f32.gmra.mrb[62].mxu1 %vm4292_vm5, %v4630_v48  ;;  %v5167_v48 = vld [vmem:[%s9432_s3 + $0x8] sm:$0xff] }
0x1200   : > { %6572 = vmatprep.mubr.msk.f32.mxu1 %vm1132_vm0, %v4938_v59 }
0x12c6   : > { %v6543_v62 = vpop.f32.mrb[56].mxu1 }
0x12c7   : > { %v4775_v5 = vadd.f32 %v6543_v62, %v4647_v2  ;;  %v4769_v15 = vpop.f32.mrb[57].mxu1 }
0x12c8   : > { %v4770_v31 = vadd.f32 %v4769_v15, %v4642_v3  ;;  %v5166_v3 = vld [vmem:[%s9432_s3] sm:$0xff] }
0x12c9   : > { %v4809_v32 = vmax.f32 %v4775_v5, 0.0 }
0x12ca   : > { %v4808_v10 = vmax.f32 %v4770_v31, 0.0  ;;  %v6546_v55 = vpop.f32.mrb[58].mxu1 }
0x12cb   : > { %v4785_v20 = vadd.f32 %v6546_v55, %v4657_v22  ;;  %v4779_v26 = vpop.f32.mrb[59].mxu1 }
0x12cc   : > { %v6786_v4 = vpack.c.bf16 %v4809_v32, %v4808_v10  ;;  %v4780_v28 = vadd.f32 %v4779_v26, %v4652_v21 }
0x12cd   : > { %v4811_v37 = vmax.f32 %v4785_v20, 0.0 }
0x12ce   : > { %v4810_v33 = vmax.f32 %v4780_v28, 0.0  ;;  %v6549_v34 = vpop.f32.mrb[60].mxu1  ;;  %6787 = vmatprep.subr.bf16.mxu0 %v6786_v4 }
0x12cf   : > { %v4795_v30 = vadd.f32 %v6549_v34, %v4667_v7  ;;  %v4789_v56 = vpop.f32.mrb[61].mxu1  ;;  %6789 = vmatpush3.bf16.msra.mxu0 %v6786_v4 }
0x12d0   : > { %v6790_v16 = vpack.c.bf16 %v4811_v37, %v4810_v33  ;;  %v4790_v9 = vadd.f32 %v4789_v56, %v4662_v17 }
0x12d1   : > { %v4813_v52 = vmax.f32 %v4795_v30, 0.0 }
0x12d2   : > { %v4812_v53 = vmax.f32 %v4790_v9, 0.0  ;;  %v6552_v36 = vpop.f32.mrb[62].mxu1  ;;  %6791 = vmatprep.subr.bf16.mxu0 %v6790_v16 }
0x12d3   : > { %v4805_v58 = vadd.f32 %v6552_v36, %v4677_v29  ;;  %v4799_v27 = vpop.f32.mrb[63].mxu1  ;;  %6793 = vmatpush3.bf16.msra.mxu0 %v6790_v16 }
0x12d4   : > { %v6794_v63 = vpack.c.bf16 %v4813_v52, %v4812_v53  ;;  %v4800_v23 = vadd.f32 %v4799_v27, %v4672_v0  ;;  %6803 = vmatprep.subr.bf16.mxu0 %v9168_v1 }
0x12d5   : > { %v4815_v19 = vmax.f32 %v4805_v58, 0.0 }
0x12d6   : > { %v4814_v8 = vmax.f32 %v4800_v23, 0.0  ;;  %6795 = vmatprep.subr.bf16.mxu1 %v6794_v63  ;;  %6562 = vmatmul.mubr.msk.f32.vlgmr.msra.gmra.mrb[60].mxu0 %vm1132_vm0, %v4817_v14  ;;  %v5181_v14 = vstv %s5918_s30 }
0x12d7   : > { %6797 = vmatpush3.bf16.msra.mxu1 %v6794_v63  ;;  %6805 = vmatpush3.bf16.msra.mxu0 %v9168_v1  ;;  %v5071_v1 = vld [vmem:[#allocation28 + $0x8] sm:$0xff] }
0x12d8   : > { %v6798_v60 = vpack.c.bf16 %v4815_v19, %v4814_v8  ;;  %6807 = vmatprep.subr.bf16.mxu0 %v9172_v38  ;;  %6591 = vmatprep.mubr.msk.f32.mxu0 %vm4292_vm5, %v5070_v25 }
0x12da   : > { %6799 = vmatprep.subr.bf16.mxu1 %v6798_v60 }
0x12db   : > { %6801 = vmatpush3.bf16.msra.mxu1 %v6798_v60  ;;  %6809 = vmatpush3.bf16.msra.mxu0 %v9172_v38  ;;  %v4942_v38 = vld [vmem:[#allocation25 + $0x18] sm:$0xff] }
0x12dc   : > { %6811 = vmatprep.subr.bf16.mxu0 %v9176_v11 }
0x12de   : > { %6573 = vmatmul.mubr.msk.f32.vlgmr.msra.gmra.mrb[64].mxu1 %vm1132_vm0, %v4939_v39 }
0x12df   : > { %6813 = vmatpush3.bf16.msra.mxu0 %v9176_v11  ;;  %v5037_v11 = vld [vmem:[#allocation26 + $0x10] sm:$0xff] }
0x12e0   : > { %6815 = vmatprep.subr.bf16.mxu0 %v9180_v6 }
0x12e3   : > { %6817 = vmatpush3.bf16.msra.mxu0 %v9180_v6  ;;  %v5161_v6 = vld [vmem:[#allocation29 + $0x8] sm:$0xff] }
0x12e6   : > { %6592 = vmatmul.mubr.msk.f32.vlgmr.msra.gmra.mrb[62].mxu0 %vm4292_vm5, %v5071_v1 }
0x13a9   : > { %v6563_v12 = vpop.f32.mrb[60].mxu0 }
0x13aa   : > { %v4902_v41 = vpop.f32.mrb[61].mxu0 }
0x13b1   : > { %v6574_v43 = vpop.f32.mrb[64].mxu1 }
0x13b2   : > { %v5025_v50 = vpop.f32.mrb[65].mxu1 }
0x13b9   : > { %v6593_v40 = vpop.f32.mrb[62].mxu0 }
0x13ba   : > { %5155 = vadd.xlane.f32.xlu1 %v6593_v40  ;;  %v5144_v45 = vpop.f32.mrb[63].mxu0 }
0x13bb   : > { %5153 = vadd.xlane.f32.xlu0 %v5144_v45 }
0x13cb   : > { %4950 = vperm.xlu1 %7060, %v4942_v38   ;;  %v4935_v38 = vstv %s4934_s5 }
0x13cf   : > { %5046 = vperm.xlu1 %7060, %v5038_v46  }
0x13d1   : > { %4945 = vperm.xlu0 %7059, %v4941_v47  }
0x13d3   : > { %4827 = vperm.xlu1 %7060, %v4819_v49  }
0x13d5   : > { %5041 = vperm.xlu0 %7059, %v5037_v11  }
0x13d7   : > { %4922 = vperm.xlu1 %7060, %v4914_v51  }
0x13d9   : > { %4822 = vperm.xlu0 %7059, %v4818_v24  }
0x13dd   : > { %4917 = vperm.xlu0 %7059, %v4913_v42  }
0x1447   : > { %v5156_v35 = vpop.xlane.xlu1 %5155 }
0x1448   : > { %v5159_v54 = vmul.f32 0.0078125, %v5156_v35  ;;  %v5154_v61 = vpop.xlane.xlu0 %5153 }
0x1449   : > { %v5158_v18 = vmul.f32 0.0078125, %v5154_v61 }
0x144a   : > { %v5163_v44 = vadd.f32 %v5161_v6, %v5159_v54  ;;  %v5059_v54 = vstv %s5915_s12 }
0x144b   : > { %v5162_v13 = vadd.f32 %v5160_v57, %v5158_v18  ;;  %v4951_v59 = vpop.permute.xlu1 %4950 }
0x144c   : > { %v5165_v2 = vmax.f32 %v5163_v44, 0.0  ;;  %v5031_v22 = vadd.f32 %v6574_v43, %v4951_v59 }
0x144d   : > { %v5164_v62 = vmax.f32 %v5162_v13, 0.0 }
0x144e   : > { %v5169_v21 = vmul.f32 %v5167_v48, %v5165_v2  ;;  %v5035_v5 = vmax.f32 %v5031_v22, 0.0 }
0x144f   : > { %v5168_v15 = vmul.f32 %v5166_v3, %v5164_v62  ;;  %v5047_v31 = vpop.permute.xlu1 %5046 }
0x1450   : > { %v5172_v32 = vsel %vm5170_vm6, %v5169_v21, 0.0  ;;  %v5050_v10 = vmul.f32 %v5047_v31, %v5035_v5  ;;  %v4946_v55 = vpop.permute.xlu0 %4945  ;;  %v5303_v5 = vld [vmem:[%s9012_s16] sm:$0xff] (%p9434_p5)  ;;  %v5307_v31 = vld [vmem:[%s9012_s16 + $0x10] sm:$0xff] (%p9434_p5) }
0x1451   : > { %v5171_v20 = vsel %vm5170_vm6, %v5168_v15, 0.0  ;;  %v5026_v26 = vadd.f32 %v5025_v50, %v4946_v55  ;;  %v5305_v15 = vld [vmem:[%s9012_s16 + $0x8] sm:$0xff] (%p9434_p5)  ;;  %5304 = vst [vmem:[%s9225_s22] sm:$0xff] (%p9434_p5), %v5303_v5  ;;  %5308 = vst [vmem:[%s9225_s22 + $0x10] sm:$0xff] (%p9434_p5), %v5307_v31 }
0x1452   : > { %v5173_v7 = vadd.f32 %v5172_v32, %v5171_v20  ;;  %v5309_v32 = vld [vmem:[%s9012_s16 + $0x18] sm:$0xff] (%p9434_p5)  ;;  %v5313_v55 = vld [vmem:[%s9012_s16 + $0x28] sm:$0xff] (%p9434_p5)  ;;  %5306 = vst [vmem:[%s9225_s22 + $0x8] sm:$0xff] (%p9434_p5), %v5305_v15  ;;  %v5315_v20 = vld [vmem:[%s9012_s16 + $0x30] sm:$0xff] (%p9434_p5) }
0x1453   : > { %v5034_v4 = vmax.f32 %v5026_v26, 0.0  ;;  %v4828_v28 = vpop.permute.xlu1 %4827  ;;  %5310 = vst [vmem:[%s9225_s22 + $0x18] sm:$0xff] (%p9434_p5), %v5309_v32  ;;  %5314 = vst [vmem:[%s9225_s22 + $0x28] sm:$0xff] (%p9434_p5), %v5313_v55  ;;  %v5317_v26 = vld [vmem:[%s9012_s16 + $0x38] sm:$0xff] (%p9434_p5) }
0x1454   : > { %v5174_v17 = vrot.slane %v5173_v7, 4  ;;  %v5042_v37 = vpop.permute.xlu0 %5041  ;;  %v4908_v33 = vadd.f32 %v6563_v12, %v4828_v28  ;;  %5316 = vst [vmem:[%s9225_s22 + $0x30] sm:$0xff] (%p9434_p5), %v5315_v20  ;;  %5318 = vst [vmem:[%s9225_s22 + $0x38] sm:$0xff] (%p9434_p5), %v5317_v26  ;;  %v5323_v28 = vld [vmem:[%s9012_s16 + $0x50] sm:$0xff] (%p9434_p5) }
0x1455   : > { %v5049_v34 = vmul.f32 %v5042_v37, %v5034_v4  ;;  %v5321_v4 = vld [vmem:[%s9012_s16 + $0x48] sm:$0xff] (%p9434_p5)  ;;  %5324 = vst [vmem:[%s9225_s22 + $0x90] sm:$0xff] (%p9434_p5), %v5323_v28  ;;  %v5327_v37 = vld [vmem:[%s9012_s16 + $0x60] sm:$0xff] (%p9434_p5) }
0x1456   : > { %v5175_v30 = vadd.f32 %v5174_v17, %v5173_v7  ;;  %v4912_v52 = vmax.f32 %v4908_v33, 0.0  ;;  %v5319_v7 = vld [vmem:[%s9012_s16 + $0x40] sm:$0xff] (%p9434_p5)  ;;  %v5325_v17 = vld [vmem:[%s9012_s16 + $0x58] sm:$0xff] (%p9434_p5)  ;;  %5322 = vst [vmem:[%s9225_s22 + $0x88] sm:$0xff] (%p9434_p5), %v5321_v4  ;;  %v5329_v33 = vld [vmem:[%s9012_s16 + $0x68] sm:$0xff] (%p9434_p5) }
0x1457   : > { %v5051_v56 = vadd.f32 %v5050_v10, %v5049_v34  ;;  %v4923_v36 = vpop.permute.xlu1 %4922  ;;  %v5311_v10 = vld [vmem:[%s9012_s16 + $0x20] sm:$0xff] (%p9434_p5)  ;;  %5320 = vst [vmem:[%s9225_s22 + $0x80] sm:$0xff] (%p9434_p5), %v5319_v7  ;;  %5326 = vst [vmem:[%s9225_s22 + $0x98] sm:$0xff] (%p9434_p5), %v5325_v17  ;;  %v5331_v34 = vld [vmem:[%s9012_s16 + $0x70] sm:$0xff] (%p9434_p5) }
0x1458   : > { %v5176_v16 = vrot.slane %v5175_v30, 2  ;;  %v4823_v9 = vpop.permute.xlu0 %4822  ;;  %v4926_v63 = vmul.f32 %v4923_v36, %v4912_v52  ;;  %5312 = vst [vmem:[%s9225_s22 + $0x20] sm:$0xff] (%p9434_p5), %v5311_v10  ;;  %5328 = vst [vmem:[%s9225_s22 + $0xa0] sm:$0xff] (%p9434_p5), %v5327_v37  ;;  %v5341_v52 = vld [vmem:[%s9012_s16 + $0x98] sm:$0xff] (%p9434_p5)  ;;  %v5347_v36 = vld [vmem:[%s9012_s16 + $0xb0] sm:$0xff] (%p9434_p5) }
0x1459   : > { %v4903_v29 = vadd.f32 %v4902_v41, %v4823_v9  ;;  %v5052_v11 = vrot.slane %v5051_v56, 4  ;;  %5330 = vst [vmem:[%s9225_s22 + $0xa8] sm:$0xff] (%p9434_p5), %v5329_v33  ;;  %5332 = vst [vmem:[%s9225_s22 + $0xb0] sm:$0xff] (%p9434_p5), %v5331_v34  ;;  %v5339_v9 = vld [vmem:[%s9012_s16 + $0x90] sm:$0xff] (%p9434_p5) }
0x145a   : > { %v5177_v53 = vadd.f32 %v5176_v16, %v5175_v30  ;;  %v5333_v30 = vld [vmem:[%s9012_s16 + $0x78] sm:$0xff] (%p9434_p5)  ;;  %v5337_v16 = vld [vmem:[%s9012_s16 + $0x88] sm:$0xff] (%p9434_p5)  ;;  %5340 = vst [vmem:[%s9225_s22 + $0x110] sm:$0xff] (%p9434_p5), %v5339_v9  ;;  %5342 = vst [vmem:[%s9225_s22 + $0x118] sm:$0xff] (%p9434_p5), %v5341_v52 }
0x145b   : > { %v4911_v0 = vmax.f32 %v4903_v29, 0.0  ;;  %v5053_v51 = vadd.f32 %v5052_v11, %v5051_v56  ;;  %v5335_v56 = vld [vmem:[%s9012_s16 + $0x80] sm:$0xff] (%p9434_p5)  ;;  %5334 = vst [vmem:[%s9225_s22 + $0xb8] sm:$0xff] (%p9434_p5), %v5333_v30  ;;  %5338 = vst [vmem:[%s9225_s22 + $0x108] sm:$0xff] (%p9434_p5), %v5337_v16 }
0x145c   : > { %v5178_v58 = vrot.slane %v5177_v53, 1  ;;  %v4918_v27 = vpop.permute.xlu0 %4917  ;;  %5336 = vst [vmem:[%s9225_s22 + $0x100] sm:$0xff] (%p9434_p5), %v5335_v56  ;;  %v5343_v29 = vld [vmem:[%s9012_s16 + $0xa0] sm:$0xff] (%p9434_p5)  ;;  %5348 = vst [vmem:[%s9225_s22 + $0x130] sm:$0xff] (%p9434_p5), %v5347_v36 }
0x145d   : > { %v4925_v23 = vmul.f32 %v4918_v27, %v4911_v0  ;;  %v5054_v24 = vrot.slane %v5053_v51, 2  ;;  %5344 = vst [vmem:[%s9225_s22 + $0x120] sm:$0xff] (%p9434_p5), %v5343_v29  ;;  %v5349_v0 = vld [vmem:[%s9012_s16 + $0xb8] sm:$0xff] (%p9434_p5)  ;;  %v5353_v27 = vld [vmem:[%s9012_s16 + $0xc8] sm:$0xff] (%p9434_p5) }
0x145e   : > { %v5179_v19 = vadd.f32 %v5178_v58, %v5177_v53  ;;  %v5345_v53 = vld [vmem:[%s9012_s16 + $0xa8] sm:$0xff] (%p9434_p5)  ;;  %5350 = vst [vmem:[%s9225_s22 + $0x138] sm:$0xff] (%p9434_p5), %v5349_v0  ;;  %v5351_v58 = vld [vmem:[%s9012_s16 + $0xc0] sm:$0xff] (%p9434_p5)  ;;  %5354 = vst [vmem:[%s9225_s22 + $0x188] sm:$0xff] (%p9434_p5), %v5353_v27 }
0x145f   : > { %v4927_v25 = vadd.f32 %v4926_v63, %v4925_v23  ;;  %v5055_v42 = vadd.f32 %v5054_v24, %v5053_v51  ;;  %5346 = vst [vmem:[%s9225_s22 + $0x128] sm:$0xff] (%p9434_p5), %v5345_v53  ;;  %5352 = vst [vmem:[%s9225_s22 + $0x180] sm:$0xff] (%p9434_p5), %v5351_v58  ;;  %v5357_v63 = vld [vmem:[%s9012_s16 + $0xd8] sm:$0xff] (%p9434_p5)  ;;  %v5359_v23 = vld [vmem:[%s9012_s16 + $0xe0] sm:$0xff] (%p9434_p5) }
0x1460   : > { %v5182_v8 = vadd.f32 %v5181_v14, %v5179_v19  ;;  %v5355_v14 = vld [vmem:[%s9012_s16 + $0xd0] sm:$0xff] (%p9434_p5)  ;;  %v5361_v19 = vld [vmem:[%s9012_s16 + $0xe8] sm:$0xff] (%p9434_p5)  ;;  %5358 = vst [vmem:[%s9225_s22 + $0x198] sm:$0xff] (%p9434_p5), %v5357_v63  ;;  %5360 = vst [vmem:[%s9225_s22 + $0x1a0] sm:$0xff] (%p9434_p5), %v5359_v23 }
0x1461   : > { %v4928_v60 = vrot.slane %v4927_v25, 4  ;;  %v5056_v6 = vrot.slane %v5055_v42, 1  ;;  %5356 = vst [vmem:[%s9225_s22 + $0x190] sm:$0xff] (%p9434_p5), %v5355_v14  ;;  %5362 = vst [vmem:[%s9225_s22 + $0x1a8] sm:$0xff] (%p9434_p5), %v5361_v19 }
0x1462   : > { %v5183_v39 = vsub.f32 0.0, %v5182_v8  ;;  %v5365_v8 = vld [vmem:[%s9012_s16 + $0xf8] sm:$0xff] (%p9434_p5) }
0x1463   : > { %v4929_v1 = vadd.f32 %v4928_v60, %v4927_v25  ;;  %v5057_v35 = vadd.f32 %v5056_v6, %v5055_v42  ;;  %v5363_v25 = vld [vmem:[%s9012_s16 + $0xf0] sm:$0xff] (%p9434_p5)  ;;  %5366 = vst [vmem:[%s9225_s22 + $0x1b8] sm:$0xff] (%p9434_p5), %v5365_v8 }
0x1464   : > { %v5184_v12 = vmul.f32 1.442695, %v5183_v39  ;;  %5364 = vst [vmem:[%s9225_s22 + $0x1b0] sm:$0xff] (%p9434_p5), %v5363_v25 }
0x1465   : > { %v4930_v40 = vrot.slane %v4929_v1, 2  ;;  %v5060_v57 = vadd.f32 %v5059_v54, %v5057_v35 }
0x1466   : > { %7197 = vpow2.f32 %v5184_v12 }
0x1467   : > { %v4931_v41 = vadd.f32 %v4930_v40, %v4929_v1  ;;  %v5061_v61 = vand.u32 2147483647, %v5060_v57  ;;  %v5068_v3 = vmax.f32 %v5060_v57, 0.0 }
0x1469   : > { %v4932_v45 = vrot.slane %v4931_v41, 1  ;;  %v5062_v18 = vsub.f32 0.0, %v5061_v61 }
0x146b   : > { %v4933_v43 = vadd.f32 %v4932_v45, %v4931_v41  ;;  %v5063_v44 = vmul.f32 1.442695, %v5062_v18 }
0x146d   : > { %v4936_v46 = vadd.f32 %v4935_v38, %v4933_v43 }
0x146f   : > { %5189 = vst [vmem:[%s1044_s26] sm:$0x1] %v4936_v46 }
0x1470   : > { %v7198_v47 = vpop.eup %7197 }
0x1471   : > { %v5186_v49 = vadd.f32 1.0, %v7198_v47 }
0x1473   : > { %7199 = vrcp.f32 %v5186_v49 }
0x1474   : > { %7201 = vpow2.f32 %v5063_v44 }
0x147d   : > { %v7200_v50 = vpop.eup %7199 }
0x147e   : > { %5192 = vperm.xlu0 %7059, %v7200_v50   ;;  %v7202_v48 = vpop.eup %7201 }
0x147f   : > { %v5065_v13 = vadd.f32 1.0, %v7202_v48 }
0x1481   : > { %7203 = vlog2.f32 %v5065_v13 }
0x148b   : > { %v7204_v59 = vpop.eup %7203 }
0x148c   : > { %v5067_v2 = vmul.f32 0.6931472, %v7204_v59 }
0x148e   : > { %v5069_v22 = vadd.f32 %v5068_v3, %v5067_v2 }
0x14fa   : > { %5210 = sbr.rel (!%p9434_p5) target bundleno = 5377 (0x1501), region = 200 }
0x14fd   : > { %v5193_v62 = vpop.permute.xlu0 %5192 }
0x14fe   : > { %v5195_v21 = vmul.f32 %v5193_v62, %v5069_v22 }
0x1500   : > { %5196 = vst [vmem:[%s1044_s26 + $0x1] sm:$0x1] %v5195_v21 }
0x1501 PF: > { %s9437_s29 = sld [smem:[#allocation45_spill]]  ;;  %s9438_s2 = sld [smem:[#allocation46_spill]] }
0x1502   : > { %p46_p2 = scmp.ge.s32.totalorder %s8386_s8, 4   ;;  %s9439_s6 = smov %s8398_s0 }
0x1503   : > { %s9440_s30 = smov %s8386_s8 }
0x1504   :  { %48 = sbr.rel (!%p46_p2) target bundleno = 30 (0x1e), region = 313 }
0x150b   :  { %5389 = vsyncpa [#allocation3], 1 }
0x150c   :  { %5391 = vsyncpa [#allocation3 + $0x1], 1 }
0x150d   :  { %5392 = vsyncpa [#allocation6], 1 }
0x150e   :  { %5393 = vsyncpa [#allocation9], 1 }
0x150f   :  { %5394 = vsyncpa [#allocation12], 1 }
0x1510   :  { %5395 = vsyncpa [#allocation15], 1 }
0x1511   :  { %5396 = vsyncpa [#allocation18], 1 }
0x1512   :  { %5397 = vsyncpa [#allocation21], 1 }
0x1513   :  { %5398 = vsyncpa [#allocation24], 1 }
0x1514   :  { %5399 = vsyncpa [#allocation27], 1 }
0x1515   :  { %5400 = vsyncpa [#allocation30], 1 }
0x1516   :  { %5401 = vsyncpa [#allocation4], 1 }
0x1517   :  { %5403 = vsyncpa [#allocation4 + $0x1], 1 }

</bundles_post_ra>
